<compile_context>
chip_gen: v6e
topology: v6e:2x2x1
jax: 0.10.0
libtpu: 0.0.40
codegen_flags: <defaults>
</compile_context>

<pallas_src>
import functools

import jax
import jax.numpy as jnp
from jax.experimental import pallas as pl
from jax.experimental.pallas import tpu as pltpu


_MAX_GROUPS = 16                       # unrolled group-loop bound (grouped path)
_MAX_POOL_BYTES = 2 * 1024 * 1024      # cap on the (L, k) pooling matrix


# --------------------------------------------------------------------------- #
# Kernels
# --------------------------------------------------------------------------- #
def _se_kernel_chw(x_ref, w1_ref, b1_ref, w2_ref, b2_ref, o_ref, *, inv_hw):
    """Layout (Bt, C, HW): spatial on lanes (lane-dense when HW % 128 == 0)."""
    xf = x_ref[...].astype(jnp.float32)                         # (Bt, C, HW)
    m = jnp.sum(xf, axis=2) * inv_hw                            # (Bt, C)
    h = jnp.dot(m, w1_ref[...], preferred_element_type=jnp.float32) + b1_ref[...]
    h = jnp.maximum(h, 0.0)
    s = jnp.dot(h, w2_ref[...], preferred_element_type=jnp.float32) + b2_ref[...]
    s = jax.nn.sigmoid(s)                                       # (Bt, C)
    # Second read of x; multiply in f32, cast only the product.
    o_ref[...] = (x_ref[...].astype(jnp.float32) * s[:, :, None]).astype(o_ref.dtype)


def _se_kernel_grouped(x_ref, p_ref, pt_ref, w1_ref, b1_ref, w2_ref, b2_ref,
                       o_ref, *, inv_hw, groups):
    """Layout (Bt, G, L) with L = k*HW a multiple of 128 (lane-dense).

    p_ref  (L, k):  p[l, kk] = 1 iff lane l belongs to sub-channel kk (0/1).
    pt_ref (k, L):  transpose of p (broadcasts the gate back over lanes).
    w1_ref (G, k, Ch), b1_ref (1, Ch), w2_ref (G, Ch, k), b2_ref (G, 1, k).
    """
    bt = x_ref.shape[0]
    ch = b1_ref.shape[1]
    p = p_ref[...]
    pt = pt_ref[...]

    # ---- Squeeze + FC1, accumulated over channel groups ----
    h = jnp.zeros((bt, ch), jnp.float32)
    for g in range(groups):
        xg = x_ref[:, g, :].astype(jnp.float32)                             # (Bt, L)
        mg = jnp.dot(xg, p, preferred_element_type=jnp.float32) * inv_hw    # (Bt, k)
        h = h + jnp.dot(mg, w1_ref[g], preferred_element_type=jnp.float32)  # (Bt, Ch)
    h = jnp.maximum(h + b1_ref[...], 0.0)

    # ---- FC2 + sigmoid + scale, one channel group at a time ----
    for g in range(groups):
        sg = jnp.dot(h, w2_ref[g], preferred_element_type=jnp.float32) + b2_ref[g]
        sg = jax.nn.sigmoid(sg)                                             # (Bt, k)
        gate = jnp.dot(sg, pt, preferred_element_type=jnp.float32)          # (Bt, L)
        o_ref[:, g, :] = (x_ref[:, g, :].astype(jnp.float32) * gate).astype(o_ref.dtype)


# --------------------------------------------------------------------------- #
# Planning helpers
# --------------------------------------------------------------------------- #
def _plan_groups(C, HW):
    """Pick (G, k, L): fold k channels into the lane axis so L = k*HW % 128 == 0.

    Prefer the largest feasible group count (<= _MAX_GROUPS): a smaller k means
    less redundant MXU work in the pooling matmuls."""
    for G in range(min(_MAX_GROUPS, C), 0, -1):
        if C % G:
            continue
        k = C // G
        L = k * HW
        if L % 128:
            continue
        if L * k * 4 > _MAX_POOL_BYTES:
            continue
        return G, k, L
    return None


def _vmem_config():
    """Generation-aware (vmem_limit_bytes, per-block target bytes, two_cores)."""
    try:
        cap = int(pltpu.get_tpu_info().vmem_capacity_bytes)
    except Exception:
        cap = 64 * 1024 * 1024
    if cap >= 96 * 1024 * 1024:            # v5e / v6e class: 128 MiB, 1 TC
        return 100 * 1024 * 1024, 12 * 1024 * 1024, False
    # v7x class: 64 MiB per TensorCore, 2 TCs per chip
    return 44 * 1024 * 1024, 5 * 1024 * 1024, True


def _choose_batch_tile(B, per_image_bytes, resident_bytes, vmem_limit,
                       block_target, two_cores):
    """How many images per grid step (always an exact divisor of B)."""
    # x block + out block, each double-buffered by the pipeline -> 4x per image,
    # plus the resident weight / pooling blocks, plus compiler scratch headroom.
    avail = int(vmem_limit * 0.75) - resident_bytes
    bt_cap = max(1, avail // (4 * per_image_bytes))
    bt_cap = min(bt_cap, max(1, block_target // per_image_bytes), B)
    if two_cores and B >= 2:
        bt_cap = min(bt_cap, max(1, B // 2))   # keep >= 2 grid steps for 2 TCs
    # Exact divisor of B: no jnp.pad / out[:B] full-tensor copies, ever.
    bt = 1
    for d in range(1, B + 1):
        if B % d == 0 and d <= bt_cap:
            bt = d
    if two_cores:
        # Prefer an even number of grid steps so both TensorCores get equal work.
        for d in range(bt, 0, -1):
            if B % d == 0 and d <= bt_cap and ((B // d) % 2 == 0):
                bt = d
                break
    return bt


# --------------------------------------------------------------------------- #
# Wrapper
# --------------------------------------------------------------------------- #
def se_layer(x_nchw, w1, b1, w2, b2):
    """SE forward.

    x_nchw: (B, C, H, W)   f32 or bf16 (output dtype matches the input)
    w1:     (C, Ch)        (transposed PyTorch fc[0].weight)
    b1:     (Ch,) or (1, Ch)
    w2:     (Ch, C)        (transposed PyTorch fc[2].weight)
    b2:     (C,) or (1, C)
    """
    B, C, H, W = x_nchw.shape
    HW = H * W
    Ch = w1.shape[1]
    dtype = x_nchw.dtype
    itemsize = jnp.dtype(dtype).itemsize

    w1 = w1.astype(jnp.float32)
    w2 = w2.astype(jnp.float32)
    b1 = b1.reshape(1, Ch).astype(jnp.float32)
    b2 = b2.reshape(-1).astype(jnp.float32)

    vmem_limit, block_target, two_cores = _vmem_config()
    per_image = C * HW * itemsize
    inv_hw = 1.0 / float(HW)

    plan = None if HW % 128 == 0 else _plan_groups(C, HW)

    compiler_params = pltpu.CompilerParams(
        dimension_semantics=("parallel",),
        vmem_limit_bytes=vmem_limit,
    )

    if plan is None:
        # (B, C, HW): lane-dense when HW % 128 == 0; masked-store fallback else.
        x = x_nchw.reshape(B, C, HW)
        b2m = b2.reshape(1, C)
        resident = 2 * 4 * (C * Ch + Ch + Ch * C + C)
        Bt = _choose_batch_tile(B, per_image, resident, vmem_limit,
                                block_target, two_cores)
        nb = B // Bt
        kernel = functools.partial(_se_kernel_chw, inv_hw=inv_hw)
        out = pl.pallas_call(
            kernel,
            out_shape=jax.ShapeDtypeStruct((B, C, HW), dtype),
            grid_spec=pltpu.PrefetchScalarGridSpec(
                num_scalar_prefetch=0,
                grid=(nb,),
                in_specs=[
                    pl.BlockSpec((Bt, C, HW), lambda b: (b, 0, 0)),   # x
                    pl.BlockSpec((C, Ch), lambda b: (0, 0)),          # W1^T
                    pl.BlockSpec((1, Ch), lambda b: (0, 0)),          # b1
                    pl.BlockSpec((Ch, C), lambda b: (0, 0)),          # W2^T
                    pl.BlockSpec((1, C), lambda b: (0, 0)),           # b2
                ],
                out_specs=pl.BlockSpec((Bt, C, HW), lambda b: (b, 0, 0)),
            ),
            compiler_params=compiler_params,
        )(x, w1, b1, w2, b2m)
        return out.reshape(B, C, H, W)

    # Grouped lane-dense path: (B, G, L), L = k*HW, L % 128 == 0.
    G, k, L = plan
    x = x_nchw.reshape(B, G, L)                                   # free reshape
    w1g = w1.reshape(G, k, Ch)                                    # (G, k, Ch)
    w2g = jnp.transpose(w2.reshape(Ch, G, k), (1, 0, 2))          # (G, Ch, k)
    b2g = b2.reshape(G, 1, k)                                     # (G, 1, k)
    lane_ch = jnp.arange(L, dtype=jnp.int32) // HW
    pool = (lane_ch[:, None] == jnp.arange(k, dtype=jnp.int32)[None, :]
            ).astype(jnp.float32)                                 # (L, k)
    pool_t = pool.T                                               # (k, L)

    resident = 2 * 4 * (2 * L * k + G * k * Ch + Ch + G * Ch * k + G * k)
    Bt = _choose_batch_tile(B, per_image, resident, vmem_limit,
                            block_target, two_cores)
    nb = B // Bt
    kernel = functools.partial(_se_kernel_grouped, inv_hw=inv_hw, groups=G)
    out = pl.pallas_call(
        kernel,
        out_shape=jax.ShapeDtypeStruct((B, G, L), dtype),
        grid_spec=pltpu.PrefetchScalarGridSpec(
            num_scalar_prefetch=0,
            grid=(nb,),
            in_specs=[
                pl.BlockSpec((Bt, G, L), lambda b: (b, 0, 0)),        # x (folded)
                pl.BlockSpec((L, k), lambda b: (0, 0)),               # pool
                pl.BlockSpec((k, L), lambda b: (0, 0)),               # pool^T
                pl.BlockSpec((G, k, Ch), lambda b: (0, 0, 0)),        # W1^T (grouped)
                pl.BlockSpec((1, Ch), lambda b: (0, 0)),              # b1
                pl.BlockSpec((G, Ch, k), lambda b: (0, 0, 0)),        # W2^T (grouped)
                pl.BlockSpec((G, 1, k), lambda b: (0, 0, 0)),         # b2 (grouped)
            ],
            out_specs=pl.BlockSpec((Bt, G, L), lambda b: (b, 0, 0)),
        ),
        compiler_params=compiler_params,
    )(x, pool, pool_t, w1g, b1, w2g, b2g)
    return out.reshape(B, C, H, W)


# --------------------------------------------------------------------------- #
# Reference + self-test
# --------------------------------------------------------------------------- #
def reference_se(x_nchw, w1, b1, w2, b2):
    """Pure-JAX f32 reference."""
    xf = x_nchw.astype(jnp.float32)
    y = jnp.mean(xf, axis=(2, 3))
    y = jnp.maximum(y @ w1.astype(jnp.float32) + b1.reshape(-1).astype(jnp.float32), 0.0)
    y = jax.nn.sigmoid(y @ w2.astype(jnp.float32) + b2.reshape(-1).astype(jnp.float32))
    return xf * y[:, :, None, None]


if __name__ == "__main__":
    key = jax.random.PRNGKey(0)

    def make_inputs(k_, B, C, H, W, reduction, dtype):
        Ch = max(1, C // reduction)
        kx, k1, k2, k3, k4 = jax.random.split(k_, 5)
        x = jax.random.normal(kx, (B, C, H, W), dtype=jnp.float32).astype(dtype)
        w1 = jax.random.normal(k1, (C, Ch), dtype=jnp.float32) * (1.0 / jnp.sqrt(C))
        b1 = jax.random.normal(k2, (Ch,), dtype=jnp.float32) * 0.1
        w2 = jax.random.normal(k3, (Ch, C), dtype=jnp.float32) * (1.0 / jnp.sqrt(Ch))
        b2 = jax.random.normal(k4, (C,), dtype=jnp.float32) * 0.1
        return x, w1, b1, w2, b2

    cases = [
        # (B, C, H, W, reduction, dtype, atol, rtol)      path exercised
        (2, 32, 8, 8, 16, jnp.float32, 1e-4, 1e-4),   # grouped lane-dense (HW=64)
        (3, 16, 16, 16, 4, jnp.float32, 1e-4, 1e-4),  # NCHW lane-dense (HW=256), odd B
        (4, 64, 8, 8, 16, jnp.bfloat16, 3e-2, 3e-2),  # bf16 activations, grouped path
        (2, 24, 5, 5, 4, jnp.float32, 1e-4, 1e-4),    # masked-store fallback (HW=25)
    ]
    for i, (B, C, H, W, r, dt, atol, rtol) in enumerate(cases):
        key, sub = jax.random.split(key)
        x, w1, b1, w2, b2 = make_inputs(sub, B, C, H, W, r, dt)
        out = jax.block_until_ready(se_layer(x, w1, b1, w2, b2))
        assert out.shape == (B, C, H, W) and out.dtype == dt
        ref = reference_se(x, w1, b1, w2, b2)
        ok = jnp.allclose(out.astype(jnp.float32), ref, atol=atol, rtol=rtol)
        assert bool(ok), f"mismatch vs reference in case {i}"

    print("KERNEL_OK")
</pallas_src>

<mosaic_0001>
module attributes {stable_mosaic.version = 11 : i64} {
  func.func @_se_kernel_grouped(%arg0: i32, %arg1: memref<1x16x128xf32, #tpu.memory_space<vmem>>, %arg2: memref<128x2xf32, #tpu.memory_space<vmem>>, %arg3: memref<2x128xf32, #tpu.memory_space<vmem>>, %arg4: memref<16x2x2xf32, #tpu.memory_space<vmem>>, %arg5: memref<1x2xf32, #tpu.memory_space<vmem>>, %arg6: memref<16x2x2xf32, #tpu.memory_space<vmem>>, %arg7: memref<16x1x2xf32, #tpu.memory_space<vmem>>, %arg8: memref<1x16x128xf32, #tpu.memory_space<vmem>>) attributes {dimension_semantics = [#tpu.dimension_semantics<parallel>], iteration_bounds = array<i64: 2>, scalar_prefetch = 0 : i64, scratch_operands = 0 : i64, tpu.core_type = #tpu.core_type<tc>, window_params = [{transform_indices = @transform_0, window_bounds = array<i64: 1, 16, 128>}, {pipeline_mode = #tpu.pipeline_mode<synchronous>, transform_indices = @transform_1, window_bounds = array<i64: 128, 2>}, {pipeline_mode = #tpu.pipeline_mode<synchronous>, transform_indices = @transform_2, window_bounds = array<i64: 2, 128>}, {pipeline_mode = #tpu.pipeline_mode<synchronous>, transform_indices = @transform_3, window_bounds = array<i64: 16, 2, 2>}, {pipeline_mode = #tpu.pipeline_mode<synchronous>, transform_indices = @transform_4, window_bounds = array<i64: 1, 2>}, {pipeline_mode = #tpu.pipeline_mode<synchronous>, transform_indices = @transform_5, window_bounds = array<i64: 16, 2, 2>}, {pipeline_mode = #tpu.pipeline_mode<synchronous>, transform_indices = @transform_6, window_bounds = array<i64: 16, 1, 2>}, {transform_indices = @transform_7, window_bounds = array<i64: 1, 16, 128>}]} {
    %c0 = arith.constant 0 : index
    %c0_0 = arith.constant 0 : index
    %0 = vector.load %arg2[%c0, %c0_0] : memref<128x2xf32, #tpu.memory_space<vmem>>, vector<128x2xf32>
    %c0_1 = arith.constant 0 : index
    %c0_2 = arith.constant 0 : index
    %1 = vector.load %arg3[%c0_1, %c0_2] : memref<2x128xf32, #tpu.memory_space<vmem>>, vector<2x128xf32>
    %cst = arith.constant 0.000000e+00 : f32
    %2 = vector.broadcast %cst : f32 to vector<1x2xf32>
    %c0_3 = arith.constant 0 : index
    %c0_4 = arith.constant 0 : index
    %c0_5 = arith.constant 0 : index
    %3 = vector.load %arg1[%c0_3, %c0_4, %c0_5] : memref<1x16x128xf32, #tpu.memory_space<vmem>>, vector<1x1x128xf32>
    %4 = vector.shape_cast %3 : vector<1x1x128xf32> to vector<1x128xf32>
    %cst_6 = arith.constant dense<0.000000e+00> : vector<1x2xf32>
    %5 = tpu.matmul %4, %0, %cst_6 {dimension_numbers = #tpu.dot_dimension_numbers<[1], [0], [0], [1], [0, 0, 1, 1], [], []>} : vector<1x128xf32>, vector<128x2xf32>, vector<1x2xf32> -> vector<1x2xf32>
    %cst_7 = arith.constant 1.562500e-02 : f32
    %6 = vector.broadcast %cst_7 : f32 to vector<1x2xf32>
    %7 = arith.mulf %5, %6 : vector<1x2xf32>
    %c0_8 = arith.constant 0 : index
    %c0_9 = arith.constant 0 : index
    %c0_10 = arith.constant 0 : index
    %8 = vector.load %arg4[%c0_8, %c0_9, %c0_10] : memref<16x2x2xf32, #tpu.memory_space<vmem>>, vector<1x2x2xf32>
    %9 = vector.shape_cast %8 : vector<1x2x2xf32> to vector<2x2xf32>
    %cst_11 = arith.constant dense<0.000000e+00> : vector<1x2xf32>
    %10 = tpu.matmul %7, %9, %cst_11 {dimension_numbers = #tpu.dot_dimension_numbers<[1], [0], [0], [1], [0, 0, 1, 1], [], []>} : vector<1x2xf32>, vector<2x2xf32>, vector<1x2xf32> -> vector<1x2xf32>
    %11 = arith.addf %2, %10 : vector<1x2xf32>
    %c0_12 = arith.constant 0 : index
    %c1 = arith.constant 1 : index
    %c0_13 = arith.constant 0 : index
    %12 = vector.load %arg1[%c0_12, %c1, %c0_13] : memref<1x16x128xf32, #tpu.memory_space<vmem>>, vector<1x1x128xf32>
    %13 = vector.shape_cast %12 : vector<1x1x128xf32> to vector<1x128xf32>
    %cst_14 = arith.constant dense<0.000000e+00> : vector<1x2xf32>
    %14 = tpu.matmul %13, %0, %cst_14 {dimension_numbers = #tpu.dot_dimension_numbers<[1], [0], [0], [1], [0, 0, 1, 1], [], []>} : vector<1x128xf32>, vector<128x2xf32>, vector<1x2xf32> -> vector<1x2xf32>
    %cst_15 = arith.constant 1.562500e-02 : f32
    %15 = vector.broadcast %cst_15 : f32 to vector<1x2xf32>
    %16 = arith.mulf %14, %15 : vector<1x2xf32>
    %c1_16 = arith.constant 1 : index
    %c0_17 = arith.constant 0 : index
    %c0_18 = arith.constant 0 : index
    %17 = vector.load %arg4[%c1_16, %c0_17, %c0_18] : memref<16x2x2xf32, #tpu.memory_space<vmem>>, vector<1x2x2xf32>
    %18 = vector.shape_cast %17 : vector<1x2x2xf32> to vector<2x2xf32>
    %cst_19 = arith.constant dense<0.000000e+00> : vector<1x2xf32>
    %19 = tpu.matmul %16, %18, %cst_19 {dimension_numbers = #tpu.dot_dimension_numbers<[1], [0], [0], [1], [0, 0, 1, 1], [], []>} : vector<1x2xf32>, vector<2x2xf32>, vector<1x2xf32> -> vector<1x2xf32>
    %20 = arith.addf %11, %19 : vector<1x2xf32>
    %c0_20 = arith.constant 0 : index
    %c2 = arith.constant 2 : index
    %c0_21 = arith.constant 0 : index
    %21 = vector.load %arg1[%c0_20, %c2, %c0_21] : memref<1x16x128xf32, #tpu.memory_space<vmem>>, vector<1x1x128xf32>
    %22 = vector.shape_cast %21 : vector<1x1x128xf32> to vector<1x128xf32>
    %cst_22 = arith.constant dense<0.000000e+00> : vector<1x2xf32>
    %23 = tpu.matmul %22, %0, %cst_22 {dimension_numbers = #tpu.dot_dimension_numbers<[1], [0], [0], [1], [0, 0, 1, 1], [], []>} : vector<1x128xf32>, vector<128x2xf32>, vector<1x2xf32> -> vector<1x2xf32>
    %cst_23 = arith.constant 1.562500e-02 : f32
    %24 = vector.broadcast %cst_23 : f32 to vector<1x2xf32>
    %25 = arith.mulf %23, %24 : vector<1x2xf32>
    %c2_24 = arith.constant 2 : index
    %c0_25 = arith.constant 0 : index
    %c0_26 = arith.constant 0 : index
    %26 = vector.load %arg4[%c2_24, %c0_25, %c0_26] : memref<16x2x2xf32, #tpu.memory_space<vmem>>, vector<1x2x2xf32>
    %27 = vector.shape_cast %26 : vector<1x2x2xf32> to vector<2x2xf32>
    %cst_27 = arith.constant dense<0.000000e+00> : vector<1x2xf32>
    %28 = tpu.matmul %25, %27, %cst_27 {dimension_numbers = #tpu.dot_dimension_numbers<[1], [0], [0], [1], [0, 0, 1, 1], [], []>} : vector<1x2xf32>, vector<2x2xf32>, vector<1x2xf32> -> vector<1x2xf32>
    %29 = arith.addf %20, %28 : vector<1x2xf32>
    %c0_28 = arith.constant 0 : index
    %c3 = arith.constant 3 : index
    %c0_29 = arith.constant 0 : index
    %30 = vector.load %arg1[%c0_28, %c3, %c0_29] : memref<1x16x128xf32, #tpu.memory_space<vmem>>, vector<1x1x128xf32>
    %31 = vector.shape_cast %30 : vector<1x1x128xf32> to vector<1x128xf32>
    %cst_30 = arith.constant dense<0.000000e+00> : vector<1x2xf32>
    %32 = tpu.matmul %31, %0, %cst_30 {dimension_numbers = #tpu.dot_dimension_numbers<[1], [0], [0], [1], [0, 0, 1, 1], [], []>} : vector<1x128xf32>, vector<128x2xf32>, vector<1x2xf32> -> vector<1x2xf32>
    %cst_31 = arith.constant 1.562500e-02 : f32
    %33 = vector.broadcast %cst_31 : f32 to vector<1x2xf32>
    %34 = arith.mulf %32, %33 : vector<1x2xf32>
    %c3_32 = arith.constant 3 : index
    %c0_33 = arith.constant 0 : index
    %c0_34 = arith.constant 0 : index
    %35 = vector.load %arg4[%c3_32, %c0_33, %c0_34] : memref<16x2x2xf32, #tpu.memory_space<vmem>>, vector<1x2x2xf32>
    %36 = vector.shape_cast %35 : vector<1x2x2xf32> to vector<2x2xf32>
    %cst_35 = arith.constant dense<0.000000e+00> : vector<1x2xf32>
    %37 = tpu.matmul %34, %36, %cst_35 {dimension_numbers = #tpu.dot_dimension_numbers<[1], [0], [0], [1], [0, 0, 1, 1], [], []>} : vector<1x2xf32>, vector<2x2xf32>, vector<1x2xf32> -> vector<1x2xf32>
    %38 = arith.addf %29, %37 : vector<1x2xf32>
    %c0_36 = arith.constant 0 : index
    %c4 = arith.constant 4 : index
    %c0_37 = arith.constant 0 : index
    %39 = vector.load %arg1[%c0_36, %c4, %c0_37] : memref<1x16x128xf32, #tpu.memory_space<vmem>>, vector<1x1x128xf32>
    %40 = vector.shape_cast %39 : vector<1x1x128xf32> to vector<1x128xf32>
    %cst_38 = arith.constant dense<0.000000e+00> : vector<1x2xf32>
    %41 = tpu.matmul %40, %0, %cst_38 {dimension_numbers = #tpu.dot_dimension_numbers<[1], [0], [0], [1], [0, 0, 1, 1], [], []>} : vector<1x128xf32>, vector<128x2xf32>, vector<1x2xf32> -> vector<1x2xf32>
    %cst_39 = arith.constant 1.562500e-02 : f32
    %42 = vector.broadcast %cst_39 : f32 to vector<1x2xf32>
    %43 = arith.mulf %41, %42 : vector<1x2xf32>
    %c4_40 = arith.constant 4 : index
    %c0_41 = arith.constant 0 : index
    %c0_42 = arith.constant 0 : index
    %44 = vector.load %arg4[%c4_40, %c0_41, %c0_42] : memref<16x2x2xf32, #tpu.memory_space<vmem>>, vector<1x2x2xf32>
    %45 = vector.shape_cast %44 : vector<1x2x2xf32> to vector<2x2xf32>
    %cst_43 = arith.constant dense<0.000000e+00> : vector<1x2xf32>
    %46 = tpu.matmul %43, %45, %cst_43 {dimension_numbers = #tpu.dot_dimension_numbers<[1], [0], [0], [1], [0, 0, 1, 1], [], []>} : vector<1x2xf32>, vector<2x2xf32>, vector<1x2xf32> -> vector<1x2xf32>
    %47 = arith.addf %38, %46 : vector<1x2xf32>
    %c0_44 = arith.constant 0 : index
    %c5 = arith.constant 5 : index
    %c0_45 = arith.constant 0 : index
    %48 = vector.load %arg1[%c0_44, %c5, %c0_45] : memref<1x16x128xf32, #tpu.memory_space<vmem>>, vector<1x1x128xf32>
    %49 = vector.shape_cast %48 : vector<1x1x128xf32> to vector<1x128xf32>
    %cst_46 = arith.constant dense<0.000000e+00> : vector<1x2xf32>
    %50 = tpu.matmul %49, %0, %cst_46 {dimension_numbers = #tpu.dot_dimension_numbers<[1], [0], [0], [1], [0, 0, 1, 1], [], []>} : vector<1x128xf32>, vector<128x2xf32>, vector<1x2xf32> -> vector<1x2xf32>
    %cst_47 = arith.constant 1.562500e-02 : f32
    %51 = vector.broadcast %cst_47 : f32 to vector<1x2xf32>
    %52 = arith.mulf %50, %51 : vector<1x2xf32>
    %c5_48 = arith.constant 5 : index
    %c0_49 = arith.constant 0 : index
    %c0_50 = arith.constant 0 : index
    %53 = vector.load %arg4[%c5_48, %c0_49, %c0_50] : memref<16x2x2xf32, #tpu.memory_space<vmem>>, vector<1x2x2xf32>
    %54 = vector.shape_cast %53 : vector<1x2x2xf32> to vector<2x2xf32>
    %cst_51 = arith.constant dense<0.000000e+00> : vector<1x2xf32>
    %55 = tpu.matmul %52, %54, %cst_51 {dimension_numbers = #tpu.dot_dimension_numbers<[1], [0], [0], [1], [0, 0, 1, 1], [], []>} : vector<1x2xf32>, vector<2x2xf32>, vector<1x2xf32> -> vector<1x2xf32>
    %56 = arith.addf %47, %55 : vector<1x2xf32>
    %c0_52 = arith.constant 0 : index
    %c6 = arith.constant 6 : index
    %c0_53 = arith.constant 0 : index
    %57 = vector.load %arg1[%c0_52, %c6, %c0_53] : memref<1x16x128xf32, #tpu.memory_space<vmem>>, vector<1x1x128xf32>
    %58 = vector.shape_cast %57 : vector<1x1x128xf32> to vector<1x128xf32>
    %cst_54 = arith.constant dense<0.000000e+00> : vector<1x2xf32>
    %59 = tpu.matmul %58, %0, %cst_54 {dimension_numbers = #tpu.dot_dimension_numbers<[1], [0], [0], [1], [0, 0, 1, 1], [], []>} : vector<1x128xf32>, vector<128x2xf32>, vector<1x2xf32> -> vector<1x2xf32>
    %cst_55 = arith.constant 1.562500e-02 : f32
    %60 = vector.broadcast %cst_55 : f32 to vector<1x2xf32>
    %61 = arith.mulf %59, %60 : vector<1x2xf32>
    %c6_56 = arith.constant 6 : index
    %c0_57 = arith.constant 0 : index
    %c0_58 = arith.constant 0 : index
    %62 = vector.load %arg4[%c6_56, %c0_57, %c0_58] : memref<16x2x2xf32, #tpu.memory_space<vmem>>, vector<1x2x2xf32>
    %63 = vector.shape_cast %62 : vector<1x2x2xf32> to vector<2x2xf32>
    %cst_59 = arith.constant dense<0.000000e+00> : vector<1x2xf32>
    %64 = tpu.matmul %61, %63, %cst_59 {dimension_numbers = #tpu.dot_dimension_numbers<[1], [0], [0], [1], [0, 0, 1, 1], [], []>} : vector<1x2xf32>, vector<2x2xf32>, vector<1x2xf32> -> vector<1x2xf32>
    %65 = arith.addf %56, %64 : vector<1x2xf32>
    %c0_60 = arith.constant 0 : index
    %c7 = arith.constant 7 : index
    %c0_61 = arith.constant 0 : index
    %66 = vector.load %arg1[%c0_60, %c7, %c0_61] : memref<1x16x128xf32, #tpu.memory_space<vmem>>, vector<1x1x128xf32>
    %67 = vector.shape_cast %66 : vector<1x1x128xf32> to vector<1x128xf32>
    %cst_62 = arith.constant dense<0.000000e+00> : vector<1x2xf32>
    %68 = tpu.matmul %67, %0, %cst_62 {dimension_numbers = #tpu.dot_dimension_numbers<[1], [0], [0], [1], [0, 0, 1, 1], [], []>} : vector<1x128xf32>, vector<128x2xf32>, vector<1x2xf32> -> vector<1x2xf32>
    %cst_63 = arith.constant 1.562500e-02 : f32
    %69 = vector.broadcast %cst_63 : f32 to vector<1x2xf32>
    %70 = arith.mulf %68, %69 : vector<1x2xf32>
    %c7_64 = arith.constant 7 : index
    %c0_65 = arith.constant 0 : index
    %c0_66 = arith.constant 0 : index
    %71 = vector.load %arg4[%c7_64, %c0_65, %c0_66] : memref<16x2x2xf32, #tpu.memory_space<vmem>>, vector<1x2x2xf32>
    %72 = vector.shape_cast %71 : vector<1x2x2xf32> to vector<2x2xf32>
    %cst_67 = arith.constant dense<0.000000e+00> : vector<1x2xf32>
    %73 = tpu.matmul %70, %72, %cst_67 {dimension_numbers = #tpu.dot_dimension_numbers<[1], [0], [0], [1], [0, 0, 1, 1], [], []>} : vector<1x2xf32>, vector<2x2xf32>, vector<1x2xf32> -> vector<1x2xf32>
    %74 = arith.addf %65, %73 : vector<1x2xf32>
    %c0_68 = arith.constant 0 : index
    %c8 = arith.constant 8 : index
    %c0_69 = arith.constant 0 : index
    %75 = vector.load %arg1[%c0_68, %c8, %c0_69] : memref<1x16x128xf32, #tpu.memory_space<vmem>>, vector<1x1x128xf32>
    %76 = vector.shape_cast %75 : vector<1x1x128xf32> to vector<1x128xf32>
    %cst_70 = arith.constant dense<0.000000e+00> : vector<1x2xf32>
    %77 = tpu.matmul %76, %0, %cst_70 {dimension_numbers = #tpu.dot_dimension_numbers<[1], [0], [0], [1], [0, 0, 1, 1], [], []>} : vector<1x128xf32>, vector<128x2xf32>, vector<1x2xf32> -> vector<1x2xf32>
    %cst_71 = arith.constant 1.562500e-02 : f32
    %78 = vector.broadcast %cst_71 : f32 to vector<1x2xf32>
    %79 = arith.mulf %77, %78 : vector<1x2xf32>
    %c8_72 = arith.constant 8 : index
    %c0_73 = arith.constant 0 : index
    %c0_74 = arith.constant 0 : index
    %80 = vector.load %arg4[%c8_72, %c0_73, %c0_74] : memref<16x2x2xf32, #tpu.memory_space<vmem>>, vector<1x2x2xf32>
    %81 = vector.shape_cast %80 : vector<1x2x2xf32> to vector<2x2xf32>
    %cst_75 = arith.constant dense<0.000000e+00> : vector<1x2xf32>
    %82 = tpu.matmul %79, %81, %cst_75 {dimension_numbers = #tpu.dot_dimension_numbers<[1], [0], [0], [1], [0, 0, 1, 1], [], []>} : vector<1x2xf32>, vector<2x2xf32>, vector<1x2xf32> -> vector<1x2xf32>
    %83 = arith.addf %74, %82 : vector<1x2xf32>
    %c0_76 = arith.constant 0 : index
    %c9 = arith.constant 9 : index
    %c0_77 = arith.constant 0 : index
    %84 = vector.load %arg1[%c0_76, %c9, %c0_77] : memref<1x16x128xf32, #tpu.memory_space<vmem>>, vector<1x1x128xf32>
    %85 = vector.shape_cast %84 : vector<1x1x128xf32> to vector<1x128xf32>
    %cst_78 = arith.constant dense<0.000000e+00> : vector<1x2xf32>
    %86 = tpu.matmul %85, %0, %cst_78 {dimension_numbers = #tpu.dot_dimension_numbers<[1], [0], [0], [1], [0, 0, 1, 1], [], []>} : vector<1x128xf32>, vector<128x2xf32>, vector<1x2xf32> -> vector<1x2xf32>
    %cst_79 = arith.constant 1.562500e-02 : f32
    %87 = vector.broadcast %cst_79 : f32 to vector<1x2xf32>
    %88 = arith.mulf %86, %87 : vector<1x2xf32>
    %c9_80 = arith.constant 9 : index
    %c0_81 = arith.constant 0 : index
    %c0_82 = arith.constant 0 : index
    %89 = vector.load %arg4[%c9_80, %c0_81, %c0_82] : memref<16x2x2xf32, #tpu.memory_space<vmem>>, vector<1x2x2xf32>
    %90 = vector.shape_cast %89 : vector<1x2x2xf32> to vector<2x2xf32>
    %cst_83 = arith.constant dense<0.000000e+00> : vector<1x2xf32>
    %91 = tpu.matmul %88, %90, %cst_83 {dimension_numbers = #tpu.dot_dimension_numbers<[1], [0], [0], [1], [0, 0, 1, 1], [], []>} : vector<1x2xf32>, vector<2x2xf32>, vector<1x2xf32> -> vector<1x2xf32>
    %92 = arith.addf %83, %91 : vector<1x2xf32>
    %c0_84 = arith.constant 0 : index
    %c10 = arith.constant 10 : index
    %c0_85 = arith.constant 0 : index
    %93 = vector.load %arg1[%c0_84, %c10, %c0_85] : memref<1x16x128xf32, #tpu.memory_space<vmem>>, vector<1x1x128xf32>
    %94 = vector.shape_cast %93 : vector<1x1x128xf32> to vector<1x128xf32>
    %cst_86 = arith.constant dense<0.000000e+00> : vector<1x2xf32>
    %95 = tpu.matmul %94, %0, %cst_86 {dimension_numbers = #tpu.dot_dimension_numbers<[1], [0], [0], [1], [0, 0, 1, 1], [], []>} : vector<1x128xf32>, vector<128x2xf32>, vector<1x2xf32> -> vector<1x2xf32>
    %cst_87 = arith.constant 1.562500e-02 : f32
    %96 = vector.broadcast %cst_87 : f32 to vector<1x2xf32>
    %97 = arith.mulf %95, %96 : vector<1x2xf32>
    %c10_88 = arith.constant 10 : index
    %c0_89 = arith.constant 0 : index
    %c0_90 = arith.constant 0 : index
    %98 = vector.load %arg4[%c10_88, %c0_89, %c0_90] : memref<16x2x2xf32, #tpu.memory_space<vmem>>, vector<1x2x2xf32>
    %99 = vector.shape_cast %98 : vector<1x2x2xf32> to vector<2x2xf32>
    %cst_91 = arith.constant dense<0.000000e+00> : vector<1x2xf32>
    %100 = tpu.matmul %97, %99, %cst_91 {dimension_numbers = #tpu.dot_dimension_numbers<[1], [0], [0], [1], [0, 0, 1, 1], [], []>} : vector<1x2xf32>, vector<2x2xf32>, vector<1x2xf32> -> vector<1x2xf32>
    %101 = arith.addf %92, %100 : vector<1x2xf32>
    %c0_92 = arith.constant 0 : index
    %c11 = arith.constant 11 : index
    %c0_93 = arith.constant 0 : index
    %102 = vector.load %arg1[%c0_92, %c11, %c0_93] : memref<1x16x128xf32, #tpu.memory_space<vmem>>, vector<1x1x128xf32>
    %103 = vector.shape_cast %102 : vector<1x1x128xf32> to vector<1x128xf32>
    %cst_94 = arith.constant dense<0.000000e+00> : vector<1x2xf32>
    %104 = tpu.matmul %103, %0, %cst_94 {dimension_numbers = #tpu.dot_dimension_numbers<[1], [0], [0], [1], [0, 0, 1, 1], [], []>} : vector<1x128xf32>, vector<128x2xf32>, vector<1x2xf32> -> vector<1x2xf32>
    %cst_95 = arith.constant 1.562500e-02 : f32
    %105 = vector.broadcast %cst_95 : f32 to vector<1x2xf32>
    %106 = arith.mulf %104, %105 : vector<1x2xf32>
    %c11_96 = arith.constant 11 : index
    %c0_97 = arith.constant 0 : index
    %c0_98 = arith.constant 0 : index
    %107 = vector.load %arg4[%c11_96, %c0_97, %c0_98] : memref<16x2x2xf32, #tpu.memory_space<vmem>>, vector<1x2x2xf32>
    %108 = vector.shape_cast %107 : vector<1x2x2xf32> to vector<2x2xf32>
    %cst_99 = arith.constant dense<0.000000e+00> : vector<1x2xf32>
    %109 = tpu.matmul %106, %108, %cst_99 {dimension_numbers = #tpu.dot_dimension_numbers<[1], [0], [0], [1], [0, 0, 1, 1], [], []>} : vector<1x2xf32>, vector<2x2xf32>, vector<1x2xf32> -> vector<1x2xf32>
    %110 = arith.addf %101, %109 : vector<1x2xf32>
    %c0_100 = arith.constant 0 : index
    %c12 = arith.constant 12 : index
    %c0_101 = arith.constant 0 : index
    %111 = vector.load %arg1[%c0_100, %c12, %c0_101] : memref<1x16x128xf32, #tpu.memory_space<vmem>>, vector<1x1x128xf32>
    %112 = vector.shape_cast %111 : vector<1x1x128xf32> to vector<1x128xf32>
    %cst_102 = arith.constant dense<0.000000e+00> : vector<1x2xf32>
    %113 = tpu.matmul %112, %0, %cst_102 {dimension_numbers = #tpu.dot_dimension_numbers<[1], [0], [0], [1], [0, 0, 1, 1], [], []>} : vector<1x128xf32>, vector<128x2xf32>, vector<1x2xf32> -> vector<1x2xf32>
    %cst_103 = arith.constant 1.562500e-02 : f32
    %114 = vector.broadcast %cst_103 : f32 to vector<1x2xf32>
    %115 = arith.mulf %113, %114 : vector<1x2xf32>
    %c12_104 = arith.constant 12 : index
    %c0_105 = arith.constant 0 : index
    %c0_106 = arith.constant 0 : index
    %116 = vector.load %arg4[%c12_104, %c0_105, %c0_106] : memref<16x2x2xf32, #tpu.memory_space<vmem>>, vector<1x2x2xf32>
    %117 = vector.shape_cast %116 : vector<1x2x2xf32> to vector<2x2xf32>
    %cst_107 = arith.constant dense<0.000000e+00> : vector<1x2xf32>
    %118 = tpu.matmul %115, %117, %cst_107 {dimension_numbers = #tpu.dot_dimension_numbers<[1], [0], [0], [1], [0, 0, 1, 1], [], []>} : vector<1x2xf32>, vector<2x2xf32>, vector<1x2xf32> -> vector<1x2xf32>
    %119 = arith.addf %110, %118 : vector<1x2xf32>
    %c0_108 = arith.constant 0 : index
    %c13 = arith.constant 13 : index
    %c0_109 = arith.constant 0 : index
    %120 = vector.load %arg1[%c0_108, %c13, %c0_109] : memref<1x16x128xf32, #tpu.memory_space<vmem>>, vector<1x1x128xf32>
    %121 = vector.shape_cast %120 : vector<1x1x128xf32> to vector<1x128xf32>
    %cst_110 = arith.constant dense<0.000000e+00> : vector<1x2xf32>
    %122 = tpu.matmul %121, %0, %cst_110 {dimension_numbers = #tpu.dot_dimension_numbers<[1], [0], [0], [1], [0, 0, 1, 1], [], []>} : vector<1x128xf32>, vector<128x2xf32>, vector<1x2xf32> -> vector<1x2xf32>
    %cst_111 = arith.constant 1.562500e-02 : f32
    %123 = vector.broadcast %cst_111 : f32 to vector<1x2xf32>
    %124 = arith.mulf %122, %123 : vector<1x2xf32>
    %c13_112 = arith.constant 13 : index
    %c0_113 = arith.constant 0 : index
    %c0_114 = arith.constant 0 : index
    %125 = vector.load %arg4[%c13_112, %c0_113, %c0_114] : memref<16x2x2xf32, #tpu.memory_space<vmem>>, vector<1x2x2xf32>
    %126 = vector.shape_cast %125 : vector<1x2x2xf32> to vector<2x2xf32>
    %cst_115 = arith.constant dense<0.000000e+00> : vector<1x2xf32>
    %127 = tpu.matmul %124, %126, %cst_115 {dimension_numbers = #tpu.dot_dimension_numbers<[1], [0], [0], [1], [0, 0, 1, 1], [], []>} : vector<1x2xf32>, vector<2x2xf32>, vector<1x2xf32> -> vector<1x2xf32>
    %128 = arith.addf %119, %127 : vector<1x2xf32>
    %c0_116 = arith.constant 0 : index
    %c14 = arith.constant 14 : index
    %c0_117 = arith.constant 0 : index
    %129 = vector.load %arg1[%c0_116, %c14, %c0_117] : memref<1x16x128xf32, #tpu.memory_space<vmem>>, vector<1x1x128xf32>
    %130 = vector.shape_cast %129 : vector<1x1x128xf32> to vector<1x128xf32>
    %cst_118 = arith.constant dense<0.000000e+00> : vector<1x2xf32>
    %131 = tpu.matmul %130, %0, %cst_118 {dimension_numbers = #tpu.dot_dimension_numbers<[1], [0], [0], [1], [0, 0, 1, 1], [], []>} : vector<1x128xf32>, vector<128x2xf32>, vector<1x2xf32> -> vector<1x2xf32>
    %cst_119 = arith.constant 1.562500e-02 : f32
    %132 = vector.broadcast %cst_119 : f32 to vector<1x2xf32>
    %133 = arith.mulf %131, %132 : vector<1x2xf32>
    %c14_120 = arith.constant 14 : index
    %c0_121 = arith.constant 0 : index
    %c0_122 = arith.constant 0 : index
    %134 = vector.load %arg4[%c14_120, %c0_121, %c0_122] : memref<16x2x2xf32, #tpu.memory_space<vmem>>, vector<1x2x2xf32>
    %135 = vector.shape_cast %134 : vector<1x2x2xf32> to vector<2x2xf32>
    %cst_123 = arith.constant dense<0.000000e+00> : vector<1x2xf32>
    %136 = tpu.matmul %133, %135, %cst_123 {dimension_numbers = #tpu.dot_dimension_numbers<[1], [0], [0], [1], [0, 0, 1, 1], [], []>} : vector<1x2xf32>, vector<2x2xf32>, vector<1x2xf32> -> vector<1x2xf32>
    %137 = arith.addf %128, %136 : vector<1x2xf32>
    %c0_124 = arith.constant 0 : index
    %c15 = arith.constant 15 : index
    %c0_125 = arith.constant 0 : index
    %138 = vector.load %arg1[%c0_124, %c15, %c0_125] : memref<1x16x128xf32, #tpu.memory_space<vmem>>, vector<1x1x128xf32>
    %139 = vector.shape_cast %138 : vector<1x1x128xf32> to vector<1x128xf32>
    %cst_126 = arith.constant dense<0.000000e+00> : vector<1x2xf32>
    %140 = tpu.matmul %139, %0, %cst_126 {dimension_numbers = #tpu.dot_dimension_numbers<[1], [0], [0], [1], [0, 0, 1, 1], [], []>} : vector<1x128xf32>, vector<128x2xf32>, vector<1x2xf32> -> vector<1x2xf32>
    %cst_127 = arith.constant 1.562500e-02 : f32
    %141 = vector.broadcast %cst_127 : f32 to vector<1x2xf32>
    %142 = arith.mulf %140, %141 : vector<1x2xf32>
    %c15_128 = arith.constant 15 : index
    %c0_129 = arith.constant 0 : index
    %c0_130 = arith.constant 0 : index
    %143 = vector.load %arg4[%c15_128, %c0_129, %c0_130] : memref<16x2x2xf32, #tpu.memory_space<vmem>>, vector<1x2x2xf32>
    %144 = vector.shape_cast %143 : vector<1x2x2xf32> to vector<2x2xf32>
    %cst_131 = arith.constant dense<0.000000e+00> : vector<1x2xf32>
    %145 = tpu.matmul %142, %144, %cst_131 {dimension_numbers = #tpu.dot_dimension_numbers<[1], [0], [0], [1], [0, 0, 1, 1], [], []>} : vector<1x2xf32>, vector<2x2xf32>, vector<1x2xf32> -> vector<1x2xf32>
    %146 = arith.addf %137, %145 : vector<1x2xf32>
    %c0_132 = arith.constant 0 : index
    %c0_133 = arith.constant 0 : index
    %147 = vector.load %arg5[%c0_132, %c0_133] : memref<1x2xf32, #tpu.memory_space<vmem>>, vector<1x2xf32>
    %148 = arith.addf %146, %147 : vector<1x2xf32>
    %cst_134 = arith.constant 0.000000e+00 : f32
    %149 = vector.broadcast %cst_134 : f32 to vector<1x2xf32>
    %150 = arith.maximumf %148, %149 : vector<1x2xf32>
    %c0_135 = arith.constant 0 : index
    %c0_136 = arith.constant 0 : index
    %c0_137 = arith.constant 0 : index
    %151 = vector.load %arg6[%c0_135, %c0_136, %c0_137] : memref<16x2x2xf32, #tpu.memory_space<vmem>>, vector<1x2x2xf32>
    %152 = vector.shape_cast %151 : vector<1x2x2xf32> to vector<2x2xf32>
    %cst_138 = arith.constant dense<0.000000e+00> : vector<1x2xf32>
    %153 = tpu.matmul %150, %152, %cst_138 {dimension_numbers = #tpu.dot_dimension_numbers<[1], [0], [0], [1], [0, 0, 1, 1], [], []>} : vector<1x2xf32>, vector<2x2xf32>, vector<1x2xf32> -> vector<1x2xf32>
    %c0_139 = arith.constant 0 : index
    %c0_140 = arith.constant 0 : index
    %c0_141 = arith.constant 0 : index
    %154 = vector.load %arg7[%c0_139, %c0_140, %c0_141] : memref<16x1x2xf32, #tpu.memory_space<vmem>>, vector<1x1x2xf32>
    %155 = vector.shape_cast %154 : vector<1x1x2xf32> to vector<1x2xf32>
    %156 = arith.addf %153, %155 : vector<1x2xf32>
    %157 = arith.negf %156 : vector<1x2xf32>
    %158 = math.exp %157 : vector<1x2xf32>
    %cst_142 = arith.constant 1.000000e+00 : f32
    %159 = vector.broadcast %cst_142 : f32 to vector<1x2xf32>
    %160 = arith.addf %159, %158 : vector<1x2xf32>
    %161 = arith.divf %159, %160 : vector<1x2xf32>
    %cst_143 = arith.constant dense<0.000000e+00> : vector<1x128xf32>
    %162 = tpu.matmul %161, %1, %cst_143 {dimension_numbers = #tpu.dot_dimension_numbers<[1], [0], [0], [1], [0, 0, 1, 1], [], []>} : vector<1x2xf32>, vector<2x128xf32>, vector<1x128xf32> -> vector<1x128xf32>
    %c0_144 = arith.constant 0 : index
    %c0_145 = arith.constant 0 : index
    %c0_146 = arith.constant 0 : index
    %163 = vector.load %arg1[%c0_144, %c0_145, %c0_146] : memref<1x16x128xf32, #tpu.memory_space<vmem>>, vector<1x1x128xf32>
    %164 = vector.shape_cast %163 : vector<1x1x128xf32> to vector<1x128xf32>
    %165 = arith.mulf %164, %162 : vector<1x128xf32>
    %c0_147 = arith.constant 0 : index
    %c0_148 = arith.constant 0 : index
    %c0_149 = arith.constant 0 : index
    %166 = vector.load %arg8[%c0_147, %c0_148, %c0_149] : memref<1x16x128xf32, #tpu.memory_space<vmem>>, vector<1x1x128xf32>
    %167 = vector.shape_cast %166 : vector<1x1x128xf32> to vector<1x128xf32>
    %168 = vector.shape_cast %165 : vector<1x128xf32> to vector<1x1x128xf32>
    tpu.vector_store %arg8[%c0_147, %c0_148, %c0_149], %168 {strides = array<i32>} : memref<1x16x128xf32, #tpu.memory_space<vmem>>, vector<1x1x128xf32>,
    %c1_150 = arith.constant 1 : index
    %c0_151 = arith.constant 0 : index
    %c0_152 = arith.constant 0 : index
    %169 = vector.load %arg6[%c1_150, %c0_151, %c0_152] : memref<16x2x2xf32, #tpu.memory_space<vmem>>, vector<1x2x2xf32>
    %170 = vector.shape_cast %169 : vector<1x2x2xf32> to vector<2x2xf32>
    %cst_153 = arith.constant dense<0.000000e+00> : vector<1x2xf32>
    %171 = tpu.matmul %150, %170, %cst_153 {dimension_numbers = #tpu.dot_dimension_numbers<[1], [0], [0], [1], [0, 0, 1, 1], [], []>} : vector<1x2xf32>, vector<2x2xf32>, vector<1x2xf32> -> vector<1x2xf32>
    %c1_154 = arith.constant 1 : index
    %c0_155 = arith.constant 0 : index
    %c0_156 = arith.constant 0 : index
    %172 = vector.load %arg7[%c1_154, %c0_155, %c0_156] : memref<16x1x2xf32, #tpu.memory_space<vmem>>, vector<1x1x2xf32>
    %173 = vector.shape_cast %172 : vector<1x1x2xf32> to vector<1x2xf32>
    %174 = arith.addf %171, %173 : vector<1x2xf32>
    %175 = arith.negf %174 : vector<1x2xf32>
    %176 = math.exp %175 : vector<1x2xf32>
    %cst_157 = arith.constant 1.000000e+00 : f32
    %177 = vector.broadcast %cst_157 : f32 to vector<1x2xf32>
    %178 = arith.addf %177, %176 : vector<1x2xf32>
    %179 = arith.divf %177, %178 : vector<1x2xf32>
    %cst_158 = arith.constant dense<0.000000e+00> : vector<1x128xf32>
    %180 = tpu.matmul %179, %1, %cst_158 {dimension_numbers = #tpu.dot_dimension_numbers<[1], [0], [0], [1], [0, 0, 1, 1], [], []>} : vector<1x2xf32>, vector<2x128xf32>, vector<1x128xf32> -> vector<1x128xf32>
    %c0_159 = arith.constant 0 : index
    %c1_160 = arith.constant 1 : index
    %c0_161 = arith.constant 0 : index
    %181 = vector.load %arg1[%c0_159, %c1_160, %c0_161] : memref<1x16x128xf32, #tpu.memory_space<vmem>>, vector<1x1x128xf32>
    %182 = vector.shape_cast %181 : vector<1x1x128xf32> to vector<1x128xf32>
    %183 = arith.mulf %182, %180 : vector<1x128xf32>
    %c0_162 = arith.constant 0 : index
    %c1_163 = arith.constant 1 : index
    %c0_164 = arith.constant 0 : index
    %184 = vector.load %arg8[%c0_162, %c1_163, %c0_164] : memref<1x16x128xf32, #tpu.memory_space<vmem>>, vector<1x1x128xf32>
    %185 = vector.shape_cast %184 : vector<1x1x128xf32> to vector<1x128xf32>
    %186 = vector.shape_cast %183 : vector<1x128xf32> to vector<1x1x128xf32>
    tpu.vector_store %arg8[%c0_162, %c1_163, %c0_164], %186 {strides = array<i32>} : memref<1x16x128xf32, #tpu.memory_space<vmem>>, vector<1x1x128xf32>,
    %c2_165 = arith.constant 2 : index
    %c0_166 = arith.constant 0 : index
    %c0_167 = arith.constant 0 : index
    %187 = vector.load %arg6[%c2_165, %c0_166, %c0_167] : memref<16x2x2xf32, #tpu.memory_space<vmem>>, vector<1x2x2xf32>
    %188 = vector.shape_cast %187 : vector<1x2x2xf32> to vector<2x2xf32>
    %cst_168 = arith.constant dense<0.000000e+00> : vector<1x2xf32>
    %189 = tpu.matmul %150, %188, %cst_168 {dimension_numbers = #tpu.dot_dimension_numbers<[1], [0], [0], [1], [0, 0, 1, 1], [], []>} : vector<1x2xf32>, vector<2x2xf32>, vector<1x2xf32> -> vector<1x2xf32>
    %c2_169 = arith.constant 2 : index
    %c0_170 = arith.constant 0 : index
    %c0_171 = arith.constant 0 : index
    %190 = vector.load %arg7[%c2_169, %c0_170, %c0_171] : memref<16x1x2xf32, #tpu.memory_space<vmem>>, vector<1x1x2xf32>
    %191 = vector.shape_cast %190 : vector<1x1x2xf32> to vector<1x2xf32>
    %192 = arith.addf %189, %191 : vector<1x2xf32>
    %193 = arith.negf %192 : vector<1x2xf32>
    %194 = math.exp %193 : vector<1x2xf32>
    %cst_172 = arith.constant 1.000000e+00 : f32
    %195 = vector.broadcast %cst_172 : f32 to vector<1x2xf32>
    %196 = arith.addf %195, %194 : vector<1x2xf32>
    %197 = arith.divf %195, %196 : vector<1x2xf32>
    %cst_173 = arith.constant dense<0.000000e+00> : vector<1x128xf32>
    %198 = tpu.matmul %197, %1, %cst_173 {dimension_numbers = #tpu.dot_dimension_numbers<[1], [0], [0], [1], [0, 0, 1, 1], [], []>} : vector<1x2xf32>, vector<2x128xf32>, vector<1x128xf32> -> vector<1x128xf32>
    %c0_174 = arith.constant 0 : index
    %c2_175 = arith.constant 2 : index
    %c0_176 = arith.constant 0 : index
    %199 = vector.load %arg1[%c0_174, %c2_175, %c0_176] : memref<1x16x128xf32, #tpu.memory_space<vmem>>, vector<1x1x128xf32>
    %200 = vector.shape_cast %199 : vector<1x1x128xf32> to vector<1x128xf32>
    %201 = arith.mulf %200, %198 : vector<1x128xf32>
    %c0_177 = arith.constant 0 : index
    %c2_178 = arith.constant 2 : index
    %c0_179 = arith.constant 0 : index
    %202 = vector.load %arg8[%c0_177, %c2_178, %c0_179] : memref<1x16x128xf32, #tpu.memory_space<vmem>>, vector<1x1x128xf32>
    %203 = vector.shape_cast %202 : vector<1x1x128xf32> to vector<1x128xf32>
    %204 = vector.shape_cast %201 : vector<1x128xf32> to vector<1x1x128xf32>
    tpu.vector_store %arg8[%c0_177, %c2_178, %c0_179], %204 {strides = array<i32>} : memref<1x16x128xf32, #tpu.memory_space<vmem>>, vector<1x1x128xf32>,
    %c3_180 = arith.constant 3 : index
    %c0_181 = arith.constant 0 : index
    %c0_182 = arith.constant 0 : index
    %205 = vector.load %arg6[%c3_180, %c0_181, %c0_182] : memref<16x2x2xf32, #tpu.memory_space<vmem>>, vector<1x2x2xf32>
    %206 = vector.shape_cast %205 : vector<1x2x2xf32> to vector<2x2xf32>
    %cst_183 = arith.constant dense<0.000000e+00> : vector<1x2xf32>
    %207 = tpu.matmul %150, %206, %cst_183 {dimension_numbers = #tpu.dot_dimension_numbers<[1], [0], [0], [1], [0, 0, 1, 1], [], []>} : vector<1x2xf32>, vector<2x2xf32>, vector<1x2xf32> -> vector<1x2xf32>
    %c3_184 = arith.constant 3 : index
    %c0_185 = arith.constant 0 : index
    %c0_186 = arith.constant 0 : index
    %208 = vector.load %arg7[%c3_184, %c0_185, %c0_186] : memref<16x1x2xf32, #tpu.memory_space<vmem>>, vector<1x1x2xf32>
    %209 = vector.shape_cast %208 : vector<1x1x2xf32> to vector<1x2xf32>
    %210 = arith.addf %207, %209 : vector<1x2xf32>
    %211 = arith.negf %210 : vector<1x2xf32>
    %212 = math.exp %211 : vector<1x2xf32>
    %cst_187 = arith.constant 1.000000e+00 : f32
    %213 = vector.broadcast %cst_187 : f32 to vector<1x2xf32>
    %214 = arith.addf %213, %212 : vector<1x2xf32>
    %215 = arith.divf %213, %214 : vector<1x2xf32>
    %cst_188 = arith.constant dense<0.000000e+00> : vector<1x128xf32>
    %216 = tpu.matmul %215, %1, %cst_188 {dimension_numbers = #tpu.dot_dimension_numbers<[1], [0], [0], [1], [0, 0, 1, 1], [], []>} : vector<1x2xf32>, vector<2x128xf32>, vector<1x128xf32> -> vector<1x128xf32>
    %c0_189 = arith.constant 0 : index
    %c3_190 = arith.constant 3 : index
    %c0_191 = arith.constant 0 : index
    %217 = vector.load %arg1[%c0_189, %c3_190, %c0_191] : memref<1x16x128xf32, #tpu.memory_space<vmem>>, vector<1x1x128xf32>
    %218 = vector.shape_cast %217 : vector<1x1x128xf32> to vector<1x128xf32>
    %219 = arith.mulf %218, %216 : vector<1x128xf32>
    %c0_192 = arith.constant 0 : index
    %c3_193 = arith.constant 3 : index
    %c0_194 = arith.constant 0 : index
    %220 = vector.load %arg8[%c0_192, %c3_193, %c0_194] : memref<1x16x128xf32, #tpu.memory_space<vmem>>, vector<1x1x128xf32>
    %221 = vector.shape_cast %220 : vector<1x1x128xf32> to vector<1x128xf32>
    %222 = vector.shape_cast %219 : vector<1x128xf32> to vector<1x1x128xf32>
    tpu.vector_store %arg8[%c0_192, %c3_193, %c0_194], %222 {strides = array<i32>} : memref<1x16x128xf32, #tpu.memory_space<vmem>>, vector<1x1x128xf32>,
    %c4_195 = arith.constant 4 : index
    %c0_196 = arith.constant 0 : index
    %c0_197 = arith.constant 0 : index
    %223 = vector.load %arg6[%c4_195, %c0_196, %c0_197] : memref<16x2x2xf32, #tpu.memory_space<vmem>>, vector<1x2x2xf32>
    %224 = vector.shape_cast %223 : vector<1x2x2xf32> to vector<2x2xf32>
    %cst_198 = arith.constant dense<0.000000e+00> : vector<1x2xf32>
    %225 = tpu.matmul %150, %224, %cst_198 {dimension_numbers = #tpu.dot_dimension_numbers<[1], [0], [0], [1], [0, 0, 1, 1], [], []>} : vector<1x2xf32>, vector<2x2xf32>, vector<1x2xf32> -> vector<1x2xf32>
    %c4_199 = arith.constant 4 : index
    %c0_200 = arith.constant 0 : index
    %c0_201 = arith.constant 0 : index
    %226 = vector.load %arg7[%c4_199, %c0_200, %c0_201] : memref<16x1x2xf32, #tpu.memory_space<vmem>>, vector<1x1x2xf32>
    %227 = vector.shape_cast %226 : vector<1x1x2xf32> to vector<1x2xf32>
    %228 = arith.addf %225, %227 : vector<1x2xf32>
    %229 = arith.negf %228 : vector<1x2xf32>
    %230 = math.exp %229 : vector<1x2xf32>
    %cst_202 = arith.constant 1.000000e+00 : f32
    %231 = vector.broadcast %cst_202 : f32 to vector<1x2xf32>
    %232 = arith.addf %231, %230 : vector<1x2xf32>
    %233 = arith.divf %231, %232 : vector<1x2xf32>
    %cst_203 = arith.constant dense<0.000000e+00> : vector<1x128xf32>
    %234 = tpu.matmul %233, %1, %cst_203 {dimension_numbers = #tpu.dot_dimension_numbers<[1], [0], [0], [1], [0, 0, 1, 1], [], []>} : vector<1x2xf32>, vector<2x128xf32>, vector<1x128xf32> -> vector<1x128xf32>
    %c0_204 = arith.constant 0 : index
    %c4_205 = arith.constant 4 : index
    %c0_206 = arith.constant 0 : index
    %235 = vector.load %arg1[%c0_204, %c4_205, %c0_206] : memref<1x16x128xf32, #tpu.memory_space<vmem>>, vector<1x1x128xf32>
    %236 = vector.shape_cast %235 : vector<1x1x128xf32> to vector<1x128xf32>
    %237 = arith.mulf %236, %234 : vector<1x128xf32>
    %c0_207 = arith.constant 0 : index
    %c4_208 = arith.constant 4 : index
    %c0_209 = arith.constant 0 : index
    %238 = vector.load %arg8[%c0_207, %c4_208, %c0_209] : memref<1x16x128xf32, #tpu.memory_space<vmem>>, vector<1x1x128xf32>
    %239 = vector.shape_cast %238 : vector<1x1x128xf32> to vector<1x128xf32>
    %240 = vector.shape_cast %237 : vector<1x128xf32> to vector<1x1x128xf32>
    tpu.vector_store %arg8[%c0_207, %c4_208, %c0_209], %240 {strides = array<i32>} : memref<1x16x128xf32, #tpu.memory_space<vmem>>, vector<1x1x128xf32>,
    %c5_210 = arith.constant 5 : index
    %c0_211 = arith.constant 0 : index
    %c0_212 = arith.constant 0 : index
    %241 = vector.load %arg6[%c5_210, %c0_211, %c0_212] : memref<16x2x2xf32, #tpu.memory_space<vmem>>, vector<1x2x2xf32>
    %242 = vector.shape_cast %241 : vector<1x2x2xf32> to vector<2x2xf32>
    %cst_213 = arith.constant dense<0.000000e+00> : vector<1x2xf32>
    %243 = tpu.matmul %150, %242, %cst_213 {dimension_numbers = #tpu.dot_dimension_numbers<[1], [0], [0], [1], [0, 0, 1, 1], [], []>} : vector<1x2xf32>, vector<2x2xf32>, vector<1x2xf32> -> vector<1x2xf32>
    %c5_214 = arith.constant 5 : index
    %c0_215 = arith.constant 0 : index
    %c0_216 = arith.constant 0 : index
    %244 = vector.load %arg7[%c5_214, %c0_215, %c0_216] : memref<16x1x2xf32, #tpu.memory_space<vmem>>, vector<1x1x2xf32>
    %245 = vector.shape_cast %244 : vector<1x1x2xf32> to vector<1x2xf32>
    %246 = arith.addf %243, %245 : vector<1x2xf32>
    %247 = arith.negf %246 : vector<1x2xf32>
    %248 = math.exp %247 : vector<1x2xf32>
    %cst_217 = arith.constant 1.000000e+00 : f32
    %249 = vector.broadcast %cst_217 : f32 to vector<1x2xf32>
    %250 = arith.addf %249, %248 : vector<1x2xf32>
    %251 = arith.divf %249, %250 : vector<1x2xf32>
    %cst_218 = arith.constant dense<0.000000e+00> : vector<1x128xf32>
    %252 = tpu.matmul %251, %1, %cst_218 {dimension_numbers = #tpu.dot_dimension_numbers<[1], [0], [0], [1], [0, 0, 1, 1], [], []>} : vector<1x2xf32>, vector<2x128xf32>, vector<1x128xf32> -> vector<1x128xf32>
    %c0_219 = arith.constant 0 : index
    %c5_220 = arith.constant 5 : index
    %c0_221 = arith.constant 0 : index
    %253 = vector.load %arg1[%c0_219, %c5_220, %c0_221] : memref<1x16x128xf32, #tpu.memory_space<vmem>>, vector<1x1x128xf32>
    %254 = vector.shape_cast %253 : vector<1x1x128xf32> to vector<1x128xf32>
    %255 = arith.mulf %254, %252 : vector<1x128xf32>
    %c0_222 = arith.constant 0 : index
    %c5_223 = arith.constant 5 : index
    %c0_224 = arith.constant 0 : index
    %256 = vector.load %arg8[%c0_222, %c5_223, %c0_224] : memref<1x16x128xf32, #tpu.memory_space<vmem>>, vector<1x1x128xf32>
    %257 = vector.shape_cast %256 : vector<1x1x128xf32> to vector<1x128xf32>
    %258 = vector.shape_cast %255 : vector<1x128xf32> to vector<1x1x128xf32>
    tpu.vector_store %arg8[%c0_222, %c5_223, %c0_224], %258 {strides = array<i32>} : memref<1x16x128xf32, #tpu.memory_space<vmem>>, vector<1x1x128xf32>,
    %c6_225 = arith.constant 6 : index
    %c0_226 = arith.constant 0 : index
    %c0_227 = arith.constant 0 : index
    %259 = vector.load %arg6[%c6_225, %c0_226, %c0_227] : memref<16x2x2xf32, #tpu.memory_space<vmem>>, vector<1x2x2xf32>
    %260 = vector.shape_cast %259 : vector<1x2x2xf32> to vector<2x2xf32>
    %cst_228 = arith.constant dense<0.000000e+00> : vector<1x2xf32>
    %261 = tpu.matmul %150, %260, %cst_228 {dimension_numbers = #tpu.dot_dimension_numbers<[1], [0], [0], [1], [0, 0, 1, 1], [], []>} : vector<1x2xf32>, vector<2x2xf32>, vector<1x2xf32> -> vector<1x2xf32>
    %c6_229 = arith.constant 6 : index
    %c0_230 = arith.constant 0 : index
    %c0_231 = arith.constant 0 : index
    %262 = vector.load %arg7[%c6_229, %c0_230, %c0_231] : memref<16x1x2xf32, #tpu.memory_space<vmem>>, vector<1x1x2xf32>
    %263 = vector.shape_cast %262 : vector<1x1x2xf32> to vector<1x2xf32>
    %264 = arith.addf %261, %263 : vector<1x2xf32>
    %265 = arith.negf %264 : vector<1x2xf32>
    %266 = math.exp %265 : vector<1x2xf32>
    %cst_232 = arith.constant 1.000000e+00 : f32
    %267 = vector.broadcast %cst_232 : f32 to vector<1x2xf32>
    %268 = arith.addf %267, %266 : vector<1x2xf32>
    %269 = arith.divf %267, %268 : vector<1x2xf32>
    %cst_233 = arith.constant dense<0.000000e+00> : vector<1x128xf32>
    %270 = tpu.matmul %269, %1, %cst_233 {dimension_numbers = #tpu.dot_dimension_numbers<[1], [0], [0], [1], [0, 0, 1, 1], [], []>} : vector<1x2xf32>, vector<2x128xf32>, vector<1x128xf32> -> vector<1x128xf32>
    %c0_234 = arith.constant 0 : index
    %c6_235 = arith.constant 6 : index
    %c0_236 = arith.constant 0 : index
    %271 = vector.load %arg1[%c0_234, %c6_235, %c0_236] : memref<1x16x128xf32, #tpu.memory_space<vmem>>, vector<1x1x128xf32>
    %272 = vector.shape_cast %271 : vector<1x1x128xf32> to vector<1x128xf32>
    %273 = arith.mulf %272, %270 : vector<1x128xf32>
    %c0_237 = arith.constant 0 : index
    %c6_238 = arith.constant 6 : index
    %c0_239 = arith.constant 0 : index
    %274 = vector.load %arg8[%c0_237, %c6_238, %c0_239] : memref<1x16x128xf32, #tpu.memory_space<vmem>>, vector<1x1x128xf32>
    %275 = vector.shape_cast %274 : vector<1x1x128xf32> to vector<1x128xf32>
    %276 = vector.shape_cast %273 : vector<1x128xf32> to vector<1x1x128xf32>
    tpu.vector_store %arg8[%c0_237, %c6_238, %c0_239], %276 {strides = array<i32>} : memref<1x16x128xf32, #tpu.memory_space<vmem>>, vector<1x1x128xf32>,
    %c7_240 = arith.constant 7 : index
    %c0_241 = arith.constant 0 : index
    %c0_242 = arith.constant 0 : index
    %277 = vector.load %arg6[%c7_240, %c0_241, %c0_242] : memref<16x2x2xf32, #tpu.memory_space<vmem>>, vector<1x2x2xf32>
    %278 = vector.shape_cast %277 : vector<1x2x2xf32> to vector<2x2xf32>
    %cst_243 = arith.constant dense<0.000000e+00> : vector<1x2xf32>
    %279 = tpu.matmul %150, %278, %cst_243 {dimension_numbers = #tpu.dot_dimension_numbers<[1], [0], [0], [1], [0, 0, 1, 1], [], []>} : vector<1x2xf32>, vector<2x2xf32>, vector<1x2xf32> -> vector<1x2xf32>
    %c7_244 = arith.constant 7 : index
    %c0_245 = arith.constant 0 : index
    %c0_246 = arith.constant 0 : index
    %280 = vector.load %arg7[%c7_244, %c0_245, %c0_246] : memref<16x1x2xf32, #tpu.memory_space<vmem>>, vector<1x1x2xf32>
    %281 = vector.shape_cast %280 : vector<1x1x2xf32> to vector<1x2xf32>
    %282 = arith.addf %279, %281 : vector<1x2xf32>
    %283 = arith.negf %282 : vector<1x2xf32>
    %284 = math.exp %283 : vector<1x2xf32>
    %cst_247 = arith.constant 1.000000e+00 : f32
    %285 = vector.broadcast %cst_247 : f32 to vector<1x2xf32>
    %286 = arith.addf %285, %284 : vector<1x2xf32>
    %287 = arith.divf %285, %286 : vector<1x2xf32>
    %cst_248 = arith.constant dense<0.000000e+00> : vector<1x128xf32>
    %288 = tpu.matmul %287, %1, %cst_248 {dimension_numbers = #tpu.dot_dimension_numbers<[1], [0], [0], [1], [0, 0, 1, 1], [], []>} : vector<1x2xf32>, vector<2x128xf32>, vector<1x128xf32> -> vector<1x128xf32>
    %c0_249 = arith.constant 0 : index
    %c7_250 = arith.constant 7 : index
    %c0_251 = arith.constant 0 : index
    %289 = vector.load %arg1[%c0_249, %c7_250, %c0_251] : memref<1x16x128xf32, #tpu.memory_space<vmem>>, vector<1x1x128xf32>
    %290 = vector.shape_cast %289 : vector<1x1x128xf32> to vector<1x128xf32>
    %291 = arith.mulf %290, %288 : vector<1x128xf32>
    %c0_252 = arith.constant 0 : index
    %c7_253 = arith.constant 7 : index
    %c0_254 = arith.constant 0 : index
    %292 = vector.load %arg8[%c0_252, %c7_253, %c0_254] : memref<1x16x128xf32, #tpu.memory_space<vmem>>, vector<1x1x128xf32>
    %293 = vector.shape_cast %292 : vector<1x1x128xf32> to vector<1x128xf32>
    %294 = vector.shape_cast %291 : vector<1x128xf32> to vector<1x1x128xf32>
    tpu.vector_store %arg8[%c0_252, %c7_253, %c0_254], %294 {strides = array<i32>} : memref<1x16x128xf32, #tpu.memory_space<vmem>>, vector<1x1x128xf32>,
    %c8_255 = arith.constant 8 : index
    %c0_256 = arith.constant 0 : index
    %c0_257 = arith.constant 0 : index
    %295 = vector.load %arg6[%c8_255, %c0_256, %c0_257] : memref<16x2x2xf32, #tpu.memory_space<vmem>>, vector<1x2x2xf32>
    %296 = vector.shape_cast %295 : vector<1x2x2xf32> to vector<2x2xf32>
    %cst_258 = arith.constant dense<0.000000e+00> : vector<1x2xf32>
    %297 = tpu.matmul %150, %296, %cst_258 {dimension_numbers = #tpu.dot_dimension_numbers<[1], [0], [0], [1], [0, 0, 1, 1], [], []>} : vector<1x2xf32>, vector<2x2xf32>, vector<1x2xf32> -> vector<1x2xf32>
    %c8_259 = arith.constant 8 : index
    %c0_260 = arith.constant 0 : index
    %c0_261 = arith.constant 0 : index
    %298 = vector.load %arg7[%c8_259, %c0_260, %c0_261] : memref<16x1x2xf32, #tpu.memory_space<vmem>>, vector<1x1x2xf32>
    %299 = vector.shape_cast %298 : vector<1x1x2xf32> to vector<1x2xf32>
    %300 = arith.addf %297, %299 : vector<1x2xf32>
    %301 = arith.negf %300 : vector<1x2xf32>
    %302 = math.exp %301 : vector<1x2xf32>
    %cst_262 = arith.constant 1.000000e+00 : f32
    %303 = vector.broadcast %cst_262 : f32 to vector<1x2xf32>
    %304 = arith.addf %303, %302 : vector<1x2xf32>
    %305 = arith.divf %303, %304 : vector<1x2xf32>
    %cst_263 = arith.constant dense<0.000000e+00> : vector<1x128xf32>
    %306 = tpu.matmul %305, %1, %cst_263 {dimension_numbers = #tpu.dot_dimension_numbers<[1], [0], [0], [1], [0, 0, 1, 1], [], []>} : vector<1x2xf32>, vector<2x128xf32>, vector<1x128xf32> -> vector<1x128xf32>
    %c0_264 = arith.constant 0 : index
    %c8_265 = arith.constant 8 : index
    %c0_266 = arith.constant 0 : index
    %307 = vector.load %arg1[%c0_264, %c8_265, %c0_266] : memref<1x16x128xf32, #tpu.memory_space<vmem>>, vector<1x1x128xf32>
    %308 = vector.shape_cast %307 : vector<1x1x128xf32> to vector<1x128xf32>
    %309 = arith.mulf %308, %306 : vector<1x128xf32>
    %c0_267 = arith.constant 0 : index
    %c8_268 = arith.constant 8 : index
    %c0_269 = arith.constant 0 : index
    %310 = vector.load %arg8[%c0_267, %c8_268, %c0_269] : memref<1x16x128xf32, #tpu.memory_space<vmem>>, vector<1x1x128xf32>
    %311 = vector.shape_cast %310 : vector<1x1x128xf32> to vector<1x128xf32>
    %312 = vector.shape_cast %309 : vector<1x128xf32> to vector<1x1x128xf32>
    tpu.vector_store %arg8[%c0_267, %c8_268, %c0_269], %312 {strides = array<i32>} : memref<1x16x128xf32, #tpu.memory_space<vmem>>, vector<1x1x128xf32>,
    %c9_270 = arith.constant 9 : index
    %c0_271 = arith.constant 0 : index
    %c0_272 = arith.constant 0 : index
    %313 = vector.load %arg6[%c9_270, %c0_271, %c0_272] : memref<16x2x2xf32, #tpu.memory_space<vmem>>, vector<1x2x2xf32>
    %314 = vector.shape_cast %313 : vector<1x2x2xf32> to vector<2x2xf32>
    %cst_273 = arith.constant dense<0.000000e+00> : vector<1x2xf32>
    %315 = tpu.matmul %150, %314, %cst_273 {dimension_numbers = #tpu.dot_dimension_numbers<[1], [0], [0], [1], [0, 0, 1, 1], [], []>} : vector<1x2xf32>, vector<2x2xf32>, vector<1x2xf32> -> vector<1x2xf32>
    %c9_274 = arith.constant 9 : index
    %c0_275 = arith.constant 0 : index
    %c0_276 = arith.constant 0 : index
    %316 = vector.load %arg7[%c9_274, %c0_275, %c0_276] : memref<16x1x2xf32, #tpu.memory_space<vmem>>, vector<1x1x2xf32>
    %317 = vector.shape_cast %316 : vector<1x1x2xf32> to vector<1x2xf32>
    %318 = arith.addf %315, %317 : vector<1x2xf32>
    %319 = arith.negf %318 : vector<1x2xf32>
    %320 = math.exp %319 : vector<1x2xf32>
    %cst_277 = arith.constant 1.000000e+00 : f32
    %321 = vector.broadcast %cst_277 : f32 to vector<1x2xf32>
    %322 = arith.addf %321, %320 : vector<1x2xf32>
    %323 = arith.divf %321, %322 : vector<1x2xf32>
    %cst_278 = arith.constant dense<0.000000e+00> : vector<1x128xf32>
    %324 = tpu.matmul %323, %1, %cst_278 {dimension_numbers = #tpu.dot_dimension_numbers<[1], [0], [0], [1], [0, 0, 1, 1], [], []>} : vector<1x2xf32>, vector<2x128xf32>, vector<1x128xf32> -> vector<1x128xf32>
    %c0_279 = arith.constant 0 : index
    %c9_280 = arith.constant 9 : index
    %c0_281 = arith.constant 0 : index
    %325 = vector.load %arg1[%c0_279, %c9_280, %c0_281] : memref<1x16x128xf32, #tpu.memory_space<vmem>>, vector<1x1x128xf32>
    %326 = vector.shape_cast %325 : vector<1x1x128xf32> to vector<1x128xf32>
    %327 = arith.mulf %326, %324 : vector<1x128xf32>
    %c0_282 = arith.constant 0 : index
    %c9_283 = arith.constant 9 : index
    %c0_284 = arith.constant 0 : index
    %328 = vector.load %arg8[%c0_282, %c9_283, %c0_284] : memref<1x16x128xf32, #tpu.memory_space<vmem>>, vector<1x1x128xf32>
    %329 = vector.shape_cast %328 : vector<1x1x128xf32> to vector<1x128xf32>
    %330 = vector.shape_cast %327 : vector<1x128xf32> to vector<1x1x128xf32>
    tpu.vector_store %arg8[%c0_282, %c9_283, %c0_284], %330 {strides = array<i32>} : memref<1x16x128xf32, #tpu.memory_space<vmem>>, vector<1x1x128xf32>,
    %c10_285 = arith.constant 10 : index
    %c0_286 = arith.constant 0 : index
    %c0_287 = arith.constant 0 : index
    %331 = vector.load %arg6[%c10_285, %c0_286, %c0_287] : memref<16x2x2xf32, #tpu.memory_space<vmem>>, vector<1x2x2xf32>
    %332 = vector.shape_cast %331 : vector<1x2x2xf32> to vector<2x2xf32>
    %cst_288 = arith.constant dense<0.000000e+00> : vector<1x2xf32>
    %333 = tpu.matmul %150, %332, %cst_288 {dimension_numbers = #tpu.dot_dimension_numbers<[1], [0], [0], [1], [0, 0, 1, 1], [], []>} : vector<1x2xf32>, vector<2x2xf32>, vector<1x2xf32> -> vector<1x2xf32>
    %c10_289 = arith.constant 10 : index
    %c0_290 = arith.constant 0 : index
    %c0_291 = arith.constant 0 : index
    %334 = vector.load %arg7[%c10_289, %c0_290, %c0_291] : memref<16x1x2xf32, #tpu.memory_space<vmem>>, vector<1x1x2xf32>
    %335 = vector.shape_cast %334 : vector<1x1x2xf32> to vector<1x2xf32>
    %336 = arith.addf %333, %335 : vector<1x2xf32>
    %337 = arith.negf %336 : vector<1x2xf32>
    %338 = math.exp %337 : vector<1x2xf32>
    %cst_292 = arith.constant 1.000000e+00 : f32
    %339 = vector.broadcast %cst_292 : f32 to vector<1x2xf32>
    %340 = arith.addf %339, %338 : vector<1x2xf32>
    %341 = arith.divf %339, %340 : vector<1x2xf32>
    %cst_293 = arith.constant dense<0.000000e+00> : vector<1x128xf32>
    %342 = tpu.matmul %341, %1, %cst_293 {dimension_numbers = #tpu.dot_dimension_numbers<[1], [0], [0], [1], [0, 0, 1, 1], [], []>} : vector<1x2xf32>, vector<2x128xf32>, vector<1x128xf32> -> vector<1x128xf32>
    %c0_294 = arith.constant 0 : index
    %c10_295 = arith.constant 10 : index
    %c0_296 = arith.constant 0 : index
    %343 = vector.load %arg1[%c0_294, %c10_295, %c0_296] : memref<1x16x128xf32, #tpu.memory_space<vmem>>, vector<1x1x128xf32>
    %344 = vector.shape_cast %343 : vector<1x1x128xf32> to vector<1x128xf32>
    %345 = arith.mulf %344, %342 : vector<1x128xf32>
    %c0_297 = arith.constant 0 : index
    %c10_298 = arith.constant 10 : index
    %c0_299 = arith.constant 0 : index
    %346 = vector.load %arg8[%c0_297, %c10_298, %c0_299] : memref<1x16x128xf32, #tpu.memory_space<vmem>>, vector<1x1x128xf32>
    %347 = vector.shape_cast %346 : vector<1x1x128xf32> to vector<1x128xf32>
    %348 = vector.shape_cast %345 : vector<1x128xf32> to vector<1x1x128xf32>
    tpu.vector_store %arg8[%c0_297, %c10_298, %c0_299], %348 {strides = array<i32>} : memref<1x16x128xf32, #tpu.memory_space<vmem>>, vector<1x1x128xf32>,
    %c11_300 = arith.constant 11 : index
    %c0_301 = arith.constant 0 : index
    %c0_302 = arith.constant 0 : index
    %349 = vector.load %arg6[%c11_300, %c0_301, %c0_302] : memref<16x2x2xf32, #tpu.memory_space<vmem>>, vector<1x2x2xf32>
    %350 = vector.shape_cast %349 : vector<1x2x2xf32> to vector<2x2xf32>
    %cst_303 = arith.constant dense<0.000000e+00> : vector<1x2xf32>
    %351 = tpu.matmul %150, %350, %cst_303 {dimension_numbers = #tpu.dot_dimension_numbers<[1], [0], [0], [1], [0, 0, 1, 1], [], []>} : vector<1x2xf32>, vector<2x2xf32>, vector<1x2xf32> -> vector<1x2xf32>
    %c11_304 = arith.constant 11 : index
    %c0_305 = arith.constant 0 : index
    %c0_306 = arith.constant 0 : index
    %352 = vector.load %arg7[%c11_304, %c0_305, %c0_306] : memref<16x1x2xf32, #tpu.memory_space<vmem>>, vector<1x1x2xf32>
    %353 = vector.shape_cast %352 : vector<1x1x2xf32> to vector<1x2xf32>
    %354 = arith.addf %351, %353 : vector<1x2xf32>
    %355 = arith.negf %354 : vector<1x2xf32>
    %356 = math.exp %355 : vector<1x2xf32>
    %cst_307 = arith.constant 1.000000e+00 : f32
    %357 = vector.broadcast %cst_307 : f32 to vector<1x2xf32>
    %358 = arith.addf %357, %356 : vector<1x2xf32>
    %359 = arith.divf %357, %358 : vector<1x2xf32>
    %cst_308 = arith.constant dense<0.000000e+00> : vector<1x128xf32>
    %360 = tpu.matmul %359, %1, %cst_308 {dimension_numbers = #tpu.dot_dimension_numbers<[1], [0], [0], [1], [0, 0, 1, 1], [], []>} : vector<1x2xf32>, vector<2x128xf32>, vector<1x128xf32> -> vector<1x128xf32>
    %c0_309 = arith.constant 0 : index
    %c11_310 = arith.constant 11 : index
    %c0_311 = arith.constant 0 : index
    %361 = vector.load %arg1[%c0_309, %c11_310, %c0_311] : memref<1x16x128xf32, #tpu.memory_space<vmem>>, vector<1x1x128xf32>
    %362 = vector.shape_cast %361 : vector<1x1x128xf32> to vector<1x128xf32>
    %363 = arith.mulf %362, %360 : vector<1x128xf32>
    %c0_312 = arith.constant 0 : index
    %c11_313 = arith.constant 11 : index
    %c0_314 = arith.constant 0 : index
    %364 = vector.load %arg8[%c0_312, %c11_313, %c0_314] : memref<1x16x128xf32, #tpu.memory_space<vmem>>, vector<1x1x128xf32>
    %365 = vector.shape_cast %364 : vector<1x1x128xf32> to vector<1x128xf32>
    %366 = vector.shape_cast %363 : vector<1x128xf32> to vector<1x1x128xf32>
    tpu.vector_store %arg8[%c0_312, %c11_313, %c0_314], %366 {strides = array<i32>} : memref<1x16x128xf32, #tpu.memory_space<vmem>>, vector<1x1x128xf32>,
    %c12_315 = arith.constant 12 : index
    %c0_316 = arith.constant 0 : index
    %c0_317 = arith.constant 0 : index
    %367 = vector.load %arg6[%c12_315, %c0_316, %c0_317] : memref<16x2x2xf32, #tpu.memory_space<vmem>>, vector<1x2x2xf32>
    %368 = vector.shape_cast %367 : vector<1x2x2xf32> to vector<2x2xf32>
    %cst_318 = arith.constant dense<0.000000e+00> : vector<1x2xf32>
    %369 = tpu.matmul %150, %368, %cst_318 {dimension_numbers = #tpu.dot_dimension_numbers<[1], [0], [0], [1], [0, 0, 1, 1], [], []>} : vector<1x2xf32>, vector<2x2xf32>, vector<1x2xf32> -> vector<1x2xf32>
    %c12_319 = arith.constant 12 : index
    %c0_320 = arith.constant 0 : index
    %c0_321 = arith.constant 0 : index
    %370 = vector.load %arg7[%c12_319, %c0_320, %c0_321] : memref<16x1x2xf32, #tpu.memory_space<vmem>>, vector<1x1x2xf32>
    %371 = vector.shape_cast %370 : vector<1x1x2xf32> to vector<1x2xf32>
    %372 = arith.addf %369, %371 : vector<1x2xf32>
    %373 = arith.negf %372 : vector<1x2xf32>
    %374 = math.exp %373 : vector<1x2xf32>
    %cst_322 = arith.constant 1.000000e+00 : f32
    %375 = vector.broadcast %cst_322 : f32 to vector<1x2xf32>
    %376 = arith.addf %375, %374 : vector<1x2xf32>
    %377 = arith.divf %375, %376 : vector<1x2xf32>
    %cst_323 = arith.constant dense<0.000000e+00> : vector<1x128xf32>
    %378 = tpu.matmul %377, %1, %cst_323 {dimension_numbers = #tpu.dot_dimension_numbers<[1], [0], [0], [1], [0, 0, 1, 1], [], []>} : vector<1x2xf32>, vector<2x128xf32>, vector<1x128xf32> -> vector<1x128xf32>
    %c0_324 = arith.constant 0 : index
    %c12_325 = arith.constant 12 : index
    %c0_326 = arith.constant 0 : index
    %379 = vector.load %arg1[%c0_324, %c12_325, %c0_326] : memref<1x16x128xf32, #tpu.memory_space<vmem>>, vector<1x1x128xf32>
    %380 = vector.shape_cast %379 : vector<1x1x128xf32> to vector<1x128xf32>
    %381 = arith.mulf %380, %378 : vector<1x128xf32>
    %c0_327 = arith.constant 0 : index
    %c12_328 = arith.constant 12 : index
    %c0_329 = arith.constant 0 : index
    %382 = vector.load %arg8[%c0_327, %c12_328, %c0_329] : memref<1x16x128xf32, #tpu.memory_space<vmem>>, vector<1x1x128xf32>
    %383 = vector.shape_cast %382 : vector<1x1x128xf32> to vector<1x128xf32>
    %384 = vector.shape_cast %381 : vector<1x128xf32> to vector<1x1x128xf32>
    tpu.vector_store %arg8[%c0_327, %c12_328, %c0_329], %384 {strides = array<i32>} : memref<1x16x128xf32, #tpu.memory_space<vmem>>, vector<1x1x128xf32>,
    %c13_330 = arith.constant 13 : index
    %c0_331 = arith.constant 0 : index
    %c0_332 = arith.constant 0 : index
    %385 = vector.load %arg6[%c13_330, %c0_331, %c0_332] : memref<16x2x2xf32, #tpu.memory_space<vmem>>, vector<1x2x2xf32>
    %386 = vector.shape_cast %385 : vector<1x2x2xf32> to vector<2x2xf32>
    %cst_333 = arith.constant dense<0.000000e+00> : vector<1x2xf32>
    %387 = tpu.matmul %150, %386, %cst_333 {dimension_numbers = #tpu.dot_dimension_numbers<[1], [0], [0], [1], [0, 0, 1, 1], [], []>} : vector<1x2xf32>, vector<2x2xf32>, vector<1x2xf32> -> vector<1x2xf32>
    %c13_334 = arith.constant 13 : index
    %c0_335 = arith.constant 0 : index
    %c0_336 = arith.constant 0 : index
    %388 = vector.load %arg7[%c13_334, %c0_335, %c0_336] : memref<16x1x2xf32, #tpu.memory_space<vmem>>, vector<1x1x2xf32>
    %389 = vector.shape_cast %388 : vector<1x1x2xf32> to vector<1x2xf32>
    %390 = arith.addf %387, %389 : vector<1x2xf32>
    %391 = arith.negf %390 : vector<1x2xf32>
    %392 = math.exp %391 : vector<1x2xf32>
    %cst_337 = arith.constant 1.000000e+00 : f32
    %393 = vector.broadcast %cst_337 : f32 to vector<1x2xf32>
    %394 = arith.addf %393, %392 : vector<1x2xf32>
    %395 = arith.divf %393, %394 : vector<1x2xf32>
    %cst_338 = arith.constant dense<0.000000e+00> : vector<1x128xf32>
    %396 = tpu.matmul %395, %1, %cst_338 {dimension_numbers = #tpu.dot_dimension_numbers<[1], [0], [0], [1], [0, 0, 1, 1], [], []>} : vector<1x2xf32>, vector<2x128xf32>, vector<1x128xf32> -> vector<1x128xf32>
    %c0_339 = arith.constant 0 : index
    %c13_340 = arith.constant 13 : index
    %c0_341 = arith.constant 0 : index
    %397 = vector.load %arg1[%c0_339, %c13_340, %c0_341] : memref<1x16x128xf32, #tpu.memory_space<vmem>>, vector<1x1x128xf32>
    %398 = vector.shape_cast %397 : vector<1x1x128xf32> to vector<1x128xf32>
    %399 = arith.mulf %398, %396 : vector<1x128xf32>
    %c0_342 = arith.constant 0 : index
    %c13_343 = arith.constant 13 : index
    %c0_344 = arith.constant 0 : index
    %400 = vector.load %arg8[%c0_342, %c13_343, %c0_344] : memref<1x16x128xf32, #tpu.memory_space<vmem>>, vector<1x1x128xf32>
    %401 = vector.shape_cast %400 : vector<1x1x128xf32> to vector<1x128xf32>
    %402 = vector.shape_cast %399 : vector<1x128xf32> to vector<1x1x128xf32>
    tpu.vector_store %arg8[%c0_342, %c13_343, %c0_344], %402 {strides = array<i32>} : memref<1x16x128xf32, #tpu.memory_space<vmem>>, vector<1x1x128xf32>,
    %c14_345 = arith.constant 14 : index
    %c0_346 = arith.constant 0 : index
    %c0_347 = arith.constant 0 : index
    %403 = vector.load %arg6[%c14_345, %c0_346, %c0_347] : memref<16x2x2xf32, #tpu.memory_space<vmem>>, vector<1x2x2xf32>
    %404 = vector.shape_cast %403 : vector<1x2x2xf32> to vector<2x2xf32>
    %cst_348 = arith.constant dense<0.000000e+00> : vector<1x2xf32>
    %405 = tpu.matmul %150, %404, %cst_348 {dimension_numbers = #tpu.dot_dimension_numbers<[1], [0], [0], [1], [0, 0, 1, 1], [], []>} : vector<1x2xf32>, vector<2x2xf32>, vector<1x2xf32> -> vector<1x2xf32>
    %c14_349 = arith.constant 14 : index
    %c0_350 = arith.constant 0 : index
    %c0_351 = arith.constant 0 : index
    %406 = vector.load %arg7[%c14_349, %c0_350, %c0_351] : memref<16x1x2xf32, #tpu.memory_space<vmem>>, vector<1x1x2xf32>
    %407 = vector.shape_cast %406 : vector<1x1x2xf32> to vector<1x2xf32>
    %408 = arith.addf %405, %407 : vector<1x2xf32>
    %409 = arith.negf %408 : vector<1x2xf32>
    %410 = math.exp %409 : vector<1x2xf32>
    %cst_352 = arith.constant 1.000000e+00 : f32
    %411 = vector.broadcast %cst_352 : f32 to vector<1x2xf32>
    %412 = arith.addf %411, %410 : vector<1x2xf32>
    %413 = arith.divf %411, %412 : vector<1x2xf32>
    %cst_353 = arith.constant dense<0.000000e+00> : vector<1x128xf32>
    %414 = tpu.matmul %413, %1, %cst_353 {dimension_numbers = #tpu.dot_dimension_numbers<[1], [0], [0], [1], [0, 0, 1, 1], [], []>} : vector<1x2xf32>, vector<2x128xf32>, vector<1x128xf32> -> vector<1x128xf32>
    %c0_354 = arith.constant 0 : index
    %c14_355 = arith.constant 14 : index
    %c0_356 = arith.constant 0 : index
    %415 = vector.load %arg1[%c0_354, %c14_355, %c0_356] : memref<1x16x128xf32, #tpu.memory_space<vmem>>, vector<1x1x128xf32>
    %416 = vector.shape_cast %415 : vector<1x1x128xf32> to vector<1x128xf32>
    %417 = arith.mulf %416, %414 : vector<1x128xf32>
    %c0_357 = arith.constant 0 : index
    %c14_358 = arith.constant 14 : index
    %c0_359 = arith.constant 0 : index
    %418 = vector.load %arg8[%c0_357, %c14_358, %c0_359] : memref<1x16x128xf32, #tpu.memory_space<vmem>>, vector<1x1x128xf32>
    %419 = vector.shape_cast %418 : vector<1x1x128xf32> to vector<1x128xf32>
    %420 = vector.shape_cast %417 : vector<1x128xf32> to vector<1x1x128xf32>
    tpu.vector_store %arg8[%c0_357, %c14_358, %c0_359], %420 {strides = array<i32>} : memref<1x16x128xf32, #tpu.memory_space<vmem>>, vector<1x1x128xf32>,
    %c15_360 = arith.constant 15 : index
    %c0_361 = arith.constant 0 : index
    %c0_362 = arith.constant 0 : index
    %421 = vector.load %arg6[%c15_360, %c0_361, %c0_362] : memref<16x2x2xf32, #tpu.memory_space<vmem>>, vector<1x2x2xf32>
    %422 = vector.shape_cast %421 : vector<1x2x2xf32> to vector<2x2xf32>
    %cst_363 = arith.constant dense<0.000000e+00> : vector<1x2xf32>
    %423 = tpu.matmul %150, %422, %cst_363 {dimension_numbers = #tpu.dot_dimension_numbers<[1], [0], [0], [1], [0, 0, 1, 1], [], []>} : vector<1x2xf32>, vector<2x2xf32>, vector<1x2xf32> -> vector<1x2xf32>
    %c15_364 = arith.constant 15 : index
    %c0_365 = arith.constant 0 : index
    %c0_366 = arith.constant 0 : index
    %424 = vector.load %arg7[%c15_364, %c0_365, %c0_366] : memref<16x1x2xf32, #tpu.memory_space<vmem>>, vector<1x1x2xf32>
    %425 = vector.shape_cast %424 : vector<1x1x2xf32> to vector<1x2xf32>
    %426 = arith.addf %423, %425 : vector<1x2xf32>
    %427 = arith.negf %426 : vector<1x2xf32>
    %428 = math.exp %427 : vector<1x2xf32>
    %cst_367 = arith.constant 1.000000e+00 : f32
    %429 = vector.broadcast %cst_367 : f32 to vector<1x2xf32>
    %430 = arith.addf %429, %428 : vector<1x2xf32>
    %431 = arith.divf %429, %430 : vector<1x2xf32>
    %cst_368 = arith.constant dense<0.000000e+00> : vector<1x128xf32>
    %432 = tpu.matmul %431, %1, %cst_368 {dimension_numbers = #tpu.dot_dimension_numbers<[1], [0], [0], [1], [0, 0, 1, 1], [], []>} : vector<1x2xf32>, vector<2x128xf32>, vector<1x128xf32> -> vector<1x128xf32>
    %c0_369 = arith.constant 0 : index
    %c15_370 = arith.constant 15 : index
    %c0_371 = arith.constant 0 : index
    %433 = vector.load %arg1[%c0_369, %c15_370, %c0_371] : memref<1x16x128xf32, #tpu.memory_space<vmem>>, vector<1x1x128xf32>
    %434 = vector.shape_cast %433 : vector<1x1x128xf32> to vector<1x128xf32>
    %435 = arith.mulf %434, %432 : vector<1x128xf32>
    %c0_372 = arith.constant 0 : index
    %c15_373 = arith.constant 15 : index
    %c0_374 = arith.constant 0 : index
    %436 = vector.load %arg8[%c0_372, %c15_373, %c0_374] : memref<1x16x128xf32, #tpu.memory_space<vmem>>, vector<1x1x128xf32>
    %437 = vector.shape_cast %436 : vector<1x1x128xf32> to vector<1x128xf32>
    %438 = vector.shape_cast %435 : vector<1x128xf32> to vector<1x1x128xf32>
    tpu.vector_store %arg8[%c0_372, %c15_373, %c0_374], %438 {strides = array<i32>} : memref<1x16x128xf32, #tpu.memory_space<vmem>>, vector<1x1x128xf32>,
    return
  }
  func.func @transform_0(%arg0: i32) -> (i32, i32, i32) {
    %c0_i32 = arith.constant 0 : i32
    %c0_i32_0 = arith.constant 0 : i32
    %c0_i32_1 = arith.constant 0 : i32
    return %arg0, %c0_i32, %c0_i32_0 : i32, i32, i32
  }
  func.func @transform_1(%arg0: i32) -> (i32, i32) {
    %c0_i32 = arith.constant 0 : i32
    %c0_i32_0 = arith.constant 0 : i32
    %c0_i32_1 = arith.constant 0 : i32
    return %c0_i32, %c0_i32_0 : i32, i32
  }
  func.func @transform_2(%arg0: i32) -> (i32, i32) {
    %c0_i32 = arith.constant 0 : i32
    %c0_i32_0 = arith.constant 0 : i32
    %c0_i32_1 = arith.constant 0 : i32
    return %c0_i32, %c0_i32_0 : i32, i32
  }
  func.func @transform_3(%arg0: i32) -> (i32, i32, i32) {
    %c0_i32 = arith.constant 0 : i32
    %c0_i32_0 = arith.constant 0 : i32
    %c0_i32_1 = arith.constant 0 : i32
    %c0_i32_2 = arith.constant 0 : i32
    return %c0_i32, %c0_i32_0, %c0_i32_1 : i32, i32, i32
  }
  func.func @transform_4(%arg0: i32) -> (i32, i32) {
    %c0_i32 = arith.constant 0 : i32
    %c0_i32_0 = arith.constant 0 : i32
    %c0_i32_1 = arith.constant 0 : i32
    return %c0_i32, %c0_i32_0 : i32, i32
  }
  func.func @transform_5(%arg0: i32) -> (i32, i32, i32) {
    %c0_i32 = arith.constant 0 : i32
    %c0_i32_0 = arith.constant 0 : i32
    %c0_i32_1 = arith.constant 0 : i32
    %c0_i32_2 = arith.constant 0 : i32
    return %c0_i32, %c0_i32_0, %c0_i32_1 : i32, i32, i32
  }
  func.func @transform_6(%arg0: i32) -> (i32, i32, i32) {
    %c0_i32 = arith.constant 0 : i32
    %c0_i32_0 = arith.constant 0 : i32
    %c0_i32_1 = arith.constant 0 : i32
    %c0_i32_2 = arith.constant 0 : i32
    return %c0_i32, %c0_i32_0, %c0_i32_1 : i32, i32, i32
  }
  func.func @transform_7(%arg0: i32) -> (i32, i32, i32) {
    %c0_i32 = arith.constant 0 : i32
    %c0_i32_0 = arith.constant 0 : i32
    %c0_i32_1 = arith.constant 0 : i32
    return %arg0, %c0_i32, %c0_i32_0 : i32, i32, i32
  }
}

</mosaic_0001>

<bundles_post_ra>
// kernel: tpu_custom_call.1
= control target key start
LH: loop header
LB: loop body
LE: loop exit
PB: predicated region body
PF: predicated region fallthrough
CT: control target
= control target key end

     0   :  { %12 = vsyncpa [#allocation3], 0  ;;  %s8194_s0 = inlined_call_operand.vmem [shape: f32[2,16,128], index: 0, kind: input, shape index: {}]   ;;  %s8195_s1 = inlined_call_operand.vmem [shape: f32[128,2], index: 1, kind: input, shape index: {}]   ;;  %s8196_s2 = inlined_call_operand.vmem [shape: f32[2,128], index: 2, kind: input, shape index: {}]   ;;  %s8197_s3 = inlined_call_operand.vmem [shape: f32[16,2,2], index: 3, kind: input, shape index: {}]   ;;  %s8198_s4 = inlined_call_operand.vmem [shape: f32[1,2], index: 4, kind: input, shape index: {}]   ;;  %s8199_s5 = inlined_call_operand.vmem [shape: f32[16,2,2], index: 5, kind: input, shape index: {}]   ;;  %s8200_s6 = inlined_call_operand.vmem [shape: f32[16,1,2], index: 6, kind: input, shape index: {}]   ;;  %s8201_s7 = inlined_call_operand.hbm [shape: f32[2,16,128], index: 7, kind: output, shape index: {}]  }
   0x1   :  { %14 = vsyncpa [#allocation3 + $0x1], 0  ;;  %s6905_s24 = smov 0   ;;  %s6907_s25 = smov 0  }
   0x2   :  { %s6909_s26 = smov 0   ;;  %s6911_s27 = smov 0  }
   0x3 LB: > { %s6926_s28 = sadd.s32 4294967295, %s6858_s27   ;;  %s5335_s29 = sadd.s32 4294967294, %s6858_s27   ;;  %s6858_s27 = sphi %s6911_s27, %s8207_s27   ;;  %s6854_s26 = sphi %s6909_s26, %s8206_s26   ;;  %s6850_s25 = sphi %s6907_s25, %s8205_s25   ;;  %s6846_s24 = sphi %s6905_s24, %s8204_s24  }
   0x4   : > { %s6930_s30 = sadd.s32 1, %s6858_s27   ;;  %s179_s8 = sadd.s32 1, %s6854_s26 }
   0x5   : > { %s176_s9 = ssub.s32 %s6858_s27, %s6930_s30  ;;  %p189_p0 = scmp.ne.s32.totalorder %s6854_s26, %s6850_s25 }
   0x6   : > { %p177_p1 = scmp.eq.s32.totalorder %s176_s9, 0  ;;  %p190_p2 = scmp.eq.s32.totalorder %s6926_s28, 1 }
   0x7   : > { %p195_p3 = scmp.ne.s32.totalorder %s6850_s25, %s6846_s24  ;;  %p196_p4 = scmp.eq.s32.totalorder %s5335_s29, 1 }
   0x8   : > { %s6941_s10 = scalar_select %p177_p1, %s6854_s26, %s179_s8  }
   0x9   : > { %p6943_p5 = por %p190_p2, %p189_p0  ;;  %p6947_p6 = por %p196_p4, %p195_p3 }
   0xa   : > { %p5338_p7 = scmp.ge.s32.totalorder %s6858_s27, 1  ;;  %p240_p8 = scmp.lt.s32.totalorder %s6858_s27, 3 }
   0xc   : > { %p241_p9 = pnand %p5338_p7, %p240_p8 }
   0xd   : > { %p272_p10 = scmp.lt.s32.totalorder (!%p241_p9), %s6926_s28, 1  ;;  %s269_s29 = sand.u32 (!%p241_p9), 1, %s6850_s25  }
   0xe   : > { %244 = sbr.rel (%p241_p9) target bundleno = 4122 (0x101a), region = 48  ;;  %s5339_s8 = sshll.u32 (!%p241_p9), %s269_s29, 4 }
   0xf   : > { %s8111_s9 = scalar_lea.vmem (!%p241_p9), [#allocation2], %s5339_s8  ;;  %s5505_s13 = sshll.u32 (!%p241_p9), %s6926_s28, 8 }
  0x10   : > { %s8147_s17 = scalar_lea.hbm (!%p241_p9), %s8201_s7, %s5505_s13 }
  0x13   : > { %v6956_v0 = vld [vmem:[%s8195_s1 + $0x78] sm:$0xff]  ;;  %v6860_v1 = vmov 0.0   ;;  %v6963_v2 = vld [vmem:[%s8195_s1 + $0x70] sm:$0xff]  ;;  %v6972_v3 = vld [vmem:[%s8195_s1 + $0x68] sm:$0xff]  ;;  %s273_s23 = scalar_select %p272_p10, %s6926_s28, 1  ;;  %vm6861_vm0 = vmmov 0  }
  0x14   : > { %5874 = vmatprep.subr.mxu0 %v6860_v1  ;;  %5909 = vmatprep.subr.mxu1 %v6860_v1  ;;  %v6981_v4 = vld [vmem:[%s8195_s1 + $0x60] sm:$0xff]  ;;  %v6990_v5 = vld [vmem:[%s8195_s1 + $0x58] sm:$0xff]  ;;  %v6999_v6 = vld [vmem:[%s8195_s1 + $0x50] sm:$0xff]  ;;  %vm445_vm1 = vcmask 1041408   ;;  %vm441_vm2 = vcmask 15360   ;;  %s8154_s28 = scalar_lea.sflag [#allocation3], %s269_s29 }
  0x15   : > { %5875 = vmatpush3.msra.mxu0 %v6956_v0  ;;  %5910 = vmatpush3.msra.mxu1 %v6956_v0  ;;  %v7008_v7 = vld [vmem:[%s8195_s1 + $0x48] sm:$0xff]  ;;  %v7017_v8 = vld [vmem:[%s8195_s1 + $0x40] sm:$0xff]  ;;  %v7026_v9 = vld [vmem:[%s8195_s1 + $0x38] sm:$0xff]  ;;  %s5504_s14 = sshll.u32 %s273_s23, 4 }
  0x16   : > { %5876 = vmatprep.subr.mxu0 %v6860_v1  ;;  %5911 = vmatprep.subr.mxu1 %v6860_v1  ;;  %v7035_v10 = vld [vmem:[%s8195_s1 + $0x30] sm:$0xff]  ;;  %v7045_v11 = vld [vmem:[%s8195_s1 + $0x28] sm:$0xff]  ;;  %v7054_v12 = vld [vmem:[%s8195_s1 + $0x20] sm:$0xff]  ;;  %s7089_s19 = scalar_lea.vmem %s8194_s0, %s5504_s14  ;;  %s5273_s14 = sshll.u32 %s8111_s9, 4  ;;  %s8149_s14 = int_to_ptr.vmem [resolvable:$true] %s5273_s14 }
  0x17   : > { %5877 = vmatpush3.msra.mxu0 %v6963_v2  ;;  %5912 = vmatpush3.msra.mxu1 %v6963_v2  ;;  %v7064_v13 = vld [vmem:[%s8195_s1 + $0x18] sm:$0xff]  ;;  %v7073_v14 = vld [vmem:[%s8195_s1 + $0x10] sm:$0xff]  ;;  %v7082_v15 = vld [vmem:[%s8195_s1 + $0x8] sm:$0xff]  ;;  %s6798_s18 = scalar_lea.vmem %s8149_s14, 256 }
  0x18   : > { %5878 = vmatprep.subr.mxu0 %v6860_v1  ;;  %5913 = vmatprep.subr.mxu1 %v6860_v1  ;;  %v7096_v16 = vld [vmem:[%s8195_s1] sm:$0xff]  ;;  %v5353_v46 = vld [vmem:[%s8197_s3 + $0x8] sm:$0x3]  ;;  %v5356_v54 = vld [vmem:[%s8197_s3 + $0xa] sm:$0x3]  ;;  %p6799_p11 = scmp.ne.s32.totalorder %s8149_s14, %s6798_s18 }
  0x19   : > { %5879 = vmatpush3.msra.mxu0 %v6972_v3  ;;  %5914 = vmatpush3.msra.mxu1 %v6972_v3  ;;  %v294_v17 = vld [vmem:[%s7089_s19] sm:$0x1]  ;;  %v367_v18 = vld [vmem:[%s7089_s19 + $0x1] sm:$0x1]  ;;  %v5342_v19 = vld [vmem:[%s8197_s3 + $0x2] sm:$0x3] }
  0x1a   : > { %5880 = vmatprep.subr.mxu0 %v6860_v1  ;;  %5915 = vmatprep.subr.mxu1 %v6860_v1  ;;  %v366_v20 = vld [vmem:[%s8197_s3] sm:$0x3]  ;;  %v595_v27 = vld [vmem:[%s7089_s19 + $0x2] sm:$0x1]  ;;  %v5347_v28 = vld [vmem:[%s8197_s3 + $0x4] sm:$0x3]  ;;  %p6800_p12 = pnand %p6799_p11, %p6943_p5 }
  0x1b   : > { %5881 = vmatpush3.msra.mxu0 %v6981_v4  ;;  %5916 = vmatpush3.msra.mxu1 %v6981_v4  ;;  %v746_v37 = vld [vmem:[%s7089_s19 + $0x3] sm:$0x1]  ;;  %v5350_v38 = vld [vmem:[%s8197_s3 + $0x6] sm:$0x3]  ;;  %v897_v45 = vld [vmem:[%s7089_s19 + $0x4] sm:$0x1] }
  0x1c   : > { %5882 = vmatprep.subr.mxu0 %v6860_v1  ;;  %5917 = vmatprep.subr.mxu1 %v6860_v1  ;;  %v1048_v53 = vld [vmem:[%s7089_s19 + $0x5] sm:$0x1]  ;;  %v1199_v61 = vld [vmem:[%s7089_s19 + $0x6] sm:$0x1]  ;;  %v5359_v62 = vld [vmem:[%s8197_s3 + $0xc] sm:$0x3]  ;;  %p6801_p13 = pneg %p6800_p12 }
  0x1d   : > { %5883 = vmatpush3.msra.mxu0 %v6990_v5  ;;  %5918 = vmatpush3.msra.mxu1 %v6990_v5 }
  0x1e   : > { %5884 = vmatprep.subr.mxu0 %v6860_v1  ;;  %5919 = vmatprep.subr.mxu1 %v6860_v1 }
  0x1f   : > { %5885 = vmatpush3.msra.mxu0 %v6999_v6  ;;  %5920 = vmatpush3.msra.mxu1 %v6999_v6 }
  0x20   : > { %5886 = vmatprep.subr.mxu0 %v6860_v1  ;;  %5921 = vmatprep.subr.mxu1 %v6860_v1 }
  0x21   : > { %5887 = vmatpush3.msra.mxu0 %v7008_v7  ;;  %5922 = vmatpush3.msra.mxu1 %v7008_v7 }
  0x22   : > { %5888 = vmatprep.subr.mxu0 %v6860_v1  ;;  %5923 = vmatprep.subr.mxu1 %v6860_v1 }
  0x23   : > { %5889 = vmatpush3.msra.mxu0 %v7017_v8  ;;  %5924 = vmatpush3.msra.mxu1 %v7017_v8 }
  0x24   : > { %5890 = vmatprep.subr.mxu0 %v6860_v1  ;;  %5925 = vmatprep.subr.mxu1 %v6860_v1 }
  0x25   : > { %5891 = vmatpush3.msra.mxu0 %v7026_v9  ;;  %5926 = vmatpush3.msra.mxu1 %v7026_v9 }
  0x26   : > { %5892 = vmatprep.subr.mxu0 %v6860_v1  ;;  %5927 = vmatprep.subr.mxu1 %v6860_v1 }
  0x27   : > { %5893 = vmatpush3.msra.mxu0 %v7035_v10  ;;  %5928 = vmatpush3.msra.mxu1 %v7035_v10 }
  0x28   : > { %5894 = vmatprep.subr.mxu0 %v6860_v1  ;;  %5929 = vmatprep.subr.mxu1 %v6860_v1 }
  0x29   : > { %5895 = vmatpush3.msra.mxu0 %v7045_v11  ;;  %5930 = vmatpush3.msra.mxu1 %v7045_v11 }
  0x2a   : > { %5896 = vmatprep.subr.mxu0 %v6860_v1  ;;  %5931 = vmatprep.subr.mxu1 %v6860_v1 }
  0x2b   : > { %5897 = vmatpush3.msra.mxu0 %v7054_v12  ;;  %5932 = vmatpush3.msra.mxu1 %v7054_v12 }
  0x2c   : > { %5898 = vmatprep.subr.mxu0 %v6860_v1  ;;  %5933 = vmatprep.subr.mxu1 %v6860_v1 }
  0x2d   : > { %5899 = vmatpush3.msra.mxu0 %v7064_v13  ;;  %5934 = vmatpush3.msra.mxu1 %v7064_v13 }
  0x2e   : > { %5900 = vmatprep.subr.mxu0 %v6860_v1  ;;  %5935 = vmatprep.subr.mxu1 %v6860_v1 }
  0x2f   : > { %5901 = vmatpush3.msra.mxu0 %v7073_v14  ;;  %5936 = vmatpush3.msra.mxu1 %v7073_v14 }
  0x30   : > { %5902 = vmatprep.subr.mxu0 %v6860_v1  ;;  %5937 = vmatprep.subr.mxu1 %v6860_v1 }
  0x31   : > { %5903 = vmatpush3.msra.mxu0 %v7082_v15  ;;  %5938 = vmatpush3.msra.mxu1 %v7082_v15 }
  0x32   : > { %5904 = vmatprep.subr.mxu0 %v6860_v1  ;;  %5939 = vmatprep.subr.mxu1 %v6860_v1 }
  0x33   : > { %5905 = vmatpush3.msra.mxu0 %v7096_v16  ;;  %5906 = vmatprep.mubr.msk.f32.mxu0 %vm6861_vm0, %v6860_v1 }
  0x34   : > { %5940 = vmatpush3.msra.mxu1 %v7096_v16  ;;  %5941 = vmatprep.mubr.msk.f32.mxu1 %vm6861_vm0, %v6860_v1 }
  0x35   : > { %5907 = vmatmul.mubr.f32.vlgmr.msra.gmra.mxu0 %v294_v17  ;;  %5942 = vmatmul.mubr.f32.vlgmr.msra.gmra.mxu1 %v367_v18 }
  0x36   : > { %5944 = vmatprep.subr.mxu0 %v6860_v1  ;;  %5949 = vmatprep.subr.mxu1 %v6860_v1 }
  0x37   : > { %5945 = vmatpush3.msk.msra.mxu0 %vm445_vm1, %v5342_v19  ;;  %5946 = vmatprep.mubr.msk.f32.mxu0 %vm6861_vm0, %v6860_v1 }
  0x38   : > { %5951 = vmatprep.mubr.msk.f32.mxu1 %vm6861_vm0, %v6860_v1  ;;  %5954 = vmatprep.subr.mxu0 %v6860_v1 }
  0x39   : > { %5950 = vmatpush3.msk.msra.mxu1 %vm445_vm1, %v366_v20 }
  0x3a   : > { %5989 = vmatprep.subr.mxu1 %v6860_v1 }
  0xf5   : > { %v361_v21 = vpop.f32.mrf.mxu0  ;;  %v434_v22 = vpop.f32.mrf.mxu1 }
  0xf6   : > { %v365_v23 = vmul.f32 0.015625, %v361_v21  ;;  %v438_v24 = vmul.f32 0.015625, %v434_v22  ;;  %v1350_v22 = vld [vmem:[%s7089_s19 + $0x7] sm:$0x1] }
  0xf7   : > { %v5943_v25 = vpop.f32.mrf.mxu1  ;;  %v5908_v26 = vpop.f32.mrf.mxu0 }
  0xf8   : > { %5947 = vmatmul.mubr.msk.f32.vlgmr.msra.gmra.mxu0 %vm441_vm2, %v438_v24  ;;  %5952 = vmatmul.mubr.msk.f32.vlgmr.msra.gmra.mxu1 %vm441_vm2, %v365_v23  ;;  %v5362_v23 = vld [vmem:[%s8197_s3 + $0xe] sm:$0x3] }
  0xf9   : > { %5955 = vmatpush3.msra.mxu0 %v6956_v0  ;;  %5986 = vmatprep.mubr.msk.f32.mxu0 %vm6861_vm0, %v6860_v1 }
  0xfa   : > { %5956 = vmatprep.subr.mxu0 %v6860_v1  ;;  %5991 = vmatprep.mubr.msk.f32.mxu1 %vm6861_vm0, %v6860_v1 }
  0xfb   : > { %5957 = vmatpush3.msra.mxu0 %v6963_v2  ;;  %5990 = vmatpush3.msk.msra.mxu1 %vm445_vm1, %v5347_v28 }
  0xfc   : > { %5958 = vmatprep.subr.mxu0 %v6860_v1  ;;  %5994 = vmatprep.subr.mxu1 %v6860_v1 }
  0xfd   : > { %5959 = vmatpush3.msra.mxu0 %v6972_v3 }
  0xfe   : > { %5960 = vmatprep.subr.mxu0 %v6860_v1 }
  0xff   : > { %5961 = vmatpush3.msra.mxu0 %v6981_v4 }
 0x100   : > { %5962 = vmatprep.subr.mxu0 %v6860_v1 }
 0x101   : > { %5963 = vmatpush3.msra.mxu0 %v6990_v5 }
 0x102   : > { %5964 = vmatprep.subr.mxu0 %v6860_v1 }
 0x103   : > { %5965 = vmatpush3.msra.mxu0 %v6999_v6 }
 0x104   : > { %5966 = vmatprep.subr.mxu0 %v6860_v1 }
 0x105   : > { %5967 = vmatpush3.msra.mxu0 %v7008_v7 }
 0x106   : > { %5968 = vmatprep.subr.mxu0 %v6860_v1 }
 0x107   : > { %5969 = vmatpush3.msra.mxu0 %v7017_v8 }
 0x108   : > { %5970 = vmatprep.subr.mxu0 %v6860_v1 }
 0x109   : > { %5971 = vmatpush3.msra.mxu0 %v7026_v9 }
 0x10a   : > { %5972 = vmatprep.subr.mxu0 %v6860_v1 }
 0x10b   : > { %5973 = vmatpush3.msra.mxu0 %v7035_v10 }
 0x10c   : > { %5974 = vmatprep.subr.mxu0 %v6860_v1 }
 0x10d   : > { %5975 = vmatpush3.msra.mxu0 %v7045_v11 }
 0x10e   : > { %5976 = vmatprep.subr.mxu0 %v6860_v1 }
 0x10f   : > { %5977 = vmatpush3.msra.mxu0 %v7054_v12 }
 0x110   : > { %5978 = vmatprep.subr.mxu0 %v6860_v1 }
 0x111   : > { %5979 = vmatpush3.msra.mxu0 %v7064_v13 }
 0x112   : > { %5980 = vmatprep.subr.mxu0 %v6860_v1 }
 0x113   : > { %5981 = vmatpush3.msra.mxu0 %v7073_v14 }
 0x114   : > { %5982 = vmatprep.subr.mxu0 %v6860_v1 }
 0x115   : > { %5983 = vmatpush3.msra.mxu0 %v7082_v15 }
 0x116   : > { %5984 = vmatprep.subr.mxu0 %v6860_v1 }
 0x117   : > { %5985 = vmatpush3.msra.mxu0 %v7096_v16 }
 0x118   : > { %5987 = vmatmul.mubr.f32.vlgmr.msra.gmra.mxu0 %v595_v27  ;;  %6029 = vmatprep.subr.mxu0 %v6860_v1 }
 0x119   : > { %6031 = vmatprep.mubr.msk.f32.mxu0 %vm6861_vm0, %v6860_v1  ;;  %6030 = vmatpush3.msk.msra.mxu0 %vm445_vm1, %v5350_v38  ;;  %v1652_v38 = vld [vmem:[%s7089_s19 + $0x9] sm:$0x1] }
 0x11a   : > { %6034 = vmatprep.subr.mxu0 %v6860_v1 }
 0x1b8   : > { %v515_v29 = vpop.f32.mrf.mxu0  ;;  %v591_v30 = vpop.f32.mrf.mxu1 }
 0x1b9   : > { %v592_v31 = vadd.f32 %v591_v30, %v515_v29  ;;  %v1501_v30 = vld [vmem:[%s7089_s19 + $0x8] sm:$0x1] }
 0x1ba   : > { %v5948_v32 = vpop.f32.mrf.mxu0  ;;  %v5953_v33 = vpop.f32.mrf.mxu1 }
 0x1d8   : > { %v662_v34 = vpop.f32.mrf.mxu0 }
 0x1d9   : > { %v666_v35 = vmul.f32 0.015625, %v662_v34 }
 0x1da   : > { %v5988_v36 = vpop.f32.mrf.mxu0 }
 0x1db   : > { %5992 = vmatmul.mubr.msk.f32.vlgmr.msra.gmra.mxu1 %vm441_vm2, %v666_v35 }
 0x1dc   : > { %5995 = vmatpush3.msra.mxu1 %v6956_v0  ;;  %6026 = vmatprep.mubr.msk.f32.mxu1 %vm6861_vm0, %v6860_v1 }
 0x1dd   : > { %5996 = vmatprep.subr.mxu1 %v6860_v1 }
 0x1de   : > { %5997 = vmatpush3.msra.mxu1 %v6963_v2 }
 0x1df   : > { %5998 = vmatprep.subr.mxu1 %v6860_v1 }
 0x1e0   : > { %5999 = vmatpush3.msra.mxu1 %v6972_v3 }
 0x1e1   : > { %6000 = vmatprep.subr.mxu1 %v6860_v1 }
 0x1e2   : > { %6001 = vmatpush3.msra.mxu1 %v6981_v4 }
 0x1e3   : > { %6002 = vmatprep.subr.mxu1 %v6860_v1 }
 0x1e4   : > { %6003 = vmatpush3.msra.mxu1 %v6990_v5 }
 0x1e5   : > { %6004 = vmatprep.subr.mxu1 %v6860_v1 }
 0x1e6   : > { %6005 = vmatpush3.msra.mxu1 %v6999_v6 }
 0x1e7   : > { %6006 = vmatprep.subr.mxu1 %v6860_v1 }
 0x1e8   : > { %6007 = vmatpush3.msra.mxu1 %v7008_v7 }
 0x1e9   : > { %6008 = vmatprep.subr.mxu1 %v6860_v1 }
 0x1ea   : > { %6009 = vmatpush3.msra.mxu1 %v7017_v8 }
 0x1eb   : > { %6010 = vmatprep.subr.mxu1 %v6860_v1 }
 0x1ec   : > { %6011 = vmatpush3.msra.mxu1 %v7026_v9 }
 0x1ed   : > { %6012 = vmatprep.subr.mxu1 %v6860_v1 }
 0x1ee   : > { %6013 = vmatpush3.msra.mxu1 %v7035_v10 }
 0x1ef   : > { %6014 = vmatprep.subr.mxu1 %v6860_v1 }
 0x1f0   : > { %6015 = vmatpush3.msra.mxu1 %v7045_v11 }
 0x1f1   : > { %6016 = vmatprep.subr.mxu1 %v6860_v1 }
 0x1f2   : > { %6017 = vmatpush3.msra.mxu1 %v7054_v12 }
 0x1f3   : > { %6018 = vmatprep.subr.mxu1 %v6860_v1 }
 0x1f4   : > { %6019 = vmatpush3.msra.mxu1 %v7064_v13 }
 0x1f5   : > { %6020 = vmatprep.subr.mxu1 %v6860_v1 }
 0x1f6   : > { %6021 = vmatpush3.msra.mxu1 %v7073_v14 }
 0x1f7   : > { %6022 = vmatprep.subr.mxu1 %v6860_v1 }
 0x1f8   : > { %6023 = vmatpush3.msra.mxu1 %v7082_v15 }
 0x1f9   : > { %6024 = vmatprep.subr.mxu1 %v6860_v1 }
 0x1fa   : > { %6025 = vmatpush3.msra.mxu1 %v7096_v16 }
 0x1fb   : > { %6027 = vmatmul.mubr.f32.vlgmr.msra.gmra.mxu1 %v746_v37  ;;  %6069 = vmatprep.subr.mxu1 %v6860_v1 }
 0x1fc   : > { %6071 = vmatprep.mubr.msk.f32.mxu1 %vm6861_vm0, %v6860_v1  ;;  %6070 = vmatpush3.msk.msra.mxu1 %vm445_vm1, %v5353_v46 }
 0x1fd   : > { %6074 = vmatprep.subr.mxu1 %v6860_v1 }
 0x29b   : > { %v741_v39 = vpop.f32.mrf.mxu1 }
 0x29c   : > { %v745_v40 = vadd.f32 %v741_v39, %v592_v31  ;;  %v5365_v31 = vld [vmem:[%s8197_s3 + $0x10] sm:$0x3]  ;;  %v5368_v39 = vld [vmem:[%s8197_s3 + $0x12] sm:$0x3] }
 0x29d   : > { %v5993_v41 = vpop.f32.mrf.mxu1 }
 0x2bb   : > { %v813_v42 = vpop.f32.mrf.mxu1 }
 0x2bc   : > { %v817_v43 = vmul.f32 0.015625, %v813_v42 }
 0x2bd   : > { %v6028_v44 = vpop.f32.mrf.mxu1 }
 0x2be   : > { %6032 = vmatmul.mubr.msk.f32.vlgmr.msra.gmra.mxu0 %vm441_vm2, %v817_v43 }
 0x2bf   : > { %6035 = vmatpush3.msra.mxu0 %v6956_v0  ;;  %6066 = vmatprep.mubr.msk.f32.mxu0 %vm6861_vm0, %v6860_v1 }
 0x2c0   : > { %6036 = vmatprep.subr.mxu0 %v6860_v1 }
 0x2c1   : > { %6037 = vmatpush3.msra.mxu0 %v6963_v2 }
 0x2c2   : > { %6038 = vmatprep.subr.mxu0 %v6860_v1 }
 0x2c3   : > { %6039 = vmatpush3.msra.mxu0 %v6972_v3 }
 0x2c4   : > { %6040 = vmatprep.subr.mxu0 %v6860_v1 }
 0x2c5   : > { %6041 = vmatpush3.msra.mxu0 %v6981_v4 }
 0x2c6   : > { %6042 = vmatprep.subr.mxu0 %v6860_v1 }
 0x2c7   : > { %6043 = vmatpush3.msra.mxu0 %v6990_v5 }
 0x2c8   : > { %6044 = vmatprep.subr.mxu0 %v6860_v1 }
 0x2c9   : > { %6045 = vmatpush3.msra.mxu0 %v6999_v6 }
 0x2ca   : > { %6046 = vmatprep.subr.mxu0 %v6860_v1 }
 0x2cb   : > { %6047 = vmatpush3.msra.mxu0 %v7008_v7 }
 0x2cc   : > { %6048 = vmatprep.subr.mxu0 %v6860_v1 }
 0x2cd   : > { %6049 = vmatpush3.msra.mxu0 %v7017_v8 }
 0x2ce   : > { %6050 = vmatprep.subr.mxu0 %v6860_v1 }
 0x2cf   : > { %6051 = vmatpush3.msra.mxu0 %v7026_v9 }
 0x2d0   : > { %6052 = vmatprep.subr.mxu0 %v6860_v1 }
 0x2d1   : > { %6053 = vmatpush3.msra.mxu0 %v7035_v10 }
 0x2d2   : > { %6054 = vmatprep.subr.mxu0 %v6860_v1 }
 0x2d3   : > { %6055 = vmatpush3.msra.mxu0 %v7045_v11 }
 0x2d4   : > { %6056 = vmatprep.subr.mxu0 %v6860_v1 }
 0x2d5   : > { %6057 = vmatpush3.msra.mxu0 %v7054_v12 }
 0x2d6   : > { %6058 = vmatprep.subr.mxu0 %v6860_v1 }
 0x2d7   : > { %6059 = vmatpush3.msra.mxu0 %v7064_v13 }
 0x2d8   : > { %6060 = vmatprep.subr.mxu0 %v6860_v1 }
 0x2d9   : > { %6061 = vmatpush3.msra.mxu0 %v7073_v14 }
 0x2da   : > { %6062 = vmatprep.subr.mxu0 %v6860_v1 }
 0x2db   : > { %6063 = vmatpush3.msra.mxu0 %v7082_v15 }
 0x2dc   : > { %6064 = vmatprep.subr.mxu0 %v6860_v1 }
 0x2dd   : > { %6065 = vmatpush3.msra.mxu0 %v7096_v16 }
 0x2de   : > { %6067 = vmatmul.mubr.f32.vlgmr.msra.gmra.mxu0 %v897_v45  ;;  %6109 = vmatprep.subr.mxu0 %v6860_v1 }
 0x2df   : > { %6111 = vmatprep.mubr.msk.f32.mxu0 %vm6861_vm0, %v6860_v1  ;;  %6110 = vmatpush3.msk.msra.mxu0 %vm445_vm1, %v5356_v54  ;;  %v7621_v54 = vld [vmem:[%s8195_s1 + $0x38] sm:$0xff] }
 0x2e0   : > { %6114 = vmatprep.subr.mxu0 %v6860_v1 }
 0x37e   : > { %v892_v47 = vpop.f32.mrf.mxu0 }
 0x37f   : > { %v896_v48 = vadd.f32 %v892_v47, %v745_v40  ;;  %v7520_v47 = vld [vmem:[%s8195_s1 + $0x78] sm:$0xff] }
 0x380   : > { %v6033_v49 = vpop.f32.mrf.mxu0 }
 0x381   : > { %v7536_v49 = vld [vmem:[%s8195_s1 + $0x68] sm:$0xff] }
 0x39e   : > { %v964_v50 = vpop.f32.mrf.mxu0 }
 0x39f   : > { %v968_v51 = vmul.f32 0.015625, %v964_v50  ;;  %v7543_v50 = vld [vmem:[%s8195_s1 + $0x60] sm:$0xff] }
 0x3a0   : > { %v6068_v52 = vpop.f32.mrf.mxu0 }
 0x3a1   : > { %6072 = vmatmul.mubr.msk.f32.vlgmr.msra.gmra.mxu1 %vm441_vm2, %v968_v51  ;;  %v7550_v51 = vld [vmem:[%s8195_s1 + $0x58] sm:$0xff]  ;;  %v7557_v52 = vld [vmem:[%s8195_s1 + $0x50] sm:$0xff] }
 0x3a2   : > { %6075 = vmatpush3.msra.mxu1 %v6956_v0  ;;  %6106 = vmatprep.mubr.msk.f32.mxu1 %vm6861_vm0, %v6860_v1 }
 0x3a3   : > { %6076 = vmatprep.subr.mxu1 %v6860_v1 }
 0x3a4   : > { %6077 = vmatpush3.msra.mxu1 %v6963_v2 }
 0x3a5   : > { %6078 = vmatprep.subr.mxu1 %v6860_v1 }
 0x3a6   : > { %6079 = vmatpush3.msra.mxu1 %v6972_v3 }
 0x3a7   : > { %6080 = vmatprep.subr.mxu1 %v6860_v1 }
 0x3a8   : > { %6081 = vmatpush3.msra.mxu1 %v6981_v4 }
 0x3a9   : > { %6082 = vmatprep.subr.mxu1 %v6860_v1 }
 0x3aa   : > { %6083 = vmatpush3.msra.mxu1 %v6990_v5 }
 0x3ab   : > { %6084 = vmatprep.subr.mxu1 %v6860_v1 }
 0x3ac   : > { %6085 = vmatpush3.msra.mxu1 %v6999_v6 }
 0x3ad   : > { %6086 = vmatprep.subr.mxu1 %v6860_v1 }
 0x3ae   : > { %6087 = vmatpush3.msra.mxu1 %v7008_v7 }
 0x3af   : > { %6088 = vmatprep.subr.mxu1 %v6860_v1 }
 0x3b0   : > { %6089 = vmatpush3.msra.mxu1 %v7017_v8 }
 0x3b1   : > { %6090 = vmatprep.subr.mxu1 %v6860_v1 }
 0x3b2   : > { %6091 = vmatpush3.msra.mxu1 %v7026_v9 }
 0x3b3   : > { %6092 = vmatprep.subr.mxu1 %v6860_v1 }
 0x3b4   : > { %6093 = vmatpush3.msra.mxu1 %v7035_v10 }
 0x3b5   : > { %6094 = vmatprep.subr.mxu1 %v6860_v1 }
 0x3b6   : > { %6095 = vmatpush3.msra.mxu1 %v7045_v11 }
 0x3b7   : > { %6096 = vmatprep.subr.mxu1 %v6860_v1 }
 0x3b8   : > { %6097 = vmatpush3.msra.mxu1 %v7054_v12 }
 0x3b9   : > { %6098 = vmatprep.subr.mxu1 %v6860_v1 }
 0x3ba   : > { %6099 = vmatpush3.msra.mxu1 %v7064_v13 }
 0x3bb   : > { %6100 = vmatprep.subr.mxu1 %v6860_v1 }
 0x3bc   : > { %6101 = vmatpush3.msra.mxu1 %v7073_v14 }
 0x3bd   : > { %6102 = vmatprep.subr.mxu1 %v6860_v1 }
 0x3be   : > { %6103 = vmatpush3.msra.mxu1 %v7082_v15 }
 0x3bf   : > { %6104 = vmatprep.subr.mxu1 %v6860_v1 }
 0x3c0   : > { %6105 = vmatpush3.msra.mxu1 %v7096_v16 }
 0x3c1   : > { %6107 = vmatmul.mubr.f32.vlgmr.msra.gmra.mxu1 %v1048_v53  ;;  %6149 = vmatprep.subr.mxu1 %v6860_v1  ;;  %v7564_v53 = vld [vmem:[%s8195_s1 + $0x48] sm:$0xff] }
 0x3c2   : > { %6151 = vmatprep.mubr.msk.f32.mxu1 %vm6861_vm0, %v6860_v1  ;;  %6150 = vmatpush3.msk.msra.mxu1 %vm445_vm1, %v5359_v62  ;;  %v7671_v62 = vld [vmem:[%s8195_s1] sm:$0xff] }
 0x3c3   : > { %6154 = vmatprep.subr.mxu1 %v6860_v1 }
 0x461   : > { %v1043_v55 = vpop.f32.mrf.mxu1 }
 0x462   : > { %v1047_v56 = vadd.f32 %v1043_v55, %v896_v48  ;;  %v7529_v48 = vld [vmem:[%s8195_s1 + $0x70] sm:$0xff] }
 0x463   : > { %v6073_v57 = vpop.f32.mrf.mxu1  ;;  %v7628_v55 = vld [vmem:[%s8195_s1 + $0x30] sm:$0xff] }
 0x464   : > { %v7642_v57 = vld [vmem:[%s8195_s1 + $0x20] sm:$0xff] }
 0x481   : > { %v1115_v58 = vpop.f32.mrf.mxu1 }
 0x482   : > { %v1119_v59 = vmul.f32 0.015625, %v1115_v58  ;;  %v7649_v58 = vld [vmem:[%s8195_s1 + $0x18] sm:$0xff] }
 0x483   : > { %v6108_v60 = vpop.f32.mrf.mxu1 }
 0x484   : > { %6112 = vmatmul.mubr.msk.f32.vlgmr.msra.gmra.mxu0 %vm441_vm2, %v1119_v59  ;;  %v7656_v59 = vld [vmem:[%s8195_s1 + $0x10] sm:$0xff]  ;;  %v7663_v60 = vld [vmem:[%s8195_s1 + $0x8] sm:$0xff] }
 0x485   : > { %6115 = vmatpush3.msra.mxu0 %v6956_v0  ;;  %6146 = vmatprep.mubr.msk.f32.mxu0 %vm6861_vm0, %v6860_v1 }
 0x486   : > { %6116 = vmatprep.subr.mxu0 %v6860_v1 }
 0x487   : > { %6117 = vmatpush3.msra.mxu0 %v6963_v2 }
 0x488   : > { %6118 = vmatprep.subr.mxu0 %v6860_v1 }
 0x489   : > { %6119 = vmatpush3.msra.mxu0 %v6972_v3 }
 0x48a   : > { %6120 = vmatprep.subr.mxu0 %v6860_v1 }
 0x48b   : > { %6121 = vmatpush3.msra.mxu0 %v6981_v4 }
 0x48c   : > { %6122 = vmatprep.subr.mxu0 %v6860_v1 }
 0x48d   : > { %6123 = vmatpush3.msra.mxu0 %v6990_v5 }
 0x48e   : > { %6124 = vmatprep.subr.mxu0 %v6860_v1 }
 0x48f   : > { %6125 = vmatpush3.msra.mxu0 %v6999_v6 }
 0x490   : > { %6126 = vmatprep.subr.mxu0 %v6860_v1 }
 0x491   : > { %6127 = vmatpush3.msra.mxu0 %v7008_v7 }
 0x492   : > { %6128 = vmatprep.subr.mxu0 %v6860_v1 }
 0x493   : > { %6129 = vmatpush3.msra.mxu0 %v7017_v8 }
 0x494   : > { %6130 = vmatprep.subr.mxu0 %v6860_v1 }
 0x495   : > { %6131 = vmatpush3.msra.mxu0 %v7026_v9 }
 0x496   : > { %6132 = vmatprep.subr.mxu0 %v6860_v1 }
 0x497   : > { %6133 = vmatpush3.msra.mxu0 %v7035_v10 }
 0x498   : > { %6134 = vmatprep.subr.mxu0 %v6860_v1 }
 0x499   : > { %6135 = vmatpush3.msra.mxu0 %v7045_v11 }
 0x49a   : > { %6136 = vmatprep.subr.mxu0 %v6860_v1 }
 0x49b   : > { %6137 = vmatpush3.msra.mxu0 %v7054_v12 }
 0x49c   : > { %6138 = vmatprep.subr.mxu0 %v6860_v1 }
 0x49d   : > { %6139 = vmatpush3.msra.mxu0 %v7064_v13 }
 0x49e   : > { %6140 = vmatprep.subr.mxu0 %v6860_v1 }
 0x49f   : > { %6141 = vmatpush3.msra.mxu0 %v7073_v14 }
 0x4a0   : > { %6142 = vmatprep.subr.mxu0 %v6860_v1 }
 0x4a1   : > { %6143 = vmatpush3.msra.mxu0 %v7082_v15 }
 0x4a2   : > { %6144 = vmatprep.subr.mxu0 %v6860_v1 }
 0x4a3   : > { %6145 = vmatpush3.msra.mxu0 %v7096_v16 }
 0x4a4   : > { %6147 = vmatmul.mubr.f32.vlgmr.msra.gmra.mxu0 %v1199_v61  ;;  %6189 = vmatprep.subr.mxu0 %v6860_v1  ;;  %v2105_v61 = vld [vmem:[%s7089_s19 + $0xc] sm:$0x1] }
 0x4a5   : > { %6191 = vmatprep.mubr.msk.f32.mxu0 %vm6861_vm0, %v6860_v1  ;;  %6190 = vmatpush3.msk.msra.mxu0 %vm445_vm1, %v5362_v23  ;;  %v2256_v23 = vld [vmem:[%s7089_s19 + $0xd] sm:$0x1] }
 0x4a6   : > { %6194 = vmatprep.subr.mxu0 %v6860_v1 }
 0x544   : > { %v1194_v63 = vpop.f32.mrf.mxu0 }
 0x545   : > { %v1198_v17 = vadd.f32 %v1194_v63, %v1047_v56  ;;  %v7635_v56 = vld [vmem:[%s8195_s1 + $0x28] sm:$0xff]  ;;  %v5377_v63 = vld [vmem:[%s8197_s3 + $0x18] sm:$0x3] }
 0x546   : > { %v6113_v18 = vpop.f32.mrf.mxu0 }
 0x564   : > { %v1266_v19 = vpop.f32.mrf.mxu0 }
 0x565   : > { %v1270_v20 = vmul.f32 0.015625, %v1266_v19 }
 0x566   : > { %v6148_v21 = vpop.f32.mrf.mxu0 }
 0x567   : > { %6152 = vmatmul.mubr.msk.f32.vlgmr.msra.gmra.mxu1 %vm441_vm2, %v1270_v20 }
 0x568   : > { %6155 = vmatpush3.msra.mxu1 %v6956_v0  ;;  %6186 = vmatprep.mubr.msk.f32.mxu1 %vm6861_vm0, %v6860_v1 }
 0x569   : > { %6156 = vmatprep.subr.mxu1 %v6860_v1 }
 0x56a   : > { %6157 = vmatpush3.msra.mxu1 %v6963_v2 }
 0x56b   : > { %6158 = vmatprep.subr.mxu1 %v6860_v1 }
 0x56c   : > { %6159 = vmatpush3.msra.mxu1 %v6972_v3 }
 0x56d   : > { %6160 = vmatprep.subr.mxu1 %v6860_v1 }
 0x56e   : > { %6161 = vmatpush3.msra.mxu1 %v6981_v4 }
 0x56f   : > { %6162 = vmatprep.subr.mxu1 %v6860_v1 }
 0x570   : > { %6163 = vmatpush3.msra.mxu1 %v6990_v5 }
 0x571   : > { %6164 = vmatprep.subr.mxu1 %v6860_v1 }
 0x572   : > { %6165 = vmatpush3.msra.mxu1 %v6999_v6 }
 0x573   : > { %6166 = vmatprep.subr.mxu1 %v6860_v1 }
 0x574   : > { %6167 = vmatpush3.msra.mxu1 %v7008_v7 }
 0x575   : > { %6168 = vmatprep.subr.mxu1 %v6860_v1 }
 0x576   : > { %6169 = vmatpush3.msra.mxu1 %v7017_v8 }
 0x577   : > { %6170 = vmatprep.subr.mxu1 %v6860_v1 }
 0x578   : > { %6171 = vmatpush3.msra.mxu1 %v7026_v9 }
 0x579   : > { %6172 = vmatprep.subr.mxu1 %v6860_v1 }
 0x57a   : > { %6173 = vmatpush3.msra.mxu1 %v7035_v10 }
 0x57b   : > { %6174 = vmatprep.subr.mxu1 %v6860_v1 }
 0x57c   : > { %6175 = vmatpush3.msra.mxu1 %v7045_v11 }
 0x57d   : > { %6176 = vmatprep.subr.mxu1 %v6860_v1 }
 0x57e   : > { %6177 = vmatpush3.msra.mxu1 %v7054_v12 }
 0x57f   : > { %6178 = vmatprep.subr.mxu1 %v6860_v1 }
 0x580   : > { %6179 = vmatpush3.msra.mxu1 %v7064_v13 }
 0x581   : > { %6180 = vmatprep.subr.mxu1 %v6860_v1 }
 0x582   : > { %6181 = vmatpush3.msra.mxu1 %v7073_v14 }
 0x583   : > { %6182 = vmatprep.subr.mxu1 %v6860_v1 }
 0x584   : > { %6183 = vmatpush3.msra.mxu1 %v7082_v15 }
 0x585   : > { %6184 = vmatprep.subr.mxu1 %v6860_v1 }
 0x586   : > { %6185 = vmatpush3.msra.mxu1 %v7096_v16 }
 0x587   : > { %6187 = vmatmul.mubr.f32.vlgmr.msra.gmra.mxu1 %v1350_v22  ;;  %6229 = vmatprep.subr.mxu1 %v6860_v1 }
 0x588   : > { %6231 = vmatprep.mubr.msk.f32.mxu1 %vm6861_vm0, %v6860_v1  ;;  %6230 = vmatpush3.msk.msra.mxu1 %vm445_vm1, %v5365_v31  ;;  %v2407_v31 = vld [vmem:[%s7089_s19 + $0xe] sm:$0x1] }
 0x589   : > { %6234 = vmatprep.subr.mxu1 %v6860_v1 }
 0x627   : > { %v1345_v24 = vpop.f32.mrf.mxu1 }
 0x628   : > { %v1349_v25 = vadd.f32 %v1345_v24, %v1198_v17  ;;  %v5380_v24 = vld [vmem:[%s8197_s3 + $0x1a] sm:$0x3] }
 0x629   : > { %v6153_v26 = vpop.f32.mrf.mxu1 }
 0x647   : > { %v1417_v27 = vpop.f32.mrf.mxu1 }
 0x648   : > { %v1421_v28 = vmul.f32 0.015625, %v1417_v27 }
 0x649   : > { %v6188_v29 = vpop.f32.mrf.mxu1 }
 0x64a   : > { %6192 = vmatmul.mubr.msk.f32.vlgmr.msra.gmra.mxu0 %vm441_vm2, %v1421_v28 }
 0x64b   : > { %6195 = vmatpush3.msra.mxu0 %v6956_v0  ;;  %6226 = vmatprep.mubr.msk.f32.mxu0 %vm6861_vm0, %v6860_v1 }
 0x64c   : > { %6196 = vmatprep.subr.mxu0 %v6860_v1 }
 0x64d   : > { %6197 = vmatpush3.msra.mxu0 %v6963_v2 }
 0x64e   : > { %6198 = vmatprep.subr.mxu0 %v6860_v1 }
 0x64f   : > { %6199 = vmatpush3.msra.mxu0 %v6972_v3 }
 0x650   : > { %6200 = vmatprep.subr.mxu0 %v6860_v1 }
 0x651   : > { %6201 = vmatpush3.msra.mxu0 %v6981_v4 }
 0x652   : > { %6202 = vmatprep.subr.mxu0 %v6860_v1 }
 0x653   : > { %6203 = vmatpush3.msra.mxu0 %v6990_v5 }
 0x654   : > { %6204 = vmatprep.subr.mxu0 %v6860_v1 }
 0x655   : > { %6205 = vmatpush3.msra.mxu0 %v6999_v6 }
 0x656   : > { %6206 = vmatprep.subr.mxu0 %v6860_v1 }
 0x657   : > { %6207 = vmatpush3.msra.mxu0 %v7008_v7 }
 0x658   : > { %6208 = vmatprep.subr.mxu0 %v6860_v1 }
 0x659   : > { %6209 = vmatpush3.msra.mxu0 %v7017_v8 }
 0x65a   : > { %6210 = vmatprep.subr.mxu0 %v6860_v1 }
 0x65b   : > { %6211 = vmatpush3.msra.mxu0 %v7026_v9 }
 0x65c   : > { %6212 = vmatprep.subr.mxu0 %v6860_v1 }
 0x65d   : > { %6213 = vmatpush3.msra.mxu0 %v7035_v10 }
 0x65e   : > { %6214 = vmatprep.subr.mxu0 %v6860_v1 }
 0x65f   : > { %6215 = vmatpush3.msra.mxu0 %v7045_v11 }
 0x660   : > { %6216 = vmatprep.subr.mxu0 %v6860_v1 }
 0x661   : > { %6217 = vmatpush3.msra.mxu0 %v7054_v12 }
 0x662   : > { %6218 = vmatprep.subr.mxu0 %v6860_v1 }
 0x663   : > { %6219 = vmatpush3.msra.mxu0 %v7064_v13 }
 0x664   : > { %6220 = vmatprep.subr.mxu0 %v6860_v1 }
 0x665   : > { %6221 = vmatpush3.msra.mxu0 %v7073_v14 }
 0x666   : > { %6222 = vmatprep.subr.mxu0 %v6860_v1 }
 0x667   : > { %6223 = vmatpush3.msra.mxu0 %v7082_v15 }
 0x668   : > { %6224 = vmatprep.subr.mxu0 %v6860_v1 }
 0x669   : > { %6225 = vmatpush3.msra.mxu0 %v7096_v16 }
 0x66a   : > { %6227 = vmatmul.mubr.f32.vlgmr.msra.gmra.mxu0 %v1501_v30  ;;  %6269 = vmatprep.subr.mxu0 %v6860_v1 }
 0x66b   : > { %6271 = vmatprep.mubr.msk.f32.mxu0 %vm6861_vm0, %v6860_v1  ;;  %6270 = vmatpush3.msk.msra.mxu0 %vm445_vm1, %v5368_v39  ;;  %v2558_v39 = vld [vmem:[%s7089_s19 + $0xf] sm:$0x1] }
 0x66c   : > { %6274 = vmatprep.subr.mxu0 %v6860_v1 }
 0x70a   : > { %v1496_v32 = vpop.f32.mrf.mxu0 }
 0x70b   : > { %v1500_v33 = vadd.f32 %v1496_v32, %v1349_v25  ;;  %v5383_v32 = vld [vmem:[%s8197_s3 + $0x1c] sm:$0x3] }
 0x70c   : > { %v6193_v34 = vpop.f32.mrf.mxu0 }
 0x72a   : > { %v1568_v35 = vpop.f32.mrf.mxu0 }
 0x72b   : > { %v1572_v36 = vmul.f32 0.015625, %v1568_v35 }
 0x72c   : > { %v6228_v37 = vpop.f32.mrf.mxu0 }
 0x72d   : > { %6232 = vmatmul.mubr.msk.f32.vlgmr.msra.gmra.mxu1 %vm441_vm2, %v1572_v36 }
 0x72e   : > { %6235 = vmatpush3.msra.mxu1 %v6956_v0  ;;  %6266 = vmatprep.mubr.msk.f32.mxu1 %vm6861_vm0, %v6860_v1 }
 0x72f   : > { %6236 = vmatprep.subr.mxu1 %v6860_v1 }
 0x730   : > { %6237 = vmatpush3.msra.mxu1 %v6963_v2 }
 0x731   : > { %6238 = vmatprep.subr.mxu1 %v6860_v1 }
 0x732   : > { %6239 = vmatpush3.msra.mxu1 %v6972_v3 }
 0x733   : > { %6240 = vmatprep.subr.mxu1 %v6860_v1 }
 0x734   : > { %6241 = vmatpush3.msra.mxu1 %v6981_v4 }
 0x735   : > { %6242 = vmatprep.subr.mxu1 %v6860_v1 }
 0x736   : > { %6243 = vmatpush3.msra.mxu1 %v6990_v5 }
 0x737   : > { %6244 = vmatprep.subr.mxu1 %v6860_v1 }
 0x738   : > { %6245 = vmatpush3.msra.mxu1 %v6999_v6 }
 0x739   : > { %6246 = vmatprep.subr.mxu1 %v6860_v1 }
 0x73a   : > { %6247 = vmatpush3.msra.mxu1 %v7008_v7 }
 0x73b   : > { %6248 = vmatprep.subr.mxu1 %v6860_v1 }
 0x73c   : > { %6249 = vmatpush3.msra.mxu1 %v7017_v8 }
 0x73d   : > { %6250 = vmatprep.subr.mxu1 %v6860_v1 }
 0x73e   : > { %6251 = vmatpush3.msra.mxu1 %v7026_v9 }
 0x73f   : > { %6252 = vmatprep.subr.mxu1 %v6860_v1 }
 0x740   : > { %6253 = vmatpush3.msra.mxu1 %v7035_v10 }
 0x741   : > { %6254 = vmatprep.subr.mxu1 %v6860_v1 }
 0x742   : > { %6255 = vmatpush3.msra.mxu1 %v7045_v11 }
 0x743   : > { %6256 = vmatprep.subr.mxu1 %v6860_v1 }
 0x744   : > { %6257 = vmatpush3.msra.mxu1 %v7054_v12 }
 0x745   : > { %6258 = vmatprep.subr.mxu1 %v6860_v1 }
 0x746   : > { %6259 = vmatpush3.msra.mxu1 %v7064_v13 }
 0x747   : > { %6260 = vmatprep.subr.mxu1 %v6860_v1 }
 0x748   : > { %6261 = vmatpush3.msra.mxu1 %v7073_v14 }
 0x749   : > { %6262 = vmatprep.subr.mxu1 %v6860_v1 }
 0x74a   : > { %6263 = vmatpush3.msra.mxu1 %v7082_v15 }
 0x74b   : > { %6264 = vmatprep.subr.mxu1 %v6860_v1 }
 0x74c   : > { %6265 = vmatpush3.msra.mxu1 %v7096_v16 }
 0x74d   : > { %6267 = vmatmul.mubr.f32.vlgmr.msra.gmra.mxu1 %v1652_v38  ;;  %6309 = vmatprep.subr.mxu1 %v6860_v1 }
 0x74e   : > { %6311 = vmatprep.mubr.msk.f32.mxu1 %vm6861_vm0, %v6860_v1 }
 0x7ed   : > { %v1647_v40 = vpop.f32.mrf.mxu1 }
 0x7ee   : > { %v1651_v41 = vadd.f32 %v1647_v40, %v1500_v33  ;;  %v5386_v40 = vld [vmem:[%s8197_s3 + $0x1e] sm:$0x3] }
 0x7ef   : > { %v6233_v42 = vpop.f32.mrf.mxu1 }
 0x80d   : > { %v1719_v43 = vpop.f32.mrf.mxu1 }
 0x80e   : > { %v1723_v44 = vmul.f32 0.015625, %v1719_v43 }
 0x80f   : > { %v6268_v45 = vpop.f32.mrf.mxu1 }
 0x810   : > { %6272 = vmatmul.mubr.msk.f32.vlgmr.msra.gmra.mxu0 %vm441_vm2, %v1723_v44 }
 0x811   : > { %6275 = vmatpush3.msra.mxu0 %v6956_v0  ;;  %6306 = vmatprep.mubr.msk.f32.mxu0 %vm6861_vm0, %v6860_v1  ;;  %v1803_v0 = vld [vmem:[%s7089_s19 + $0xa] sm:$0x1] }
 0x812   : > { %6276 = vmatprep.subr.mxu0 %v6860_v1 }
 0x813   : > { %6277 = vmatpush3.msra.mxu0 %v6963_v2  ;;  %v5371_v2 = vld [vmem:[%s8197_s3 + $0x14] sm:$0x3] }
 0x814   : > { %6278 = vmatprep.subr.mxu0 %v6860_v1  ;;  %6310 = vmatpush3.msk.msra.mxu1 %vm445_vm1, %v5371_v2  ;;  %v2712_v2 = vld [vmem:[%s8199_s5] sm:$0x3] }
 0x815   : > { %6279 = vmatpush3.msra.mxu0 %v6972_v3  ;;  %6314 = vmatprep.subr.mxu1 %v6860_v1 }
 0x816   : > { %6280 = vmatprep.subr.mxu0 %v6860_v1 }
 0x817   : > { %6281 = vmatpush3.msra.mxu0 %v6981_v4 }
 0x818   : > { %6282 = vmatprep.subr.mxu0 %v6860_v1 }
 0x819   : > { %6283 = vmatpush3.msra.mxu0 %v6990_v5 }
 0x81a   : > { %6284 = vmatprep.subr.mxu0 %v6860_v1 }
 0x81b   : > { %6285 = vmatpush3.msra.mxu0 %v6999_v6 }
 0x81c   : > { %6286 = vmatprep.subr.mxu0 %v6860_v1 }
 0x81d   : > { %6287 = vmatpush3.msra.mxu0 %v7008_v7 }
 0x81e   : > { %6288 = vmatprep.subr.mxu0 %v6860_v1 }
 0x81f   : > { %6289 = vmatpush3.msra.mxu0 %v7017_v8 }
 0x820   : > { %6290 = vmatprep.subr.mxu0 %v6860_v1 }
 0x821   : > { %6291 = vmatpush3.msra.mxu0 %v7026_v9 }
 0x822   : > { %6292 = vmatprep.subr.mxu0 %v6860_v1 }
 0x823   : > { %6293 = vmatpush3.msra.mxu0 %v7035_v10 }
 0x824   : > { %6294 = vmatprep.subr.mxu0 %v6860_v1 }
 0x825   : > { %6295 = vmatpush3.msra.mxu0 %v7045_v11 }
 0x826   : > { %6296 = vmatprep.subr.mxu0 %v6860_v1 }
 0x827   : > { %6297 = vmatpush3.msra.mxu0 %v7054_v12 }
 0x828   : > { %6298 = vmatprep.subr.mxu0 %v6860_v1 }
 0x829   : > { %6299 = vmatpush3.msra.mxu0 %v7064_v13 }
 0x82a   : > { %6300 = vmatprep.subr.mxu0 %v6860_v1 }
 0x82b   : > { %6301 = vmatpush3.msra.mxu0 %v7073_v14 }
 0x82c   : > { %6302 = vmatprep.subr.mxu0 %v6860_v1 }
 0x82d   : > { %6303 = vmatpush3.msra.mxu0 %v7082_v15 }
 0x82e   : > { %6304 = vmatprep.subr.mxu0 %v6860_v1 }
 0x82f   : > { %6305 = vmatpush3.msra.mxu0 %v7096_v16 }
 0x830   : > { %6307 = vmatmul.mubr.f32.vlgmr.msra.gmra.mxu0 %v1803_v0  ;;  %6349 = vmatprep.subr.mxu0 %v6860_v1 }
 0x831   : > { %6351 = vmatprep.mubr.msk.f32.mxu0 %vm6861_vm0, %v6860_v1 }
 0x8d0   : > { %v1798_v3 = vpop.f32.mrf.mxu0 }
 0x8d1   : > { %v1802_v4 = vadd.f32 %v1798_v3, %v1651_v41 }
 0x8d2   : > { %v6273_v5 = vpop.f32.mrf.mxu0 }
 0x8f0   : > { %v1870_v6 = vpop.f32.mrf.mxu0 }
 0x8f1   : > { %v1874_v7 = vmul.f32 0.015625, %v1870_v6 }
 0x8f2   : > { %v6308_v46 = vpop.f32.mrf.mxu0 }
 0x8f3   : > { %6312 = vmatmul.mubr.msk.f32.vlgmr.msra.gmra.mxu1 %vm441_vm2, %v1874_v7 }
 0x8f4   : > { %6315 = vmatpush3.msra.mxu1 %v7520_v47  ;;  %6346 = vmatprep.mubr.msk.f32.mxu1 %vm6861_vm0, %v6860_v1 }
 0x8f5   : > { %6316 = vmatprep.subr.mxu1 %v6860_v1 }
 0x8f6   : > { %6317 = vmatpush3.msra.mxu1 %v7529_v48 }
 0x8f7   : > { %6318 = vmatprep.subr.mxu1 %v6860_v1 }
 0x8f8   : > { %6319 = vmatpush3.msra.mxu1 %v7536_v49 }
 0x8f9   : > { %6320 = vmatprep.subr.mxu1 %v6860_v1 }
 0x8fa   : > { %6321 = vmatpush3.msra.mxu1 %v7543_v50 }
 0x8fb   : > { %6322 = vmatprep.subr.mxu1 %v6860_v1 }
 0x8fc   : > { %6323 = vmatpush3.msra.mxu1 %v7550_v51 }
 0x8fd   : > { %6324 = vmatprep.subr.mxu1 %v6860_v1 }
 0x8fe   : > { %6325 = vmatpush3.msra.mxu1 %v7557_v52 }
 0x8ff   : > { %6326 = vmatprep.subr.mxu1 %v6860_v1 }
 0x900   : > { %6327 = vmatpush3.msra.mxu1 %v7564_v53 }
 0x901   : > { %6328 = vmatprep.subr.mxu1 %v6860_v1 }
 0x902   : > { %6329 = vmatpush3.msra.mxu1 %v7017_v8  ;;  %v1954_v8 = vld [vmem:[%s7089_s19 + $0xb] sm:$0x1] }
 0x903   : > { %6330 = vmatprep.subr.mxu1 %v6860_v1 }
 0x904   : > { %6331 = vmatpush3.msra.mxu1 %v7026_v9  ;;  %v5374_v9 = vld [vmem:[%s8197_s3 + $0x16] sm:$0x3] }
 0x905   : > { %6332 = vmatprep.subr.mxu1 %v6860_v1  ;;  %6350 = vmatpush3.msk.msra.mxu0 %vm445_vm1, %v5374_v9  ;;  %v5450_v9 = vld [vmem:[%s8199_s5 + $0x12] sm:$0x3] }
 0x906   : > { %6333 = vmatpush3.msra.mxu1 %v7035_v10  ;;  %6354 = vmatprep.subr.mxu0 %v6860_v1 }
 0x907   : > { %6334 = vmatprep.subr.mxu1 %v6860_v1 }
 0x908   : > { %6335 = vmatpush3.msra.mxu1 %v7045_v11 }
 0x909   : > { %6336 = vmatprep.subr.mxu1 %v6860_v1 }
 0x90a   : > { %6337 = vmatpush3.msra.mxu1 %v7054_v12 }
 0x90b   : > { %6338 = vmatprep.subr.mxu1 %v6860_v1 }
 0x90c   : > { %6339 = vmatpush3.msra.mxu1 %v7064_v13 }
 0x90d   : > { %6340 = vmatprep.subr.mxu1 %v6860_v1 }
 0x90e   : > { %6341 = vmatpush3.msra.mxu1 %v7073_v14 }
 0x90f   : > { %6342 = vmatprep.subr.mxu1 %v6860_v1 }
 0x910   : > { %6343 = vmatpush3.msra.mxu1 %v7082_v15 }
 0x911   : > { %6344 = vmatprep.subr.mxu1 %v6860_v1 }
 0x912   : > { %6345 = vmatpush3.msra.mxu1 %v7096_v16  ;;  %v7614_v16 = vld [vmem:[%s8195_s1 + $0x40] sm:$0xff] }
 0x913   : > { %6347 = vmatmul.mubr.f32.vlgmr.msra.gmra.mxu1 %v1954_v8  ;;  %6389 = vmatprep.subr.mxu1 %v6860_v1  ;;  %v5443_v8 = vld [vmem:[%s8199_s5 + $0x10] sm:$0x3] }
 0x914   : > { %6391 = vmatprep.mubr.msk.f32.mxu1 %vm6861_vm0, %v6860_v1  ;;  %6390 = vmatpush3.msk.msra.mxu1 %vm445_vm1, %v5377_v63  ;;  %v5402_v63 = vld [vmem:[%s8200_s6 + $0x2] sm:$0x1] }
 0x915   : > { %6394 = vmatprep.subr.mxu1 %v6860_v1 }
 0x9b3   : > { %v1949_v10 = vpop.f32.mrf.mxu1 }
 0x9b4   : > { %v1953_v11 = vadd.f32 %v1949_v10, %v1802_v4  ;;  %v2709_v4 = vld [vmem:[%s8198_s4] sm:$0x1]  ;;  %v5457_v10 = vld [vmem:[%s8199_s5 + $0x14] sm:$0x3] }
 0x9b5   : > { %v6313_v12 = vpop.f32.mrf.mxu1 }
 0x9b6   : > { %v5471_v12 = vld [vmem:[%s8199_s5 + $0x18] sm:$0x3] }
 0x9d3   : > { %v2021_v13 = vpop.f32.mrf.mxu1 }
 0x9d4   : > { %v2025_v14 = vmul.f32 0.015625, %v2021_v13  ;;  %v5478_v13 = vld [vmem:[%s8199_s5 + $0x1a] sm:$0x3] }
 0x9d5   : > { %v6348_v15 = vpop.f32.mrf.mxu1 }
 0x9d6   : > { %6352 = vmatmul.mubr.msk.f32.vlgmr.msra.gmra.mxu0 %vm441_vm2, %v2025_v14  ;;  %v5485_v14 = vld [vmem:[%s8199_s5 + $0x1c] sm:$0x3]  ;;  %v5492_v15 = vld [vmem:[%s8199_s5 + $0x1e] sm:$0x3] }
 0x9d7   : > { %6355 = vmatpush3.msra.mxu0 %v7520_v47  ;;  %6386 = vmatprep.mubr.msk.f32.mxu0 %vm6861_vm0, %v6860_v1 }
 0x9d8   : > { %6356 = vmatprep.subr.mxu0 %v6860_v1 }
 0x9d9   : > { %6357 = vmatpush3.msra.mxu0 %v7529_v48 }
 0x9da   : > { %6358 = vmatprep.subr.mxu0 %v6860_v1 }
 0x9db   : > { %6359 = vmatpush3.msra.mxu0 %v7536_v49 }
 0x9dc   : > { %6360 = vmatprep.subr.mxu0 %v6860_v1 }
 0x9dd   : > { %6361 = vmatpush3.msra.mxu0 %v7543_v50 }
 0x9de   : > { %6362 = vmatprep.subr.mxu0 %v6860_v1 }
 0x9df   : > { %6363 = vmatpush3.msra.mxu0 %v7550_v51 }
 0x9e0   : > { %6364 = vmatprep.subr.mxu0 %v6860_v1 }
 0x9e1   : > { %6365 = vmatpush3.msra.mxu0 %v7557_v52 }
 0x9e2   : > { %6366 = vmatprep.subr.mxu0 %v6860_v1 }
 0x9e3   : > { %6367 = vmatpush3.msra.mxu0 %v7564_v53 }
 0x9e4   : > { %6368 = vmatprep.subr.mxu0 %v6860_v1 }
 0x9e5   : > { %6369 = vmatpush3.msra.mxu0 %v7614_v16 }
 0x9e6   : > { %6370 = vmatprep.subr.mxu0 %v6860_v1 }
 0x9e7   : > { %6371 = vmatpush3.msra.mxu0 %v7621_v54 }
 0x9e8   : > { %6372 = vmatprep.subr.mxu0 %v6860_v1 }
 0x9e9   : > { %6373 = vmatpush3.msra.mxu0 %v7628_v55 }
 0x9ea   : > { %6374 = vmatprep.subr.mxu0 %v6860_v1 }
 0x9eb   : > { %6375 = vmatpush3.msra.mxu0 %v7635_v56 }
 0x9ec   : > { %6376 = vmatprep.subr.mxu0 %v6860_v1 }
 0x9ed   : > { %6377 = vmatpush3.msra.mxu0 %v7642_v57 }
 0x9ee   : > { %6378 = vmatprep.subr.mxu0 %v6860_v1 }
 0x9ef   : > { %6379 = vmatpush3.msra.mxu0 %v7649_v58 }
 0x9f0   : > { %6380 = vmatprep.subr.mxu0 %v6860_v1 }
 0x9f1   : > { %6381 = vmatpush3.msra.mxu0 %v7656_v59 }
 0x9f2   : > { %6382 = vmatprep.subr.mxu0 %v6860_v1 }
 0x9f3   : > { %6383 = vmatpush3.msra.mxu0 %v7663_v60 }
 0x9f4   : > { %6384 = vmatprep.subr.mxu0 %v6860_v1 }
 0x9f5   : > { %6385 = vmatpush3.msra.mxu0 %v7671_v62 }
 0x9f6   : > { %6387 = vmatmul.mubr.f32.vlgmr.msra.gmra.mxu0 %v2105_v61  ;;  %6429 = vmatprep.subr.mxu0 %v6860_v1 }
 0x9f7   : > { %6431 = vmatprep.mubr.msk.f32.mxu0 %vm6861_vm0, %v6860_v1  ;;  %6430 = vmatpush3.msk.msra.mxu0 %vm445_vm1, %v5380_v24 }
 0x9f8   : > { %6434 = vmatprep.subr.mxu0 %v6860_v1 }
 0xa96   : > { %v2100_v17 = vpop.f32.mrf.mxu0 }
 0xa97   : > { %v2104_v18 = vadd.f32 %v2100_v17, %v1953_v11  ;;  %v5464_v11 = vld [vmem:[%s8199_s5 + $0x16] sm:$0x3] }
 0xa98   : > { %v6353_v19 = vpop.f32.mrf.mxu0 }
 0xab6   : > { %v2172_v20 = vpop.f32.mrf.mxu0 }
 0xab7   : > { %v2176_v21 = vmul.f32 0.015625, %v2172_v20 }
 0xab8   : > { %v6388_v22 = vpop.f32.mrf.mxu0 }
 0xab9   : > { %6392 = vmatmul.mubr.msk.f32.vlgmr.msra.gmra.mxu1 %vm441_vm2, %v2176_v21  ;;  %v5409_v21 = vld [vmem:[%s8200_s6 + $0x3] sm:$0x1] }
 0xaba   : > { %6395 = vmatpush3.msra.mxu1 %v7520_v47  ;;  %6426 = vmatprep.mubr.msk.f32.mxu1 %vm6861_vm0, %v6860_v1 }
 0xabb   : > { %6396 = vmatprep.subr.mxu1 %v6860_v1 }
 0xabc   : > { %6397 = vmatpush3.msra.mxu1 %v7529_v48 }
 0xabd   : > { %6398 = vmatprep.subr.mxu1 %v6860_v1 }
 0xabe   : > { %6399 = vmatpush3.msra.mxu1 %v7536_v49 }
 0xabf   : > { %6400 = vmatprep.subr.mxu1 %v6860_v1 }
 0xac0   : > { %6401 = vmatpush3.msra.mxu1 %v7543_v50 }
 0xac1   : > { %6402 = vmatprep.subr.mxu1 %v6860_v1 }
 0xac2   : > { %6403 = vmatpush3.msra.mxu1 %v7550_v51 }
 0xac3   : > { %6404 = vmatprep.subr.mxu1 %v6860_v1 }
 0xac4   : > { %6405 = vmatpush3.msra.mxu1 %v7557_v52 }
 0xac5   : > { %6406 = vmatprep.subr.mxu1 %v6860_v1 }
 0xac6   : > { %6407 = vmatpush3.msra.mxu1 %v7564_v53 }
 0xac7   : > { %6408 = vmatprep.subr.mxu1 %v6860_v1 }
 0xac8   : > { %6409 = vmatpush3.msra.mxu1 %v7614_v16 }
 0xac9   : > { %6410 = vmatprep.subr.mxu1 %v6860_v1 }
 0xaca   : > { %6411 = vmatpush3.msra.mxu1 %v7621_v54 }
 0xacb   : > { %6412 = vmatprep.subr.mxu1 %v6860_v1 }
 0xacc   : > { %6413 = vmatpush3.msra.mxu1 %v7628_v55 }
 0xacd   : > { %6414 = vmatprep.subr.mxu1 %v6860_v1 }
 0xace   : > { %6415 = vmatpush3.msra.mxu1 %v7635_v56 }
 0xacf   : > { %6416 = vmatprep.subr.mxu1 %v6860_v1 }
 0xad0   : > { %6417 = vmatpush3.msra.mxu1 %v7642_v57 }
 0xad1   : > { %6418 = vmatprep.subr.mxu1 %v6860_v1 }
 0xad2   : > { %6419 = vmatpush3.msra.mxu1 %v7649_v58 }
 0xad3   : > { %6420 = vmatprep.subr.mxu1 %v6860_v1 }
 0xad4   : > { %6421 = vmatpush3.msra.mxu1 %v7656_v59 }
 0xad5   : > { %6422 = vmatprep.subr.mxu1 %v6860_v1 }
 0xad6   : > { %6423 = vmatpush3.msra.mxu1 %v7663_v60 }
 0xad7   : > { %6424 = vmatprep.subr.mxu1 %v6860_v1 }
 0xad8   : > { %6425 = vmatpush3.msra.mxu1 %v7671_v62 }
 0xad9   : > { %6427 = vmatmul.mubr.f32.vlgmr.msra.gmra.mxu1 %v2256_v23  ;;  %6469 = vmatprep.subr.mxu1 %v6860_v1 }
 0xada   : > { %6471 = vmatprep.mubr.msk.f32.mxu1 %vm6861_vm0, %v6860_v1  ;;  %6470 = vmatpush3.msk.msra.mxu1 %vm445_vm1, %v5383_v32  ;;  %v5423_v32 = vld [vmem:[%s8200_s6 + $0x5] sm:$0x1] }
 0xadb   : > { %6474 = vmatprep.subr.mxu1 %v6860_v1 }
 0xb79   : > { %v2251_v25 = vpop.f32.mrf.mxu1 }
 0xb7a   : > { %v2255_v26 = vadd.f32 %v2251_v25, %v2104_v18 }
 0xb7b   : > { %v6393_v27 = vpop.f32.mrf.mxu1 }
 0xb99   : > { %v2323_v28 = vpop.f32.mrf.mxu1 }
 0xb9a   : > { %v2327_v29 = vmul.f32 0.015625, %v2323_v28 }
 0xb9b   : > { %v6428_v30 = vpop.f32.mrf.mxu1 }
 0xb9c   : > { %6432 = vmatmul.mubr.msk.f32.vlgmr.msra.gmra.mxu0 %vm441_vm2, %v2327_v29 }
 0xb9d   : > { %6435 = vmatpush3.msra.mxu0 %v7520_v47  ;;  %6466 = vmatprep.mubr.msk.f32.mxu0 %vm6861_vm0, %v6860_v1 }
 0xb9e   : > { %6436 = vmatprep.subr.mxu0 %v6860_v1 }
 0xb9f   : > { %6437 = vmatpush3.msra.mxu0 %v7529_v48 }
 0xba0   : > { %6438 = vmatprep.subr.mxu0 %v6860_v1 }
 0xba1   : > { %6439 = vmatpush3.msra.mxu0 %v7536_v49 }
 0xba2   : > { %6440 = vmatprep.subr.mxu0 %v6860_v1 }
 0xba3   : > { %6441 = vmatpush3.msra.mxu0 %v7543_v50 }
 0xba4   : > { %6442 = vmatprep.subr.mxu0 %v6860_v1 }
 0xba5   : > { %6443 = vmatpush3.msra.mxu0 %v7550_v51 }
 0xba6   : > { %6444 = vmatprep.subr.mxu0 %v6860_v1 }
 0xba7   : > { %6445 = vmatpush3.msra.mxu0 %v7557_v52 }
 0xba8   : > { %6446 = vmatprep.subr.mxu0 %v6860_v1 }
 0xba9   : > { %6447 = vmatpush3.msra.mxu0 %v7564_v53 }
 0xbaa   : > { %6448 = vmatprep.subr.mxu0 %v6860_v1 }
 0xbab   : > { %6449 = vmatpush3.msra.mxu0 %v7614_v16 }
 0xbac   : > { %6450 = vmatprep.subr.mxu0 %v6860_v1 }
 0xbad   : > { %6451 = vmatpush3.msra.mxu0 %v7621_v54 }
 0xbae   : > { %6452 = vmatprep.subr.mxu0 %v6860_v1 }
 0xbaf   : > { %6453 = vmatpush3.msra.mxu0 %v7628_v55 }
 0xbb0   : > { %6454 = vmatprep.subr.mxu0 %v6860_v1 }
 0xbb1   : > { %6455 = vmatpush3.msra.mxu0 %v7635_v56 }
 0xbb2   : > { %6456 = vmatprep.subr.mxu0 %v6860_v1 }
 0xbb3   : > { %6457 = vmatpush3.msra.mxu0 %v7642_v57 }
 0xbb4   : > { %6458 = vmatprep.subr.mxu0 %v6860_v1 }
 0xbb5   : > { %6459 = vmatpush3.msra.mxu0 %v7649_v58 }
 0xbb6   : > { %6460 = vmatprep.subr.mxu0 %v6860_v1 }
 0xbb7   : > { %6461 = vmatpush3.msra.mxu0 %v7656_v59 }
 0xbb8   : > { %6462 = vmatprep.subr.mxu0 %v6860_v1 }
 0xbb9   : > { %6463 = vmatpush3.msra.mxu0 %v7663_v60 }
 0xbba   : > { %6464 = vmatprep.subr.mxu0 %v6860_v1 }
 0xbbb   : > { %6465 = vmatpush3.msra.mxu0 %v7671_v62 }
 0xbbc   : > { %6467 = vmatmul.mubr.f32.vlgmr.msra.gmra.mxu0 %v2407_v31  ;;  %6509 = vmatprep.subr.mxu0 %v6860_v1 }
 0xbbd   : > { %6511 = vmatprep.mubr.msk.f32.mxu0 %vm6861_vm0, %v6860_v1  ;;  %6510 = vmatpush3.msk.msra.mxu0 %vm445_vm1, %v5386_v40 }
 0xbbe   : > { %6514 = vmatprep.subr.mxu0 %v6860_v1 }
 0xc5c   : > { %v2402_v33 = vpop.f32.mrf.mxu0 }
 0xc5d   : > { %v2406_v34 = vadd.f32 %v2402_v33, %v2255_v26  ;;  %v5416_v26 = vld [vmem:[%s8200_s6 + $0x4] sm:$0x1] }
 0xc5e   : > { %v6433_v35 = vpop.f32.mrf.mxu0 }
 0xc7c   : > { %v2474_v36 = vpop.f32.mrf.mxu0 }
 0xc7d   : > { %v2478_v37 = vmul.f32 0.015625, %v2474_v36 }
 0xc7e   : > { %v6468_v38 = vpop.f32.mrf.mxu0 }
 0xc7f   : > { %6472 = vmatmul.mubr.msk.f32.vlgmr.msra.gmra.mxu1 %vm441_vm2, %v2478_v37 }
 0xc80   : > { %6475 = vmatpush3.msra.mxu1 %v7520_v47  ;;  %6506 = vmatprep.mubr.msk.f32.mxu1 %vm6861_vm0, %v6860_v1  ;;  %v5394_v47 = vld [vmem:[%s8199_s5 + $0x2] sm:$0x3] }
 0xc81   : > { %6476 = vmatprep.subr.mxu1 %v6860_v1 }
 0xc82   : > { %6477 = vmatpush3.msra.mxu1 %v7529_v48  ;;  %v5401_v48 = vld [vmem:[%s8199_s5 + $0x4] sm:$0x3] }
 0xc83   : > { %6478 = vmatprep.subr.mxu1 %v6860_v1 }
 0xc84   : > { %6479 = vmatpush3.msra.mxu1 %v7536_v49  ;;  %v5408_v49 = vld [vmem:[%s8199_s5 + $0x6] sm:$0x3] }
 0xc85   : > { %6480 = vmatprep.subr.mxu1 %v6860_v1 }
 0xc86   : > { %6481 = vmatpush3.msra.mxu1 %v7543_v50  ;;  %v5415_v50 = vld [vmem:[%s8199_s5 + $0x8] sm:$0x3] }
 0xc87   : > { %6482 = vmatprep.subr.mxu1 %v6860_v1 }
 0xc88   : > { %6483 = vmatpush3.msra.mxu1 %v7550_v51  ;;  %v5422_v51 = vld [vmem:[%s8199_s5 + $0xa] sm:$0x3] }
 0xc89   : > { %6484 = vmatprep.subr.mxu1 %v6860_v1 }
 0xc8a   : > { %6485 = vmatpush3.msra.mxu1 %v7557_v52  ;;  %v5429_v52 = vld [vmem:[%s8199_s5 + $0xc] sm:$0x3] }
 0xc8b   : > { %6486 = vmatprep.subr.mxu1 %v6860_v1 }
 0xc8c   : > { %6487 = vmatpush3.msra.mxu1 %v7564_v53  ;;  %v5436_v53 = vld [vmem:[%s8199_s5 + $0xe] sm:$0x3] }
 0xc8d   : > { %6488 = vmatprep.subr.mxu1 %v6860_v1 }
 0xc8e   : > { %6489 = vmatpush3.msra.mxu1 %v7614_v16  ;;  %v7963_v16 = vld [vmem:[%s8196_s2] sm:$0x3] }
 0xc8f   : > { %6490 = vmatprep.subr.mxu1 %v6860_v1 }
 0xc90   : > { %6491 = vmatpush3.msra.mxu1 %v7621_v54  ;;  %v2713_v54 = vld [vmem:[%s8200_s6] sm:$0x1] }
 0xc91   : > { %6492 = vmatprep.subr.mxu1 %v6860_v1 }
 0xc92   : > { %6493 = vmatpush3.msra.mxu1 %v7628_v55 }
 0xc93   : > { %6494 = vmatprep.subr.mxu1 %v6860_v1 }
 0xc94   : > { %6495 = vmatpush3.msra.mxu1 %v7635_v56 }
 0xc95   : > { %6496 = vmatprep.subr.mxu1 %v6860_v1 }
 0xc96   : > { %6497 = vmatpush3.msra.mxu1 %v7642_v57 }
 0xc97   : > { %6498 = vmatprep.subr.mxu1 %v6860_v1 }
 0xc98   : > { %6499 = vmatpush3.msra.mxu1 %v7649_v58  ;;  %v5395_v58 = vld [vmem:[%s8200_s6 + $0x1] sm:$0x1] }
 0xc99   : > { %6500 = vmatprep.subr.mxu1 %v6860_v1 }
 0xc9a   : > { %6501 = vmatpush3.msra.mxu1 %v7656_v59 }
 0xc9b   : > { %6502 = vmatprep.subr.mxu1 %v6860_v1 }
 0xc9c   : > { %6503 = vmatpush3.msra.mxu1 %v7663_v60 }
 0xc9d   : > { %6504 = vmatprep.subr.mxu1 %v6860_v1 }
 0xc9e   : > { %6505 = vmatpush3.msra.mxu1 %v7671_v62 }
 0xc9f   : > { %6507 = vmatmul.mubr.f32.vlgmr.msra.gmra.mxu1 %v2558_v39  ;;  %6519 = vmatprep.subr.mxu1 %v6860_v1  ;;  %v5430_v39 = vld [vmem:[%s8200_s6 + $0x6] sm:$0x1] }
 0xca0   : > { %6521 = vmatprep.mubr.msk.f32.mxu1 %vm6861_vm0, %v6860_v1  ;;  %6520 = vmatpush3.msk.msra.mxu1 %vm445_vm1, %v7963_v16 }
 0xca1   : > { %6529 = vmatprep.subr.mxu1 %v6860_v1 }
 0xd3f   : > { %v2553_v41 = vpop.f32.mrf.mxu1 }
 0xd40   : > { %v2557_v42 = vadd.f32 %v2553_v41, %v2406_v34 }
 0xd41   : > { %v6473_v43 = vpop.f32.mrf.mxu1 }
 0xd5f   : > { %v2625_v44 = vpop.f32.mrf.mxu1 }
 0xd60   : > { %v2629_v45 = vmul.f32 0.015625, %v2625_v44 }
 0xd61   : > { %v6508_v0 = vpop.f32.mrf.mxu1 }
 0xd62   : > { %6512 = vmatmul.mubr.msk.f32.vlgmr.msra.gmra.mxu0 %vm441_vm2, %v2629_v45  ;;  %v5437_v0 = vld [vmem:[%s8200_s6 + $0x7] sm:$0x1] }
 0xd63   : > { %6516 = vmatprep.mubr.msk.f32.mxu0 %vm6861_vm0, %v6860_v1  ;;  %6515 = vmatpush3.msk.msra.mxu0 %vm445_vm1, %v2712_v2 }
 0xd64   : > { %6524 = vmatprep.subr.mxu0 %v6860_v1 }
 0xe22   : > { %v2704_v3 = vpop.f32.mrf.mxu0 }
 0xe23   : > { %v2708_v5 = vadd.f32 %v2704_v3, %v2557_v42 }
 0xe24   : > { %v6513_v6 = vpop.f32.mrf.mxu0 }
 0xe25   : > { %v2710_v7 = vadd.f32 %v2709_v4, %v2708_v5 }
 0xe27   : > { %v7822_v46 = vmax.f32 %v2710_v7, 0.0 }
 0xe29   : > { %6517 = vmatmul.mubr.msk.f32.vlgmr.msra.gmra.mxu0 %vm441_vm2, %v7822_v46 }
 0xe2a   : > { %6525 = vmatpush3.msk.msra.mxu0 %vm445_vm1, %v5394_v47  ;;  %6526 = vmatprep.mubr.msk.f32.mxu0 %vm6861_vm0, %v6860_v1 }
 0xe2b   : > { %6534 = vmatprep.subr.mxu0 %v6860_v1 }
 0xe2d   : > { %6527 = vmatmul.mubr.msk.f32.vlgmr.msra.gmra.mxu0 %vm441_vm2, %v7822_v46 }
 0xe2e   : > { %6535 = vmatpush3.msk.msra.mxu0 %vm445_vm1, %v5401_v48  ;;  %6536 = vmatprep.mubr.msk.f32.mxu0 %vm6861_vm0, %v6860_v1 }
 0xe2f   : > { %6544 = vmatprep.subr.mxu0 %v6860_v1 }
 0xe31   : > { %6537 = vmatmul.mubr.msk.f32.vlgmr.msra.gmra.mxu0 %vm441_vm2, %v7822_v46 }
 0xe32   : > { %6545 = vmatpush3.msk.msra.mxu0 %vm445_vm1, %v5408_v49  ;;  %6546 = vmatprep.mubr.msk.f32.mxu0 %vm6861_vm0, %v6860_v1 }
 0xe33   : > { %6554 = vmatprep.subr.mxu0 %v6860_v1 }
 0xe35   : > { %6547 = vmatmul.mubr.msk.f32.vlgmr.msra.gmra.mxu0 %vm441_vm2, %v7822_v46 }
 0xe36   : > { %6555 = vmatpush3.msk.msra.mxu0 %vm445_vm1, %v5415_v50  ;;  %6556 = vmatprep.mubr.msk.f32.mxu0 %vm6861_vm0, %v6860_v1 }
 0xe37   : > { %6564 = vmatprep.subr.mxu0 %v6860_v1 }
 0xe39   : > { %6557 = vmatmul.mubr.msk.f32.vlgmr.msra.gmra.mxu0 %vm441_vm2, %v7822_v46 }
 0xe3a   : > { %6565 = vmatpush3.msk.msra.mxu0 %vm445_vm1, %v5422_v51  ;;  %6566 = vmatprep.mubr.msk.f32.mxu0 %vm6861_vm0, %v6860_v1 }
 0xe3b   : > { %6574 = vmatprep.subr.mxu0 %v6860_v1 }
 0xe3d   : > { %6567 = vmatmul.mubr.msk.f32.vlgmr.msra.gmra.mxu0 %vm441_vm2, %v7822_v46 }
 0xe3e   : > { %6575 = vmatpush3.msk.msra.mxu0 %vm445_vm1, %v5429_v52  ;;  %6576 = vmatprep.mubr.msk.f32.mxu0 %vm6861_vm0, %v6860_v1 }
 0xe3f   : > { %6584 = vmatprep.subr.mxu0 %v6860_v1 }
 0xe41   : > { %6577 = vmatmul.mubr.msk.f32.vlgmr.msra.gmra.mxu0 %vm441_vm2, %v7822_v46 }
 0xe42   : > { %6585 = vmatpush3.msk.msra.mxu0 %vm445_vm1, %v5436_v53  ;;  %6586 = vmatprep.mubr.msk.f32.mxu0 %vm6861_vm0, %v6860_v1  ;;  %v5451_v53 = vld [vmem:[%s8200_s6 + $0x9] sm:$0x1] }
 0xe43   : > { %6594 = vmatprep.subr.mxu0 %v6860_v1 }
 0xe45   : > { %6587 = vmatmul.mubr.msk.f32.vlgmr.msra.gmra.mxu0 %vm441_vm2, %v7822_v46 }
 0xe46   : > { %6595 = vmatpush3.msk.msra.mxu0 %vm445_vm1, %v5443_v8  ;;  %6596 = vmatprep.mubr.msk.f32.mxu0 %vm6861_vm0, %v6860_v1 }
 0xe47   : > { %6604 = vmatprep.subr.mxu0 %v6860_v1 }
 0xe49   : > { %6597 = vmatmul.mubr.msk.f32.vlgmr.msra.gmra.mxu0 %vm441_vm2, %v7822_v46 }
 0xe4a   : > { %6605 = vmatpush3.msk.msra.mxu0 %vm445_vm1, %v5450_v9  ;;  %6606 = vmatprep.mubr.msk.f32.mxu0 %vm6861_vm0, %v6860_v1 }
 0xe4b   : > { %6614 = vmatprep.subr.mxu0 %v6860_v1 }
 0xe4d   : > { %6607 = vmatmul.mubr.msk.f32.vlgmr.msra.gmra.mxu0 %vm441_vm2, %v7822_v46 }
 0xe4e   : > { %6615 = vmatpush3.msk.msra.mxu0 %vm445_vm1, %v5457_v10  ;;  %6616 = vmatprep.mubr.msk.f32.mxu0 %vm6861_vm0, %v6860_v1 }
 0xe4f   : > { %6624 = vmatprep.subr.mxu0 %v6860_v1 }
 0xe51   : > { %6617 = vmatmul.mubr.msk.f32.vlgmr.msra.gmra.mxu0 %vm441_vm2, %v7822_v46 }
 0xe52   : > { %6625 = vmatpush3.msk.msra.mxu0 %vm445_vm1, %v5464_v11  ;;  %6626 = vmatprep.mubr.msk.f32.mxu0 %vm6861_vm0, %v6860_v1 }
 0xe53   : > { %6634 = vmatprep.subr.mxu0 %v6860_v1 }
 0xe55   : > { %6627 = vmatmul.mubr.msk.f32.vlgmr.msra.gmra.mxu0 %vm441_vm2, %v7822_v46 }
 0xe56   : > { %6635 = vmatpush3.msk.msra.mxu0 %vm445_vm1, %v5471_v12  ;;  %6636 = vmatprep.mubr.msk.f32.mxu0 %vm6861_vm0, %v6860_v1 }
 0xe57   : > { %6644 = vmatprep.subr.mxu0 %v6860_v1 }
 0xe59   : > { %6637 = vmatmul.mubr.msk.f32.vlgmr.msra.gmra.mxu0 %vm441_vm2, %v7822_v46 }
 0xe5a   : > { %6645 = vmatpush3.msk.msra.mxu0 %vm445_vm1, %v5478_v13  ;;  %6646 = vmatprep.mubr.msk.f32.mxu0 %vm6861_vm0, %v6860_v1 }
 0xe5b   : > { %6654 = vmatprep.subr.mxu0 %v6860_v1 }
 0xe5d   : > { %6647 = vmatmul.mubr.msk.f32.vlgmr.msra.gmra.mxu0 %vm441_vm2, %v7822_v46 }
 0xe5e   : > { %6655 = vmatpush3.msk.msra.mxu0 %vm445_vm1, %v5485_v14  ;;  %6656 = vmatprep.mubr.msk.f32.mxu0 %vm6861_vm0, %v6860_v1 }
 0xe5f   : > { %6664 = vmatprep.subr.mxu0 %v6860_v1 }
 0xe61   : > { %6657 = vmatmul.mubr.msk.f32.vlgmr.msra.gmra.mxu0 %vm441_vm2, %v7822_v46 }
 0xe62   : > { %6665 = vmatpush3.msk.msra.mxu0 %vm445_vm1, %v5492_v15  ;;  %6666 = vmatprep.mubr.msk.f32.mxu0 %vm6861_vm0, %v6860_v1  ;;  %v5458_v15 = vld [vmem:[%s8200_s6 + $0xa] sm:$0x1] }
 0xe65   : > { %6667 = vmatmul.mubr.msk.f32.vlgmr.msra.gmra.mxu0 %vm441_vm2, %v7822_v46  ;;  %v5444_v46 = vld [vmem:[%s8200_s6 + $0x8] sm:$0x1] }
 0xee9   : > { %v2786_v55 = vpop.f32.mrf.mxu0 }
 0xeea   : > { %v2787_v56 = vadd.f32 %v2786_v55, %v2713_v54 }
 0xeeb   : > { %v6518_v57 = vpop.f32.mrf.mxu0 }
 0xeec   : > { %v5391_v59 = vmul.f32 -1.442695, %v2787_v56 }
 0xeed   : > { %v2947_v60 = vpop.f32.mrf.mxu0 }
 0xeee   : > { %6717 = vpow2.f32 %v5391_v59  ;;  %v2948_v61 = vadd.f32 %v5395_v58, %v2947_v60 }
 0xeef   : > { %v6528_v62 = vpop.f32.mrf.mxu0 }
 0xef0   : > { %v5398_v17 = vmul.f32 -1.442695, %v2948_v61  ;;  %v5465_v61 = vld [vmem:[%s8200_s6 + $0xb] sm:$0x1] }
 0xef1   : > { %v3106_v18 = vpop.f32.mrf.mxu0 }
 0xef2   : > { %6719 = vpow2.f32 %v5398_v17  ;;  %v3107_v19 = vadd.f32 %v5402_v63, %v3106_v18 }
 0xef3   : > { %v6538_v20 = vpop.f32.mrf.mxu0 }
 0xef4   : > { %v5405_v22 = vmul.f32 -1.442695, %v3107_v19 }
 0xef5   : > { %v3265_v23 = vpop.f32.mrf.mxu0 }
 0xef6   : > { %6721 = vpow2.f32 %v5405_v22  ;;  %v3266_v24 = vadd.f32 %v5409_v21, %v3265_v23  ;;  %v5472_v22 = vld [vmem:[%s8200_s6 + $0xc] sm:$0x1] }
 0xef7   : > { %v6548_v25 = vpop.f32.mrf.mxu0 }
 0xef8   : > { %v5412_v27 = vmul.f32 -1.442695, %v3266_v24 }
 0xef9   : > { %v3424_v28 = vpop.f32.mrf.mxu0 }
 0xefa   : > { %6723 = vpow2.f32 %v5412_v27  ;;  %v3425_v29 = vadd.f32 %v5416_v26, %v3424_v28 }
 0xefb   : > { %v6718_v30 = vpop.eup %6717  ;;  %v6558_v31 = vpop.f32.mrf.mxu0 }
 0xefc   : > { %v2793_v33 = vadd.f32 1.0, %v6718_v30  ;;  %v5419_v34 = vmul.f32 -1.442695, %v3425_v29  ;;  %v5479_v30 = vld [vmem:[%s8200_s6 + $0xd] sm:$0x1] }
 0xefd   : > { %v3583_v35 = vpop.f32.mrf.mxu0 }
 0xefe   : > { %6725 = vrcp.f32 %v2793_v33  ;;  %v3584_v36 = vadd.f32 %v5423_v32, %v3583_v35 }
 0xeff   : > { %v6720_v37 = vpop.eup %6719  ;;  %6727 = vpow2.f32 %v5419_v34  ;;  %v6568_v38 = vpop.f32.mrf.mxu0 }
 0xf00   : > { %v2954_v40 = vadd.f32 1.0, %v6720_v37  ;;  %v5426_v41 = vmul.f32 -1.442695, %v3584_v36  ;;  %v5486_v38 = vld [vmem:[%s8200_s6 + $0xe] sm:$0x1] }
 0xf01   : > { %v3742_v42 = vpop.f32.mrf.mxu0 }
 0xf02   : > { %6729 = vrcp.f32 %v2954_v40  ;;  %v3743_v43 = vadd.f32 %v5430_v39, %v3742_v42 }
 0xf03   : > { %v6722_v44 = vpop.eup %6721  ;;  %6731 = vpow2.f32 %v5426_v41  ;;  %v6578_v45 = vpop.f32.mrf.mxu0 }
 0xf04   : > { %v3113_v2 = vadd.f32 1.0, %v6722_v44  ;;  %v5433_v3 = vmul.f32 -1.442695, %v3743_v43 }
 0xf05   : > { %v3901_v4 = vpop.f32.mrf.mxu0 }
 0xf06   : > { %6733 = vrcp.f32 %v3113_v2  ;;  %v3902_v5 = vadd.f32 %v5437_v0, %v3901_v4  ;;  %v5493_v0 = vld [vmem:[%s8200_s6 + $0xf] sm:$0x1] }
 0xf07   : > { %v6724_v6 = vpop.eup %6723  ;;  %6735 = vpow2.f32 %v5433_v3  ;;  %v6588_v7 = vpop.f32.mrf.mxu0 }
 0xf08   : > { %v3272_v47 = vadd.f32 1.0, %v6724_v6  ;;  %v5440_v48 = vmul.f32 -1.442695, %v3902_v5 }
 0xf09   : > { %v4060_v49 = vpop.f32.mrf.mxu0 }
 0xf0a   : > { %6737 = vrcp.f32 %v3272_v47  ;;  %v4061_v50 = vadd.f32 %v5444_v46, %v4060_v49 }
 0xf0b   : > { %v6726_v51 = vpop.eup %6725  ;;  %6739 = vpow2.f32 %v5440_v48  ;;  %v6598_v52 = vpop.f32.mrf.mxu0 }
 0xf0c   : > { %v6728_v8 = vpop.eup %6727  ;;  %v5447_v9 = vmul.f32 -1.442695, %v4061_v50  ;;  %6522 = vmatmul.mubr.msk.f32.vlgmr.msra.gmra.mxu1 %vm441_vm2, %v6726_v51 }
 0xf0d   : > { %v3431_v10 = vadd.f32 1.0, %v6728_v8  ;;  %6530 = vmatpush3.msk.msra.mxu1 %vm445_vm1, %v7963_v16  ;;  %v4219_v11 = vpop.f32.mrf.mxu0  ;;  %6531 = vmatprep.mubr.msk.f32.mxu1 %vm6861_vm0, %v6860_v1 }
 0xf0e   : > { %6741 = vpow2.f32 %v5447_v9  ;;  %v4220_v12 = vadd.f32 %v5451_v53, %v4219_v11  ;;  %6539 = vmatprep.subr.mxu1 %v6860_v1 }
 0xf0f   : > { %v6730_v13 = vpop.eup %6729  ;;  %6743 = vrcp.f32 %v3431_v10  ;;  %v6608_v14 = vpop.f32.mrf.mxu0 }
 0xf10   : > { %v6732_v54 = vpop.eup %6731  ;;  %v5454_v55 = vmul.f32 -1.442695, %v4220_v12  ;;  %6532 = vmatmul.mubr.msk.f32.vlgmr.msra.gmra.mxu1 %vm441_vm2, %v6730_v13 }
 0xf11   : > { %v3590_v56 = vadd.f32 1.0, %v6732_v54  ;;  %6540 = vmatpush3.msk.msra.mxu1 %vm445_vm1, %v7963_v16  ;;  %v4378_v57 = vpop.f32.mrf.mxu0  ;;  %6541 = vmatprep.mubr.msk.f32.mxu1 %vm6861_vm0, %v6860_v1 }
 0xf12   : > { %6745 = vpow2.f32 %v5454_v55  ;;  %v4379_v58 = vadd.f32 %v5458_v15, %v4378_v57  ;;  %6549 = vmatprep.subr.mxu1 %v6860_v1 }
 0xf13   : > { %v6734_v59 = vpop.eup %6733  ;;  %6747 = vrcp.f32 %v3590_v56  ;;  %v6618_v60 = vpop.f32.mrf.mxu0 }
 0xf14   : > { %v6736_v62 = vpop.eup %6735  ;;  %v5461_v63 = vmul.f32 -1.442695, %v4379_v58  ;;  %6542 = vmatmul.mubr.msk.f32.vlgmr.msra.gmra.mxu1 %vm441_vm2, %v6734_v59  ;;  %v6797_v59 = vld [vmem:[%s7089_s19] sm:$0x1] }
 0xf15   : > { %v3749_v17 = vadd.f32 1.0, %v6736_v62  ;;  %6550 = vmatpush3.msk.msra.mxu1 %vm445_vm1, %v7963_v16  ;;  %v4537_v18 = vpop.f32.mrf.mxu0  ;;  %6551 = vmatprep.mubr.msk.f32.mxu1 %vm6861_vm0, %v6860_v1  ;;  %v3030_v62 = vld [vmem:[%s7089_s19 + $0x1] sm:$0x1] }
 0xf16   : > { %6749 = vpow2.f32 %v5461_v63  ;;  %v4538_v19 = vadd.f32 %v5465_v61, %v4537_v18  ;;  %6559 = vmatprep.subr.mxu1 %v6860_v1 }
 0xf17   : > { %v6738_v20 = vpop.eup %6737  ;;  %6751 = vrcp.f32 %v3749_v17  ;;  %v6628_v21 = vpop.f32.mrf.mxu0  ;;  %v3189_v17 = vld [vmem:[%s7089_s19 + $0x2] sm:$0x1] }
 0xf18   : > { %v6740_v23 = vpop.eup %6739  ;;  %v5468_v24 = vmul.f32 -1.442695, %v4538_v19  ;;  %6552 = vmatmul.mubr.msk.f32.vlgmr.msra.gmra.mxu1 %vm441_vm2, %v6738_v20  ;;  %v3348_v21 = vld [vmem:[%s7089_s19 + $0x3] sm:$0x1] }
 0xf19   : > { %v3908_v25 = vadd.f32 1.0, %v6740_v23  ;;  %6560 = vmatpush3.msk.msra.mxu1 %vm445_vm1, %v7963_v16  ;;  %v4696_v26 = vpop.f32.mrf.mxu0  ;;  %6561 = vmatprep.mubr.msk.f32.mxu1 %vm6861_vm0, %v6860_v1 }
 0xf1a   : > { %6753 = vpow2.f32 %v5468_v24  ;;  %v4697_v27 = vadd.f32 %v5472_v22, %v4696_v26  ;;  %6569 = vmatprep.subr.mxu1 %v6860_v1 }
 0xf1b   : > { %v6742_v28 = vpop.eup %6741  ;;  %6755 = vrcp.f32 %v3908_v25  ;;  %v6638_v29 = vpop.f32.mrf.mxu0  ;;  %v3507_v25 = vld [vmem:[%s7089_s19 + $0x4] sm:$0x1] }
 0xf1c   : > { %v6744_v31 = vpop.eup %6743  ;;  %v4067_v32 = vadd.f32 1.0, %v6742_v28  ;;  %v5475_v33 = vmul.f32 -1.442695, %v4697_v27  ;;  %v3666_v29 = vld [vmem:[%s7089_s19 + $0x5] sm:$0x1] }
 0xf1d   : > { %6562 = vmatmul.mubr.msk.f32.vlgmr.msra.gmra.mxu1 %vm441_vm2, %v6744_v31  ;;  %v4855_v34 = vpop.f32.mrf.mxu0 }
 0xf1e   : > { %6757 = vrcp.f32 %v4067_v32  ;;  %6570 = vmatpush3.msk.msra.mxu1 %vm445_vm1, %v7963_v16  ;;  %v4856_v35 = vadd.f32 %v5479_v30, %v4855_v34  ;;  %6571 = vmatprep.mubr.msk.f32.mxu1 %vm6861_vm0, %v6860_v1 }
 0xf1f   : > { %v6746_v36 = vpop.eup %6745  ;;  %6759 = vpow2.f32 %v5475_v33  ;;  %6579 = vmatprep.subr.mxu1 %v6860_v1  ;;  %v6648_v37 = vpop.f32.mrf.mxu0  ;;  %v3825_v33 = vld [vmem:[%s7089_s19 + $0x6] sm:$0x1] }
 0xf20   : > { %v6748_v39 = vpop.eup %6747  ;;  %v4226_v40 = vadd.f32 1.0, %v6746_v36  ;;  %v5482_v41 = vmul.f32 -1.442695, %v4856_v35  ;;  %v3984_v37 = vld [vmem:[%s7089_s19 + $0x7] sm:$0x1] }
 0xf21   : > { %6572 = vmatmul.mubr.msk.f32.vlgmr.msra.gmra.mxu1 %vm441_vm2, %v6748_v39  ;;  %v5014_v42 = vpop.f32.mrf.mxu0 }
 0xf22   : > { %6761 = vrcp.f32 %v4226_v40  ;;  %6580 = vmatpush3.msk.msra.mxu1 %vm445_vm1, %v7963_v16  ;;  %v5015_v43 = vadd.f32 %v5486_v38, %v5014_v42  ;;  %6581 = vmatprep.mubr.msk.f32.mxu1 %vm6861_vm0, %v6860_v1 }
 0xf23   : > { %v6750_v44 = vpop.eup %6749  ;;  %6763 = vpow2.f32 %v5482_v41  ;;  %6589 = vmatprep.subr.mxu1 %v6860_v1  ;;  %v6658_v45 = vpop.f32.mrf.mxu0  ;;  %v4143_v41 = vld [vmem:[%s7089_s19 + $0x8] sm:$0x1] }
 0xf24   : > { %v6752_v2 = vpop.eup %6751  ;;  %v4385_v3 = vadd.f32 1.0, %v6750_v44  ;;  %v5489_v4 = vmul.f32 -1.442695, %v5015_v43  ;;  %v4302_v45 = vld [vmem:[%s7089_s19 + $0x9] sm:$0x1] }
 0xf25   : > { %6582 = vmatmul.mubr.msk.f32.vlgmr.msra.gmra.mxu1 %vm441_vm2, %v6752_v2  ;;  %v5173_v5 = vpop.f32.mrf.mxu0 }
 0xf26   : > { %6765 = vrcp.f32 %v4385_v3  ;;  %6590 = vmatpush3.msk.msra.mxu1 %vm445_vm1, %v7963_v16  ;;  %v5174_v6 = vadd.f32 %v5493_v0, %v5173_v5  ;;  %6591 = vmatprep.mubr.msk.f32.mxu1 %vm6861_vm0, %v6860_v1 }
 0xf27   : > { %v6754_v7 = vpop.eup %6753  ;;  %6767 = vpow2.f32 %v5489_v4  ;;  %6599 = vmatprep.subr.mxu1 %v6860_v1  ;;  %v6668_v46 = vpop.f32.mrf.mxu0  ;;  %v4461_v4 = vld [vmem:[%s7089_s19 + $0xa] sm:$0x1] }
 0xf28   : > { %v6756_v47 = vpop.eup %6755  ;;  %v4544_v48 = vadd.f32 1.0, %v6754_v7  ;;  %v5496_v49 = vmul.f32 -1.442695, %v5174_v6  ;;  %v4620_v46 = vld [vmem:[%s7089_s19 + $0xb] sm:$0x1] }
 0xf29   : > { %6592 = vmatmul.mubr.msk.f32.vlgmr.msra.gmra.mxu1 %vm441_vm2, %v6756_v47 }
 0xf2a   : > { %6769 = vrcp.f32 %v4544_v48  ;;  %6600 = vmatpush3.msk.msra.mxu1 %vm445_vm1, %v7963_v16  ;;  %6601 = vmatprep.mubr.msk.f32.mxu1 %vm6861_vm0, %v6860_v1 }
 0xf2b   : > { %v6758_v50 = vpop.eup %6757  ;;  %6771 = vpow2.f32 %v5496_v49  ;;  %6609 = vmatprep.subr.mxu1 %v6860_v1 }
 0xf2c   : > { %v6760_v51 = vpop.eup %6759 }
 0xf2d   : > { %v4703_v52 = vadd.f32 1.0, %v6760_v51  ;;  %6602 = vmatmul.mubr.msk.f32.vlgmr.msra.gmra.mxu1 %vm441_vm2, %v6758_v50  ;;  %v4779_v50 = vld [vmem:[%s7089_s19 + $0xc] sm:$0x1] }
 0xf2e   : > { %6610 = vmatpush3.msk.msra.mxu1 %vm445_vm1, %v7963_v16  ;;  %6611 = vmatprep.mubr.msk.f32.mxu1 %vm6861_vm0, %v6860_v1 }
 0xf2f   : > { %v6762_v53 = vpop.eup %6761  ;;  %6773 = vrcp.f32 %v4703_v52  ;;  %6619 = vmatprep.subr.mxu1 %v6860_v1 }
 0xf30   : > { %v6764_v8 = vpop.eup %6763 }
 0xf31   : > { %v4862_v9 = vadd.f32 1.0, %v6764_v8  ;;  %6612 = vmatmul.mubr.msk.f32.vlgmr.msra.gmra.mxu1 %vm441_vm2, %v6762_v53  ;;  %v4938_v8 = vld [vmem:[%s7089_s19 + $0xd] sm:$0x1] }
 0xf32   : > { %6620 = vmatpush3.msk.msra.mxu1 %vm445_vm1, %v7963_v16  ;;  %6621 = vmatprep.mubr.msk.f32.mxu1 %vm6861_vm0, %v6860_v1 }
 0xf33   : > { %v6766_v10 = vpop.eup %6765  ;;  %6775 = vrcp.f32 %v4862_v9  ;;  %6629 = vmatprep.subr.mxu1 %v6860_v1 }
 0xf34   : > { %v6768_v11 = vpop.eup %6767 }
 0xf35   : > { %v5021_v12 = vadd.f32 1.0, %v6768_v11  ;;  %6622 = vmatmul.mubr.msk.f32.vlgmr.msra.gmra.mxu1 %vm441_vm2, %v6766_v10 }
 0xf36   : > { %6630 = vmatpush3.msk.msra.mxu1 %vm445_vm1, %v7963_v16  ;;  %6631 = vmatprep.mubr.msk.f32.mxu1 %vm6861_vm0, %v6860_v1 }
 0xf37   : > { %v6770_v13 = vpop.eup %6769  ;;  %6777 = vrcp.f32 %v5021_v12  ;;  %6639 = vmatprep.subr.mxu1 %v6860_v1  ;;  %v5097_v12 = vld [vmem:[%s7089_s19 + $0xe] sm:$0x1] }
 0xf38   : > { %v6772_v14 = vpop.eup %6771 }
 0xf39   : > { %v5180_v15 = vadd.f32 1.0, %v6772_v14  ;;  %6632 = vmatmul.mubr.msk.f32.vlgmr.msra.gmra.mxu1 %vm441_vm2, %v6770_v13 }
 0xf3a   : > { %6640 = vmatpush3.msk.msra.mxu1 %vm445_vm1, %v7963_v16  ;;  %6641 = vmatprep.mubr.msk.f32.mxu1 %vm6861_vm0, %v6860_v1 }
 0xf3b   : > { %6779 = vrcp.f32 %v5180_v15  ;;  %6649 = vmatprep.subr.mxu1 %v6860_v1 }
 0xf3c   : > { %v6774_v54 = vpop.eup %6773 }
 0xf3d   : > { %6642 = vmatmul.mubr.msk.f32.vlgmr.msra.gmra.mxu1 %vm441_vm2, %v6774_v54  ;;  %v5256_v54 = vld [vmem:[%s7089_s19 + $0xf] sm:$0x1]  ;;  %s6862_s19 = smov [#allocation2]  }
 0xf3e   : > { %6650 = vmatpush3.msk.msra.mxu1 %vm445_vm1, %v7963_v16  ;;  %6651 = vmatprep.mubr.msk.f32.mxu1 %vm6861_vm0, %v6860_v1  ;;  %s6802_s20 = sshll.u32 %s6862_s19, 4  ;;  %s6803_s20 = int_to_ptr.vmem [resolvable:$false] %s6802_s20 }
 0xf3f   : > { %6659 = vmatprep.subr.mxu1 %v6860_v1  ;;  %s6804_s21 = scalar_lea.vmem %s6803_s20, 512  ;;  %p6805_p0 = scmp.lt.s32.totalorder %s8149_s14, %s6803_s20 }
 0xf40   : > { %v6776_v55 = vpop.eup %6775  ;;  %p6806_p1 = scmp.lt.s32.totalorder %s6804_s21, %s6798_s18 }
 0xf41   : > { %6652 = vmatmul.mubr.msk.f32.vlgmr.msra.gmra.mxu1 %vm441_vm2, %v6776_v55 }
 0xf42   : > { %6660 = vmatpush3.msk.msra.mxu1 %vm445_vm1, %v7963_v16  ;;  %6661 = vmatprep.mubr.msk.f32.mxu1 %vm6861_vm0, %v6860_v1  ;;  %p6807_p2 = por %p6806_p1, %p6805_p0 }
 0xf43   : > { %6669 = vmatprep.subr.mxu1 %v6860_v1 }
 0xf44   : > { %v6778_v56 = vpop.eup %6777  ;;  %p6808_p3 = pnand %p6807_p2, %p6801_p13 }
 0xf45   : > { %6662 = vmatmul.mubr.msk.f32.vlgmr.msra.gmra.mxu1 %vm441_vm2, %v6778_v56 }
 0xf46   : > { %6670 = vmatpush3.msk.msra.mxu1 %vm445_vm1, %v7963_v16  ;;  %6671 = vmatprep.mubr.msk.f32.mxu1 %vm6861_vm0, %v6860_v1 }
 0xf48   : > { %v6780_v57 = vpop.eup %6779 }
 0xf49   : > { %6672 = vmatmul.mubr.msk.f32.vlgmr.msra.gmra.mxu1 %vm441_vm2, %v6780_v57 }
 0xfcc   : > { %v2868_v58 = vpop.f32.mrf.mxu1 }
 0xfcd   : > { %v2872_v60 = vmul.f32 %v6797_v59, %v2868_v58 }
 0xfce   : > { %v6523_v61 = vpop.f32.mrf.mxu1 }
 0xfcf   : > { %2873 = vst [vmem:[%s8111_s9] sm:$0x1] %v2872_v60 }
 0xfd0   : > { %v3026_v1 = vpop.f32.mrf.mxu1 }
 0xfd1   : > { %v3031_v16 = vmul.f32 %v3030_v62, %v3026_v1 }
 0xfd2   : > { %v6533_v63 = vpop.f32.mrf.mxu1 }
 0xfd3   : > { %3032 = vst [vmem:[%s8111_s9 + $0x1] sm:$0x1] %v3031_v16 }
 0xfd4   : > { %v3185_v18 = vpop.f32.mrf.mxu1 }
 0xfd5   : > { %v3190_v19 = vmul.f32 %v3189_v17, %v3185_v18 }
 0xfd6   : > { %v6543_v20 = vpop.f32.mrf.mxu1 }
 0xfd7   : > { %3191 = vst [vmem:[%s8111_s9 + $0x2] sm:$0x1] %v3190_v19 }
 0xfd8   : > { %v3344_v22 = vpop.f32.mrf.mxu1 }
 0xfd9   : > { %v3349_v23 = vmul.f32 %v3348_v21, %v3344_v22 }
 0xfda   : > { %v6553_v24 = vpop.f32.mrf.mxu1 }
 0xfdb   : > { %3350 = vst [vmem:[%s8111_s9 + $0x3] sm:$0x1] %v3349_v23 }
 0xfdd   : > { %v3503_v26 = vpop.f32.mrf.mxu1 }
 0xfde   : > { %v3508_v27 = vmul.f32 %v3507_v25, %v3503_v26 }
 0xfdf   : > { %v6563_v28 = vpop.f32.mrf.mxu1 }
 0xfe0   : > { %3509 = vst [vmem:[%s8111_s9 + $0x4] sm:$0x1] %v3508_v27 }
 0xfe1   : > { %v3662_v30 = vpop.f32.mrf.mxu1 }
 0xfe2   : > { %v3667_v31 = vmul.f32 %v3666_v29, %v3662_v30 }
 0xfe3   : > { %v6573_v32 = vpop.f32.mrf.mxu1 }
 0xfe4   : > { %3668 = vst [vmem:[%s8111_s9 + $0x5] sm:$0x1] %v3667_v31 }
 0xfe5   : > { %v3821_v34 = vpop.f32.mrf.mxu1 }
 0xfe6   : > { %v3826_v35 = vmul.f32 %v3825_v33, %v3821_v34 }
 0xfe7   : > { %v6583_v36 = vpop.f32.mrf.mxu1 }
 0xfe8   : > { %3827 = vst [vmem:[%s8111_s9 + $0x6] sm:$0x1] %v3826_v35 }
 0xfe9   : > { %v3980_v38 = vpop.f32.mrf.mxu1 }
 0xfea   : > { %v3985_v39 = vmul.f32 %v3984_v37, %v3980_v38 }
 0xfeb   : > { %v6593_v40 = vpop.f32.mrf.mxu1 }
 0xfec   : > { %3986 = vst [vmem:[%s8111_s9 + $0x7] sm:$0x1] %v3985_v39 }
 0xfed   : > { %v4139_v42 = vpop.f32.mrf.mxu1 }
 0xfee   : > { %v4144_v43 = vmul.f32 %v4143_v41, %v4139_v42 }
 0xfef   : > { %v6603_v44 = vpop.f32.mrf.mxu1 }
 0xff0   : > { %4145 = vst [vmem:[%s8111_s9 + $0x8] sm:$0x1] %v4144_v43 }
 0xff1   : > { %v4298_v0 = vpop.f32.mrf.mxu1 }
 0xff2   : > { %v4303_v2 = vmul.f32 %v4302_v45, %v4298_v0 }
 0xff3   : > { %v6613_v3 = vpop.f32.mrf.mxu1 }
 0xff4   : > { %4304 = vst [vmem:[%s8111_s9 + $0x9] sm:$0x1] %v4303_v2 }
 0xff5   : > { %v4457_v5 = vpop.f32.mrf.mxu1 }
 0xff6   : > { %v4462_v6 = vmul.f32 %v4461_v4, %v4457_v5 }
 0xff7   : > { %v6623_v7 = vpop.f32.mrf.mxu1 }
 0xff8   : > { %4463 = vst [vmem:[%s8111_s9 + $0xa] sm:$0x1] %v4462_v6 }
 0xff9   : > { %v4616_v47 = vpop.f32.mrf.mxu1 }
 0xffa   : > { %v4621_v48 = vmul.f32 %v4620_v46, %v4616_v47 }
 0xffb   : > { %v6633_v49 = vpop.f32.mrf.mxu1 }
 0xffc   : > { %4622 = vst [vmem:[%s8111_s9 + $0xb] sm:$0x1] %v4621_v48 }
 0xffd   : > { %v4775_v51 = vpop.f32.mrf.mxu1 }
 0xffe   : > { %v4780_v52 = vmul.f32 %v4779_v50, %v4775_v51 }
 0xfff   : > { %v6643_v53 = vpop.f32.mrf.mxu1 }
0x1000   : > { %4781 = vst [vmem:[%s8111_s9 + $0xc] sm:$0x1] %v4780_v52 }
0x1001   : > { %v4934_v9 = vpop.f32.mrf.mxu1 }
0x1002   : > { %v4939_v10 = vmul.f32 %v4938_v8, %v4934_v9 }
0x1003   : > { %v6653_v11 = vpop.f32.mrf.mxu1 }
0x1004   : > { %4940 = vst [vmem:[%s8111_s9 + $0xd] sm:$0x1] %v4939_v10 }
0x1005   : > { %v5093_v13 = vpop.f32.mrf.mxu1 }
0x1006   : > { %v5098_v14 = vmul.f32 %v5097_v12, %v5093_v13 }
0x1007   : > { %v6663_v15 = vpop.f32.mrf.mxu1 }
0x1008   : > { %5099 = vst [vmem:[%s8111_s9 + $0xe] sm:$0x1] %v5098_v14 }
0x1009   : > { %v5252_v55 = vpop.f32.mrf.mxu1 }
0x100a   : > { %v5257_v56 = vmul.f32 %v5256_v54, %v5252_v55 }
0x100b   : > { %v6673_v57 = vpop.f32.mrf.mxu1 }
0x100c   : > { %5258 = vst [vmem:[%s8111_s9 + $0xf] sm:$0x1] %v5257_v56 }
0x100d   : > { %6811 = shalt.err (!%p6808_p3)
}
0x100e   : > { %s6812_s22 = scalar_lea.hbm %s8147_s17, 256  ;;  %s6816_s8 = scalar_lea.hbm %s8201_s7, 512 }
0x100f   : > { %p6813_p4 = scmp.ne.s32.totalorder %s8147_s17, %s6812_s22  ;;  %p6817_p9 = scmp.lt.s32.totalorder %s8147_s17, %s8201_s7 }
0x1010   : > { %p6818_p10 = scmp.lt.s32.totalorder %s6816_s8, %s6812_s22 }
0x1011   : > { %p6814_p7 = pnand %p6813_p4, %p6943_p5 }
0x1012   : > { %p6819_p11 = por %p6818_p10, %p6817_p9 }
0x1013   : > { %p6815_p8 = pneg %p6814_p7 }
0x1015   : > { %p6820_p12 = pnand %p6819_p11, %p6815_p8 }
0x1017   : > { %6823 = shalt.err (!%p6820_p12)
}
0x1018   : > { %s6863_s15 = smov 128   ;;  %s6864_s16 = smov 8  }
0x1019   : > { %6674 = dma.vmem_to_hbm [thread:$0]  (%p6943_p5), %s8149_s14, 256, %s8147_s17, %s8154_s28, %s6863_s15, %s6863_s15, %s6864_s16  }
0x101a PF: > { %p6680_p13 = scmp.ge.s32.totalorder %s6858_s27, 2  ;;  %s5288_s18 = sand.u32 1, %s6846_s24  }
0x101b   : > { %s5289_s19 = scalar_lea.sflag [#allocation3], %s5288_s18 }
0x101c   : > { %p6677_p0 = pnand %p6680_p13, %p6947_p6 }
0x101e   : > { %p6678_p1 = pneg %p6677_p0 }
0x1020   : > { %6841 = dma.done.wait (%p6678_p1), %s5289_s19, 256  }
0x1021   : > { %6843 = vsyncadd (%p6678_p1), %s5289_s19, 4294967040  ;;  %p17_p2 = scmp.ge.s32.totalorder %s6930_s30, 4   ;;  %s8204_s24 = smov %s6850_s25 }
0x1022   : > { %s8205_s25 = smov %s6854_s26  ;;  %s8206_s26 = smov %s6941_s10 }
0x1023   : > { %s8207_s27 = smov %s6930_s30  ;;  %19 = sbr.rel (!%p17_p2) target bundleno = 3 (0x3), region = 128 }
0x1028   :  { %5294 = vsyncpa [#allocation3], 1 }
0x1029   :  { %5296 = vsyncpa [#allocation3 + $0x1], 1 }

</bundles_post_ra>
